<compile_context>
chip_gen: v5e
topology: v5e:2x2
jax: 0.10.0
libtpu: 0.0.40
codegen_flags: <defaults>
</compile_context>

<pallas_src>
import functools
import math

import jax
import jax.numpy as jnp
from jax.experimental import pallas as pl
from jax.experimental.pallas import tpu as pltpu


def _round_up(x, m):
    return (x + m - 1) // m * m


# --------------------------------- kernel ------------------------------------
def _fused_kernel(data_ref, p_ref, o_ref, *, depth, C, n, din0, sec0, rblk,
                  we_off):
    """All `depth` TransformerConv layers for Bt batch elements (one grid step)."""
    C4 = 4 * C
    blk = data_ref[...]                                   # (Bt, n, 2n + din0)
    Bt = blk.shape[0]

    # Wrapper packed edge/A pre-transposed -> only the [t, s] orientation exists.
    adjT = blk[:, :, 0:n] * blk[:, :, n:2 * n]            # adjT[b,t,s] = edge[s,t]*A[s,t]
    x0 = blk[:, :, 2 * n:2 * n + din0]                    # (Bt, n, din0)
    mask = adjT != jnp.float32(0.0)                       # dense_to_sparse drops zeros
    neg_big = jnp.float32(-1e30)
    scale = jnp.float32(1.0 / math.sqrt(C))

    def attend(proj, we_row):
        # proj = [q | k | v | skip] lane-packed as (Bt, n, 4C); we_row is (1, C).
        q = proj[:, :, 0 * C:1 * C]
        k = proj[:, :, 1 * C:2 * C]
        v = proj[:, :, 2 * C:3 * C]
        skip = proj[:, :, 3 * C:4 * C]

        # Batched q.k^T (contract feature axis) — fills sublanes across batch.
        s = jnp.einsum('btc,bsc->bts', q, k,
                       preferred_element_type=jnp.float32)        # (Bt, n_t, n_s)
        # q . we^T as a VPU/XLU lane reduction (no N=1 matmul).
        qe = jnp.sum(q * we_row, axis=-1, keepdims=True)          # (Bt, n_t, 1)
        scores = (s + adjT * qe) * scale

        # Masked softmax over sources s (rows with no edges -> alpha == 0).
        masked = jnp.where(mask, scores, neg_big)
        m = jnp.max(masked, axis=-1, keepdims=True)
        p = jnp.where(mask, jnp.exp(masked - m), jnp.float32(0.0))
        denom = jnp.sum(p, axis=-1, keepdims=True)
        alpha = p / (denom + jnp.float32(1e-16))

        # out[t] = sum_s alpha[t,s] * (v_s + adj[s,t] * we) + skip[t]
        ae = jnp.sum(alpha * adjT, axis=-1, keepdims=True)        # (Bt, n_t, 1)
        msg = jnp.einsum('bts,bsc->btc', alpha, v,
                         preferred_element_type=jnp.float32)
        return msg + ae * we_row + skip

    # ---- layer 0: din0 == 1 -> broadcast multiply on the VPU.
    w0 = p_ref[0:din0, :]                                  # (din0, 4C)
    b0 = p_ref[din0:din0 + 1, :]                           # (1, 4C)
    if din0 == 1:
        proj = x0 * w0 + b0                                # (Bt, n, 4C)
    else:
        proj = (jnp.dot(x0.reshape(Bt * n, din0), w0,
                        preferred_element_type=jnp.float32) + b0
                ).reshape(Bt, n, C4)
    x = attend(proj, p_ref[we_off:we_off + 1, 0:C])        # (Bt, n, C)

    # ---- layers 1..depth-1: unrolled (depth is small); activation never leaves VMEM.
    for j in range(1, depth):
        base = sec0 + (j - 1) * rblk
        wj = p_ref[base:base + C, :]                       # (C, 4C), 8-row aligned
        bj = p_ref[base + C:base + C + 1, :]               # (1, 4C)
        proj = (jnp.dot(x.reshape(Bt * n, C), wj,
                        preferred_element_type=jnp.float32) + bj
                ).reshape(Bt, n, C4)
        x = attend(proj, p_ref[we_off + j:we_off + j + 1, 0:C])

    # Lane-dense store: one (Bt, 1, n*C) row per step (n*C = 128 here).
    o_ref[...] = x.reshape(Bt, 1, n * C)


# ----------------------------- packing helpers --------------------------------
def _pack_params(params):
    """Pack all depth*9 parameters into ONE (rows, 4C) slab, 8-row aligned."""
    depth = len(params)
    din0 = params[0]["wq"].shape[0]
    C = params[0]["wq"].shape[1]
    C4 = 4 * C
    for p in params:
        assert p["wq"].shape[1] == C, "fused kernel assumes uniform hidden width"
    for p in params[1:]:
        assert p["wq"].shape[0] == C, "chained layers must have in_dim == C"

    def wcat(p):
        return jnp.concatenate([p[k] for k in ("wq", "wk", "wv", "wskip")], axis=1)

    def bcat(p):
        return jnp.concatenate([p[k] for k in ("bq", "bk", "bv", "bskip")], axis=1)

    def padrows(x, r):
        return jnp.pad(x, ((0, r - x.shape[0]), (0, 0)))

    sec0 = _round_up(din0 + 1, 8)               # layer-0 [w0; b0] section
    rblk = _round_up(C + 1, 8)                  # per-layer [wr; br] section
    blocks = [padrows(jnp.concatenate([wcat(params[0]), bcat(params[0])], 0), sec0)]
    for p in params[1:]:
        blocks.append(padrows(jnp.concatenate([wcat(p), bcat(p)], 0), rblk))
    we_off = sec0 + (depth - 1) * rblk
    we = jnp.concatenate([p["we"] for p in params], axis=0)        # (depth, C)
    we = jnp.pad(we, ((0, _round_up(depth, 8) - depth), (0, C4 - C)))
    blocks.append(we)
    slab = jnp.concatenate(blocks, axis=0).astype(jnp.float32)
    meta = dict(depth=depth, C=C, din0=din0, sec0=sec0, rblk=rblk, we_off=we_off)
    return slab, meta


def _grid_blocks(b):
    """2 parallel batch blocks only on two-TensorCore chips (v7x); else 1."""
    try:
        kind = jax.devices()[0].device_kind.lower()
    except Exception:
        kind = ""
    two_tc = ("v7" in kind) or ("tpu7" in kind) or ("7x" in kind)
    if two_tc and b >= 2 and b % 2 == 0:
        return 2
    return 1


# --------------------------------- wrapper ------------------------------------
@jax.jit
def transformer_conv_layer(node, edge, A, params):
    """Full TransformerConvLayer.forward as a single fused pallas_call."""
    b, n, din0 = node.shape
    pslab, meta = _pack_params(params)
    assert meta["din0"] == din0
    C = meta["C"]

    # ONE per-batch data slab: [edge^T | A^T | node]. Transposing while packing
    # keeps only the [t, s] adjacency orientation on-chip (no in-kernel transpose).
    data = jnp.concatenate(
        [jnp.swapaxes(edge, 1, 2), jnp.swapaxes(A, 1, 2), node], axis=-1
    ).astype(jnp.float32)                                   # (b, n, 2n + din0)

    nblk = _grid_blocks(b)                                  # 1 on v5e/v6e, 2 on v7x
    Bt = b // nblk

    kernel = functools.partial(_fused_kernel, n=n, **meta)

    out = pl.pallas_call(
        kernel,
        out_shape=jax.ShapeDtypeStruct((b, 1, n * C), jnp.float32),
        grid=(nblk,),
        in_specs=[
            pl.BlockSpec((Bt, n, 2 * n + din0), lambda i: (i, 0, 0)),  # data slab
            pl.BlockSpec(pslab.shape, lambda i: (0, 0)),               # param slab
        ],
        out_specs=pl.BlockSpec((Bt, 1, n * C), lambda i: (i, 0, 0)),
        compiler_params=pltpu.CompilerParams(
            dimension_semantics=("parallel",)),              # both TCs busy on v7x
    )(data, pslab)
    return out.reshape(b, n, C)


# ---------------- pure-JAX reference (for correctness check only) -------------
def _ref_layer(x, adj, p):
    C = p["wq"].shape[1]
    q = x @ p["wq"] + p["bq"]
    k = x @ p["wk"] + p["bk"]
    v = x @ p["wv"] + p["bv"]
    we = p["we"]
    adjT = adj.T
    scores = (q @ k.T + adjT * (q @ we.T)) / math.sqrt(C)
    mask = adjT != 0.0
    masked = jnp.where(mask, scores, -1e30)
    m = jnp.max(masked, axis=-1, keepdims=True)
    pm = jnp.where(mask, jnp.exp(masked - m), 0.0)
    alpha = pm / (jnp.sum(pm, axis=-1, keepdims=True) + 1e-16)
    out = alpha @ v + jnp.sum(alpha * adjT, axis=-1, keepdims=True) * we
    return out + x @ p["wskip"] + p["bskip"]


def _ref_forward(node, edge, A, params):
    b = node.shape[0]
    outs = []
    for i in range(b):
        x = node[i]
        adj = edge[i] * A[i]
        for p in params:
            x = _ref_layer(x, adj, p)
        outs.append(x)
    return jnp.stack(outs, axis=0)


# ------------------------------------------------------------------------------
def make_params(key, in_dim, out_dim, head, depth):
    params = []
    for i in range(depth):
        din, C = in_dim[i], out_dim[i] * head
        key, *ks = jax.random.split(key, 10)
        scale = 1.0 / math.sqrt(max(din, 1))
        params.append(dict(
            wq=jax.random.normal(ks[0], (din, C), jnp.float32) * scale,
            bq=jax.random.normal(ks[1], (1, C), jnp.float32) * 0.01,
            wk=jax.random.normal(ks[2], (din, C), jnp.float32) * scale,
            bk=jax.random.normal(ks[3], (1, C), jnp.float32) * 0.01,
            wv=jax.random.normal(ks[4], (din, C), jnp.float32) * scale,
            bv=jax.random.normal(ks[5], (1, C), jnp.float32) * 0.01,
            we=jax.random.normal(ks[6], (1, C), jnp.float32),       # lin_edge, no bias
            wskip=jax.random.normal(ks[7], (din, C), jnp.float32) * scale,
            bskip=jax.random.normal(ks[8], (1, C), jnp.float32) * 0.01,
        ))
    return params


if __name__ == "__main__":
    b, n, depth, head = 2, 16, 6, 1
    in_dim = [1, 8, 8, 8, 8, 8]       # in_dim[i+1] == out_dim[i] * head (chained layers)
    out_dim = [8, 8, 8, 8, 8, 8]

    key = jax.random.PRNGKey(0)
    k_node, k_edge, k_A, k_par = jax.random.split(key, 4)
    node = jax.random.normal(k_node, (b, n, 1), jnp.float32)            # b n 1
    edge = jax.random.normal(k_edge, (b, n, n), jnp.float32)            # b n n
    A = (jax.random.uniform(k_A, (b, n, n)) < 0.5).astype(jnp.float32)  # b n n (0/1)

    params = make_params(k_par, in_dim, out_dim, head, depth)

    out = jax.block_until_ready(transformer_conv_layer(node, edge, A, params))
    ref = _ref_forward(node, edge, A, params)

    assert out.shape == (b, n, out_dim[-1] * head)
    assert jnp.all(jnp.isfinite(out))
    assert jnp.allclose(out, ref, atol=1e-4, rtol=1e-4)
    print("KERNEL_OK")
</pallas_src>

<mosaic_0001>
module attributes {stable_mosaic.version = 11 : i64} {
  func.func @_fused_kernel(%arg0: i32, %arg1: memref<2x16x33xf32, #tpu.memory_space<vmem>>, %arg2: memref<96x32xf32, #tpu.memory_space<vmem>>, %arg3: memref<2x1x128xf32, #tpu.memory_space<vmem>>) attributes {dimension_semantics = [#tpu.dimension_semantics<parallel>], iteration_bounds = array<i64: 1>, scalar_prefetch = 0 : i64, scratch_operands = 0 : i64, tpu.core_type = #tpu.core_type<tc>, window_params = [{transform_indices = @transform_0, window_bounds = array<i64: 2, 16, 33>}, {pipeline_mode = #tpu.pipeline_mode<synchronous>, transform_indices = @transform_1, window_bounds = array<i64: 96, 32>}, {transform_indices = @transform_2, window_bounds = array<i64: 2, 1, 128>}]} {
    %c0 = arith.constant 0 : index
    %c0_0 = arith.constant 0 : index
    %c0_1 = arith.constant 0 : index
    %0 = vector.load %arg1[%c0, %c0_0, %c0_1] : memref<2x16x33xf32, #tpu.memory_space<vmem>>, vector<2x16x33xf32>
    %1 = vector.extract_strided_slice %0 {offsets = [0, 0, 0], sizes = [2, 16, 16], strides = [1, 1, 1]} : vector<2x16x33xf32> to vector<2x16x16xf32>
    %2 = vector.extract_strided_slice %0 {offsets = [0, 0, 16], sizes = [2, 16, 16], strides = [1, 1, 1]} : vector<2x16x33xf32> to vector<2x16x16xf32>
    %3 = arith.mulf %1, %2 : vector<2x16x16xf32>
    %4 = vector.extract_strided_slice %0 {offsets = [0, 0, 32], sizes = [2, 16, 1], strides = [1, 1, 1]} : vector<2x16x33xf32> to vector<2x16x1xf32>
    %cst = arith.constant 0.000000e+00 : f32
    %5 = vector.broadcast %cst : f32 to vector<2x16x16xf32>
    %6 = arith.cmpf one, %3, %5 : vector<2x16x16xf32>
    %c0_2 = arith.constant 0 : index
    %c0_3 = arith.constant 0 : index
    %7 = vector.load %arg2[%c0_2, %c0_3] : memref<96x32xf32, #tpu.memory_space<vmem>>, vector<1x32xf32>
    %c1 = arith.constant 1 : index
    %c0_4 = arith.constant 0 : index
    %8 = vector.load %arg2[%c1, %c0_4] : memref<96x32xf32, #tpu.memory_space<vmem>>, vector<1x32xf32>
    %9 = vector.shape_cast %7 : vector<1x32xf32> to vector<1x1x32xf32>
    %10 = vector.broadcast %4 : vector<2x16x1xf32> to vector<2x16x32xf32>
    %11 = vector.broadcast %9 : vector<1x1x32xf32> to vector<2x16x32xf32>
    %12 = arith.mulf %10, %11 : vector<2x16x32xf32>
    %13 = vector.shape_cast %8 : vector<1x32xf32> to vector<1x1x32xf32>
    %14 = vector.broadcast %13 : vector<1x1x32xf32> to vector<2x16x32xf32>
    %15 = arith.addf %12, %14 : vector<2x16x32xf32>
    %c88 = arith.constant 88 : index
    %c0_5 = arith.constant 0 : index
    %16 = vector.load %arg2[%c88, %c0_5] : memref<96x32xf32, #tpu.memory_space<vmem>>, vector<1x8xf32>
    %17 = vector.extract_strided_slice %15 {offsets = [0, 0, 0], sizes = [2, 16, 8], strides = [1, 1, 1]} : vector<2x16x32xf32> to vector<2x16x8xf32>
    %18 = vector.extract_strided_slice %15 {offsets = [0, 0, 8], sizes = [2, 16, 8], strides = [1, 1, 1]} : vector<2x16x32xf32> to vector<2x16x8xf32>
    %19 = vector.extract_strided_slice %15 {offsets = [0, 0, 16], sizes = [2, 16, 8], strides = [1, 1, 1]} : vector<2x16x32xf32> to vector<2x16x8xf32>
    %20 = vector.extract_strided_slice %15 {offsets = [0, 0, 24], sizes = [2, 16, 8], strides = [1, 1, 1]} : vector<2x16x32xf32> to vector<2x16x8xf32>
    "tpu.trace_start"() <{level = 10 : i32, message = "btc,bsc->bts"}> : () -> ()
    %cst_6 = arith.constant dense<0.000000e+00> : vector<2x16x16xf32>
    %21 = tpu.matmul %17, %18, %cst_6 {dimension_numbers = #tpu.dot_dimension_numbers<[2], [2], [1], [1], [0, 0, 0, 1, 1, 1], [0], [0]>} : vector<2x16x8xf32>, vector<2x16x8xf32>, vector<2x16x16xf32> -> vector<2x16x16xf32>
    "tpu.trace_stop"() : () -> ()
    %22 = vector.shape_cast %16 : vector<1x8xf32> to vector<1x1x8xf32>
    %23 = vector.broadcast %22 : vector<1x1x8xf32> to vector<2x16x8xf32>
    %24 = arith.mulf %17, %23 : vector<2x16x8xf32>
    %cst_7 = arith.constant dense<0.000000e+00> : vector<2x16xf32>
    %25 = vector.multi_reduction <add>, %24, %cst_7 [2] : vector<2x16x8xf32> to vector<2x16xf32>
    %26 = vector.shape_cast %25 : vector<2x16xf32> to vector<2x16x1xf32>
    %27 = vector.broadcast %26 : vector<2x16x1xf32> to vector<2x16x16xf32>
    %28 = arith.mulf %3, %27 : vector<2x16x16xf32>
    %29 = arith.addf %21, %28 : vector<2x16x16xf32>
    %cst_8 = arith.constant 0.353553385 : f32
    %30 = vector.broadcast %cst_8 : f32 to vector<2x16x16xf32>
    %31 = arith.mulf %29, %30 : vector<2x16x16xf32>
    %cst_9 = arith.constant -1.000000e+30 : f32
    %32 = vector.broadcast %cst_9 : f32 to vector<2x16x16xf32>
    %33 = arith.select %6, %31, %32 : vector<2x16x16xi1>, vector<2x16x16xf32>
    %cst_10 = arith.constant dense<0xFF800000> : vector<2x16xf32>
    %34 = vector.multi_reduction <maximumf>, %33, %cst_10 [2] : vector<2x16x16xf32> to vector<2x16xf32>
    %35 = vector.shape_cast %34 : vector<2x16xf32> to vector<2x16x1xf32>
    %36 = vector.broadcast %35 : vector<2x16x1xf32> to vector<2x16x16xf32>
    %37 = arith.subf %33, %36 : vector<2x16x16xf32>
    %38 = math.exp %37 : vector<2x16x16xf32>
    %cst_11 = arith.constant 0.000000e+00 : f32
    %39 = vector.broadcast %cst_11 : f32 to vector<2x16x16xf32>
    %40 = arith.select %6, %38, %39 : vector<2x16x16xi1>, vector<2x16x16xf32>
    %cst_12 = arith.constant dense<0.000000e+00> : vector<2x16xf32>
    %41 = vector.multi_reduction <add>, %40, %cst_12 [2] : vector<2x16x16xf32> to vector<2x16xf32>
    %42 = vector.shape_cast %41 : vector<2x16xf32> to vector<2x16x1xf32>
    %cst_13 = arith.constant 1.000000e-16 : f32
    %43 = vector.broadcast %cst_13 : f32 to vector<2x16x1xf32>
    %44 = arith.addf %42, %43 : vector<2x16x1xf32>
    %45 = vector.broadcast %44 : vector<2x16x1xf32> to vector<2x16x16xf32>
    %46 = arith.divf %40, %45 : vector<2x16x16xf32>
    %47 = arith.mulf %46, %3 : vector<2x16x16xf32>
    %cst_14 = arith.constant dense<0.000000e+00> : vector<2x16xf32>
    %48 = vector.multi_reduction <add>, %47, %cst_14 [2] : vector<2x16x16xf32> to vector<2x16xf32>
    %49 = vector.shape_cast %48 : vector<2x16xf32> to vector<2x16x1xf32>
    "tpu.trace_start"() <{level = 10 : i32, message = "bts,bsc->btc"}> : () -> ()
    %cst_15 = arith.constant dense<0.000000e+00> : vector<2x16x8xf32>
    %50 = tpu.matmul %46, %19, %cst_15 {dimension_numbers = #tpu.dot_dimension_numbers<[2], [1], [1], [2], [0, 0, 0, 1, 1, 2], [0], [0]>} : vector<2x16x16xf32>, vector<2x16x8xf32>, vector<2x16x8xf32> -> vector<2x16x8xf32>
    "tpu.trace_stop"() : () -> ()
    %51 = vector.shape_cast %16 : vector<1x8xf32> to vector<1x1x8xf32>
    %52 = vector.broadcast %49 : vector<2x16x1xf32> to vector<2x16x8xf32>
    %53 = vector.broadcast %51 : vector<1x1x8xf32> to vector<2x16x8xf32>
    %54 = arith.mulf %52, %53 : vector<2x16x8xf32>
    %55 = arith.addf %50, %54 : vector<2x16x8xf32>
    %56 = arith.addf %55, %20 : vector<2x16x8xf32>
    %c8 = arith.constant 8 : index
    %c0_16 = arith.constant 0 : index
    %57 = vector.load %arg2[%c8, %c0_16] : memref<96x32xf32, #tpu.memory_space<vmem>>, vector<8x32xf32>
    %c16 = arith.constant 16 : index
    %c0_17 = arith.constant 0 : index
    %58 = vector.load %arg2[%c16, %c0_17] : memref<96x32xf32, #tpu.memory_space<vmem>>, vector<1x32xf32>
    %59 = vector.shape_cast %56 : vector<2x16x8xf32> to vector<32x8xf32>
    %cst_18 = arith.constant dense<0.000000e+00> : vector<32x32xf32>
    %60 = tpu.matmul %59, %57, %cst_18 {dimension_numbers = #tpu.dot_dimension_numbers<[1], [0], [0], [1], [0, 0, 1, 1], [], []>} : vector<32x8xf32>, vector<8x32xf32>, vector<32x32xf32> -> vector<32x32xf32>
    %61 = vector.broadcast %58 : vector<1x32xf32> to vector<32x32xf32>
    %62 = arith.addf %60, %61 : vector<32x32xf32>
    %63 = vector.shape_cast %62 : vector<32x32xf32> to vector<2x16x32xf32>
    %c89 = arith.constant 89 : index
    %c0_19 = arith.constant 0 : index
    %64 = vector.load %arg2[%c89, %c0_19] : memref<96x32xf32, #tpu.memory_space<vmem>>, vector<1x8xf32>
    %65 = vector.extract_strided_slice %63 {offsets = [0, 0, 0], sizes = [2, 16, 8], strides = [1, 1, 1]} : vector<2x16x32xf32> to vector<2x16x8xf32>
    %66 = vector.extract_strided_slice %63 {offsets = [0, 0, 8], sizes = [2, 16, 8], strides = [1, 1, 1]} : vector<2x16x32xf32> to vector<2x16x8xf32>
    %67 = vector.extract_strided_slice %63 {offsets = [0, 0, 16], sizes = [2, 16, 8], strides = [1, 1, 1]} : vector<2x16x32xf32> to vector<2x16x8xf32>
    %68 = vector.extract_strided_slice %63 {offsets = [0, 0, 24], sizes = [2, 16, 8], strides = [1, 1, 1]} : vector<2x16x32xf32> to vector<2x16x8xf32>
    "tpu.trace_start"() <{level = 10 : i32, message = "btc,bsc->bts"}> : () -> ()
    %cst_20 = arith.constant dense<0.000000e+00> : vector<2x16x16xf32>
    %69 = tpu.matmul %65, %66, %cst_20 {dimension_numbers = #tpu.dot_dimension_numbers<[2], [2], [1], [1], [0, 0, 0, 1, 1, 1], [0], [0]>} : vector<2x16x8xf32>, vector<2x16x8xf32>, vector<2x16x16xf32> -> vector<2x16x16xf32>
    "tpu.trace_stop"() : () -> ()
    %70 = vector.shape_cast %64 : vector<1x8xf32> to vector<1x1x8xf32>
    %71 = vector.broadcast %70 : vector<1x1x8xf32> to vector<2x16x8xf32>
    %72 = arith.mulf %65, %71 : vector<2x16x8xf32>
    %cst_21 = arith.constant dense<0.000000e+00> : vector<2x16xf32>
    %73 = vector.multi_reduction <add>, %72, %cst_21 [2] : vector<2x16x8xf32> to vector<2x16xf32>
    %74 = vector.shape_cast %73 : vector<2x16xf32> to vector<2x16x1xf32>
    %75 = vector.broadcast %74 : vector<2x16x1xf32> to vector<2x16x16xf32>
    %76 = arith.mulf %3, %75 : vector<2x16x16xf32>
    %77 = arith.addf %69, %76 : vector<2x16x16xf32>
    %cst_22 = arith.constant 0.353553385 : f32
    %78 = vector.broadcast %cst_22 : f32 to vector<2x16x16xf32>
    %79 = arith.mulf %77, %78 : vector<2x16x16xf32>
    %cst_23 = arith.constant -1.000000e+30 : f32
    %80 = vector.broadcast %cst_23 : f32 to vector<2x16x16xf32>
    %81 = arith.select %6, %79, %80 : vector<2x16x16xi1>, vector<2x16x16xf32>
    %cst_24 = arith.constant dense<0xFF800000> : vector<2x16xf32>
    %82 = vector.multi_reduction <maximumf>, %81, %cst_24 [2] : vector<2x16x16xf32> to vector<2x16xf32>
    %83 = vector.shape_cast %82 : vector<2x16xf32> to vector<2x16x1xf32>
    %84 = vector.broadcast %83 : vector<2x16x1xf32> to vector<2x16x16xf32>
    %85 = arith.subf %81, %84 : vector<2x16x16xf32>
    %86 = math.exp %85 : vector<2x16x16xf32>
    %cst_25 = arith.constant 0.000000e+00 : f32
    %87 = vector.broadcast %cst_25 : f32 to vector<2x16x16xf32>
    %88 = arith.select %6, %86, %87 : vector<2x16x16xi1>, vector<2x16x16xf32>
    %cst_26 = arith.constant dense<0.000000e+00> : vector<2x16xf32>
    %89 = vector.multi_reduction <add>, %88, %cst_26 [2] : vector<2x16x16xf32> to vector<2x16xf32>
    %90 = vector.shape_cast %89 : vector<2x16xf32> to vector<2x16x1xf32>
    %cst_27 = arith.constant 1.000000e-16 : f32
    %91 = vector.broadcast %cst_27 : f32 to vector<2x16x1xf32>
    %92 = arith.addf %90, %91 : vector<2x16x1xf32>
    %93 = vector.broadcast %92 : vector<2x16x1xf32> to vector<2x16x16xf32>
    %94 = arith.divf %88, %93 : vector<2x16x16xf32>
    %95 = arith.mulf %94, %3 : vector<2x16x16xf32>
    %cst_28 = arith.constant dense<0.000000e+00> : vector<2x16xf32>
    %96 = vector.multi_reduction <add>, %95, %cst_28 [2] : vector<2x16x16xf32> to vector<2x16xf32>
    %97 = vector.shape_cast %96 : vector<2x16xf32> to vector<2x16x1xf32>
    "tpu.trace_start"() <{level = 10 : i32, message = "bts,bsc->btc"}> : () -> ()
    %cst_29 = arith.constant dense<0.000000e+00> : vector<2x16x8xf32>
    %98 = tpu.matmul %94, %67, %cst_29 {dimension_numbers = #tpu.dot_dimension_numbers<[2], [1], [1], [2], [0, 0, 0, 1, 1, 2], [0], [0]>} : vector<2x16x16xf32>, vector<2x16x8xf32>, vector<2x16x8xf32> -> vector<2x16x8xf32>
    "tpu.trace_stop"() : () -> ()
    %99 = vector.shape_cast %64 : vector<1x8xf32> to vector<1x1x8xf32>
    %100 = vector.broadcast %97 : vector<2x16x1xf32> to vector<2x16x8xf32>
    %101 = vector.broadcast %99 : vector<1x1x8xf32> to vector<2x16x8xf32>
    %102 = arith.mulf %100, %101 : vector<2x16x8xf32>
    %103 = arith.addf %98, %102 : vector<2x16x8xf32>
    %104 = arith.addf %103, %68 : vector<2x16x8xf32>
    %c24 = arith.constant 24 : index
    %c0_30 = arith.constant 0 : index
    %105 = vector.load %arg2[%c24, %c0_30] : memref<96x32xf32, #tpu.memory_space<vmem>>, vector<8x32xf32>
    %c32 = arith.constant 32 : index
    %c0_31 = arith.constant 0 : index
    %106 = vector.load %arg2[%c32, %c0_31] : memref<96x32xf32, #tpu.memory_space<vmem>>, vector<1x32xf32>
    %107 = vector.shape_cast %104 : vector<2x16x8xf32> to vector<32x8xf32>
    %cst_32 = arith.constant dense<0.000000e+00> : vector<32x32xf32>
    %108 = tpu.matmul %107, %105, %cst_32 {dimension_numbers = #tpu.dot_dimension_numbers<[1], [0], [0], [1], [0, 0, 1, 1], [], []>} : vector<32x8xf32>, vector<8x32xf32>, vector<32x32xf32> -> vector<32x32xf32>
    %109 = vector.broadcast %106 : vector<1x32xf32> to vector<32x32xf32>
    %110 = arith.addf %108, %109 : vector<32x32xf32>
    %111 = vector.shape_cast %110 : vector<32x32xf32> to vector<2x16x32xf32>
    %c90 = arith.constant 90 : index
    %c0_33 = arith.constant 0 : index
    %112 = vector.load %arg2[%c90, %c0_33] : memref<96x32xf32, #tpu.memory_space<vmem>>, vector<1x8xf32>
    %113 = vector.extract_strided_slice %111 {offsets = [0, 0, 0], sizes = [2, 16, 8], strides = [1, 1, 1]} : vector<2x16x32xf32> to vector<2x16x8xf32>
    %114 = vector.extract_strided_slice %111 {offsets = [0, 0, 8], sizes = [2, 16, 8], strides = [1, 1, 1]} : vector<2x16x32xf32> to vector<2x16x8xf32>
    %115 = vector.extract_strided_slice %111 {offsets = [0, 0, 16], sizes = [2, 16, 8], strides = [1, 1, 1]} : vector<2x16x32xf32> to vector<2x16x8xf32>
    %116 = vector.extract_strided_slice %111 {offsets = [0, 0, 24], sizes = [2, 16, 8], strides = [1, 1, 1]} : vector<2x16x32xf32> to vector<2x16x8xf32>
    "tpu.trace_start"() <{level = 10 : i32, message = "btc,bsc->bts"}> : () -> ()
    %cst_34 = arith.constant dense<0.000000e+00> : vector<2x16x16xf32>
    %117 = tpu.matmul %113, %114, %cst_34 {dimension_numbers = #tpu.dot_dimension_numbers<[2], [2], [1], [1], [0, 0, 0, 1, 1, 1], [0], [0]>} : vector<2x16x8xf32>, vector<2x16x8xf32>, vector<2x16x16xf32> -> vector<2x16x16xf32>
    "tpu.trace_stop"() : () -> ()
    %118 = vector.shape_cast %112 : vector<1x8xf32> to vector<1x1x8xf32>
    %119 = vector.broadcast %118 : vector<1x1x8xf32> to vector<2x16x8xf32>
    %120 = arith.mulf %113, %119 : vector<2x16x8xf32>
    %cst_35 = arith.constant dense<0.000000e+00> : vector<2x16xf32>
    %121 = vector.multi_reduction <add>, %120, %cst_35 [2] : vector<2x16x8xf32> to vector<2x16xf32>
    %122 = vector.shape_cast %121 : vector<2x16xf32> to vector<2x16x1xf32>
    %123 = vector.broadcast %122 : vector<2x16x1xf32> to vector<2x16x16xf32>
    %124 = arith.mulf %3, %123 : vector<2x16x16xf32>
    %125 = arith.addf %117, %124 : vector<2x16x16xf32>
    %cst_36 = arith.constant 0.353553385 : f32
    %126 = vector.broadcast %cst_36 : f32 to vector<2x16x16xf32>
    %127 = arith.mulf %125, %126 : vector<2x16x16xf32>
    %cst_37 = arith.constant -1.000000e+30 : f32
    %128 = vector.broadcast %cst_37 : f32 to vector<2x16x16xf32>
    %129 = arith.select %6, %127, %128 : vector<2x16x16xi1>, vector<2x16x16xf32>
    %cst_38 = arith.constant dense<0xFF800000> : vector<2x16xf32>
    %130 = vector.multi_reduction <maximumf>, %129, %cst_38 [2] : vector<2x16x16xf32> to vector<2x16xf32>
    %131 = vector.shape_cast %130 : vector<2x16xf32> to vector<2x16x1xf32>
    %132 = vector.broadcast %131 : vector<2x16x1xf32> to vector<2x16x16xf32>
    %133 = arith.subf %129, %132 : vector<2x16x16xf32>
    %134 = math.exp %133 : vector<2x16x16xf32>
    %cst_39 = arith.constant 0.000000e+00 : f32
    %135 = vector.broadcast %cst_39 : f32 to vector<2x16x16xf32>
    %136 = arith.select %6, %134, %135 : vector<2x16x16xi1>, vector<2x16x16xf32>
    %cst_40 = arith.constant dense<0.000000e+00> : vector<2x16xf32>
    %137 = vector.multi_reduction <add>, %136, %cst_40 [2] : vector<2x16x16xf32> to vector<2x16xf32>
    %138 = vector.shape_cast %137 : vector<2x16xf32> to vector<2x16x1xf32>
    %cst_41 = arith.constant 1.000000e-16 : f32
    %139 = vector.broadcast %cst_41 : f32 to vector<2x16x1xf32>
    %140 = arith.addf %138, %139 : vector<2x16x1xf32>
    %141 = vector.broadcast %140 : vector<2x16x1xf32> to vector<2x16x16xf32>
    %142 = arith.divf %136, %141 : vector<2x16x16xf32>
    %143 = arith.mulf %142, %3 : vector<2x16x16xf32>
    %cst_42 = arith.constant dense<0.000000e+00> : vector<2x16xf32>
    %144 = vector.multi_reduction <add>, %143, %cst_42 [2] : vector<2x16x16xf32> to vector<2x16xf32>
    %145 = vector.shape_cast %144 : vector<2x16xf32> to vector<2x16x1xf32>
    "tpu.trace_start"() <{level = 10 : i32, message = "bts,bsc->btc"}> : () -> ()
    %cst_43 = arith.constant dense<0.000000e+00> : vector<2x16x8xf32>
    %146 = tpu.matmul %142, %115, %cst_43 {dimension_numbers = #tpu.dot_dimension_numbers<[2], [1], [1], [2], [0, 0, 0, 1, 1, 2], [0], [0]>} : vector<2x16x16xf32>, vector<2x16x8xf32>, vector<2x16x8xf32> -> vector<2x16x8xf32>
    "tpu.trace_stop"() : () -> ()
    %147 = vector.shape_cast %112 : vector<1x8xf32> to vector<1x1x8xf32>
    %148 = vector.broadcast %145 : vector<2x16x1xf32> to vector<2x16x8xf32>
    %149 = vector.broadcast %147 : vector<1x1x8xf32> to vector<2x16x8xf32>
    %150 = arith.mulf %148, %149 : vector<2x16x8xf32>
    %151 = arith.addf %146, %150 : vector<2x16x8xf32>
    %152 = arith.addf %151, %116 : vector<2x16x8xf32>
    %c40 = arith.constant 40 : index
    %c0_44 = arith.constant 0 : index
    %153 = vector.load %arg2[%c40, %c0_44] : memref<96x32xf32, #tpu.memory_space<vmem>>, vector<8x32xf32>
    %c48 = arith.constant 48 : index
    %c0_45 = arith.constant 0 : index
    %154 = vector.load %arg2[%c48, %c0_45] : memref<96x32xf32, #tpu.memory_space<vmem>>, vector<1x32xf32>
    %155 = vector.shape_cast %152 : vector<2x16x8xf32> to vector<32x8xf32>
    %cst_46 = arith.constant dense<0.000000e+00> : vector<32x32xf32>
    %156 = tpu.matmul %155, %153, %cst_46 {dimension_numbers = #tpu.dot_dimension_numbers<[1], [0], [0], [1], [0, 0, 1, 1], [], []>} : vector<32x8xf32>, vector<8x32xf32>, vector<32x32xf32> -> vector<32x32xf32>
    %157 = vector.broadcast %154 : vector<1x32xf32> to vector<32x32xf32>
    %158 = arith.addf %156, %157 : vector<32x32xf32>
    %159 = vector.shape_cast %158 : vector<32x32xf32> to vector<2x16x32xf32>
    %c91 = arith.constant 91 : index
    %c0_47 = arith.constant 0 : index
    %160 = vector.load %arg2[%c91, %c0_47] : memref<96x32xf32, #tpu.memory_space<vmem>>, vector<1x8xf32>
    %161 = vector.extract_strided_slice %159 {offsets = [0, 0, 0], sizes = [2, 16, 8], strides = [1, 1, 1]} : vector<2x16x32xf32> to vector<2x16x8xf32>
    %162 = vector.extract_strided_slice %159 {offsets = [0, 0, 8], sizes = [2, 16, 8], strides = [1, 1, 1]} : vector<2x16x32xf32> to vector<2x16x8xf32>
    %163 = vector.extract_strided_slice %159 {offsets = [0, 0, 16], sizes = [2, 16, 8], strides = [1, 1, 1]} : vector<2x16x32xf32> to vector<2x16x8xf32>
    %164 = vector.extract_strided_slice %159 {offsets = [0, 0, 24], sizes = [2, 16, 8], strides = [1, 1, 1]} : vector<2x16x32xf32> to vector<2x16x8xf32>
    "tpu.trace_start"() <{level = 10 : i32, message = "btc,bsc->bts"}> : () -> ()
    %cst_48 = arith.constant dense<0.000000e+00> : vector<2x16x16xf32>
    %165 = tpu.matmul %161, %162, %cst_48 {dimension_numbers = #tpu.dot_dimension_numbers<[2], [2], [1], [1], [0, 0, 0, 1, 1, 1], [0], [0]>} : vector<2x16x8xf32>, vector<2x16x8xf32>, vector<2x16x16xf32> -> vector<2x16x16xf32>
    "tpu.trace_stop"() : () -> ()
    %166 = vector.shape_cast %160 : vector<1x8xf32> to vector<1x1x8xf32>
    %167 = vector.broadcast %166 : vector<1x1x8xf32> to vector<2x16x8xf32>
    %168 = arith.mulf %161, %167 : vector<2x16x8xf32>
    %cst_49 = arith.constant dense<0.000000e+00> : vector<2x16xf32>
    %169 = vector.multi_reduction <add>, %168, %cst_49 [2] : vector<2x16x8xf32> to vector<2x16xf32>
    %170 = vector.shape_cast %169 : vector<2x16xf32> to vector<2x16x1xf32>
    %171 = vector.broadcast %170 : vector<2x16x1xf32> to vector<2x16x16xf32>
    %172 = arith.mulf %3, %171 : vector<2x16x16xf32>
    %173 = arith.addf %165, %172 : vector<2x16x16xf32>
    %cst_50 = arith.constant 0.353553385 : f32
    %174 = vector.broadcast %cst_50 : f32 to vector<2x16x16xf32>
    %175 = arith.mulf %173, %174 : vector<2x16x16xf32>
    %cst_51 = arith.constant -1.000000e+30 : f32
    %176 = vector.broadcast %cst_51 : f32 to vector<2x16x16xf32>
    %177 = arith.select %6, %175, %176 : vector<2x16x16xi1>, vector<2x16x16xf32>
    %cst_52 = arith.constant dense<0xFF800000> : vector<2x16xf32>
    %178 = vector.multi_reduction <maximumf>, %177, %cst_52 [2] : vector<2x16x16xf32> to vector<2x16xf32>
    %179 = vector.shape_cast %178 : vector<2x16xf32> to vector<2x16x1xf32>
    %180 = vector.broadcast %179 : vector<2x16x1xf32> to vector<2x16x16xf32>
    %181 = arith.subf %177, %180 : vector<2x16x16xf32>
    %182 = math.exp %181 : vector<2x16x16xf32>
    %cst_53 = arith.constant 0.000000e+00 : f32
    %183 = vector.broadcast %cst_53 : f32 to vector<2x16x16xf32>
    %184 = arith.select %6, %182, %183 : vector<2x16x16xi1>, vector<2x16x16xf32>
    %cst_54 = arith.constant dense<0.000000e+00> : vector<2x16xf32>
    %185 = vector.multi_reduction <add>, %184, %cst_54 [2] : vector<2x16x16xf32> to vector<2x16xf32>
    %186 = vector.shape_cast %185 : vector<2x16xf32> to vector<2x16x1xf32>
    %cst_55 = arith.constant 1.000000e-16 : f32
    %187 = vector.broadcast %cst_55 : f32 to vector<2x16x1xf32>
    %188 = arith.addf %186, %187 : vector<2x16x1xf32>
    %189 = vector.broadcast %188 : vector<2x16x1xf32> to vector<2x16x16xf32>
    %190 = arith.divf %184, %189 : vector<2x16x16xf32>
    %191 = arith.mulf %190, %3 : vector<2x16x16xf32>
    %cst_56 = arith.constant dense<0.000000e+00> : vector<2x16xf32>
    %192 = vector.multi_reduction <add>, %191, %cst_56 [2] : vector<2x16x16xf32> to vector<2x16xf32>
    %193 = vector.shape_cast %192 : vector<2x16xf32> to vector<2x16x1xf32>
    "tpu.trace_start"() <{level = 10 : i32, message = "bts,bsc->btc"}> : () -> ()
    %cst_57 = arith.constant dense<0.000000e+00> : vector<2x16x8xf32>
    %194 = tpu.matmul %190, %163, %cst_57 {dimension_numbers = #tpu.dot_dimension_numbers<[2], [1], [1], [2], [0, 0, 0, 1, 1, 2], [0], [0]>} : vector<2x16x16xf32>, vector<2x16x8xf32>, vector<2x16x8xf32> -> vector<2x16x8xf32>
    "tpu.trace_stop"() : () -> ()
    %195 = vector.shape_cast %160 : vector<1x8xf32> to vector<1x1x8xf32>
    %196 = vector.broadcast %193 : vector<2x16x1xf32> to vector<2x16x8xf32>
    %197 = vector.broadcast %195 : vector<1x1x8xf32> to vector<2x16x8xf32>
    %198 = arith.mulf %196, %197 : vector<2x16x8xf32>
    %199 = arith.addf %194, %198 : vector<2x16x8xf32>
    %200 = arith.addf %199, %164 : vector<2x16x8xf32>
    %c56 = arith.constant 56 : index
    %c0_58 = arith.constant 0 : index
    %201 = vector.load %arg2[%c56, %c0_58] : memref<96x32xf32, #tpu.memory_space<vmem>>, vector<8x32xf32>
    %c64 = arith.constant 64 : index
    %c0_59 = arith.constant 0 : index
    %202 = vector.load %arg2[%c64, %c0_59] : memref<96x32xf32, #tpu.memory_space<vmem>>, vector<1x32xf32>
    %203 = vector.shape_cast %200 : vector<2x16x8xf32> to vector<32x8xf32>
    %cst_60 = arith.constant dense<0.000000e+00> : vector<32x32xf32>
    %204 = tpu.matmul %203, %201, %cst_60 {dimension_numbers = #tpu.dot_dimension_numbers<[1], [0], [0], [1], [0, 0, 1, 1], [], []>} : vector<32x8xf32>, vector<8x32xf32>, vector<32x32xf32> -> vector<32x32xf32>
    %205 = vector.broadcast %202 : vector<1x32xf32> to vector<32x32xf32>
    %206 = arith.addf %204, %205 : vector<32x32xf32>
    %207 = vector.shape_cast %206 : vector<32x32xf32> to vector<2x16x32xf32>
    %c92 = arith.constant 92 : index
    %c0_61 = arith.constant 0 : index
    %208 = vector.load %arg2[%c92, %c0_61] : memref<96x32xf32, #tpu.memory_space<vmem>>, vector<1x8xf32>
    %209 = vector.extract_strided_slice %207 {offsets = [0, 0, 0], sizes = [2, 16, 8], strides = [1, 1, 1]} : vector<2x16x32xf32> to vector<2x16x8xf32>
    %210 = vector.extract_strided_slice %207 {offsets = [0, 0, 8], sizes = [2, 16, 8], strides = [1, 1, 1]} : vector<2x16x32xf32> to vector<2x16x8xf32>
    %211 = vector.extract_strided_slice %207 {offsets = [0, 0, 16], sizes = [2, 16, 8], strides = [1, 1, 1]} : vector<2x16x32xf32> to vector<2x16x8xf32>
    %212 = vector.extract_strided_slice %207 {offsets = [0, 0, 24], sizes = [2, 16, 8], strides = [1, 1, 1]} : vector<2x16x32xf32> to vector<2x16x8xf32>
    "tpu.trace_start"() <{level = 10 : i32, message = "btc,bsc->bts"}> : () -> ()
    %cst_62 = arith.constant dense<0.000000e+00> : vector<2x16x16xf32>
    %213 = tpu.matmul %209, %210, %cst_62 {dimension_numbers = #tpu.dot_dimension_numbers<[2], [2], [1], [1], [0, 0, 0, 1, 1, 1], [0], [0]>} : vector<2x16x8xf32>, vector<2x16x8xf32>, vector<2x16x16xf32> -> vector<2x16x16xf32>
    "tpu.trace_stop"() : () -> ()
    %214 = vector.shape_cast %208 : vector<1x8xf32> to vector<1x1x8xf32>
    %215 = vector.broadcast %214 : vector<1x1x8xf32> to vector<2x16x8xf32>
    %216 = arith.mulf %209, %215 : vector<2x16x8xf32>
    %cst_63 = arith.constant dense<0.000000e+00> : vector<2x16xf32>
    %217 = vector.multi_reduction <add>, %216, %cst_63 [2] : vector<2x16x8xf32> to vector<2x16xf32>
    %218 = vector.shape_cast %217 : vector<2x16xf32> to vector<2x16x1xf32>
    %219 = vector.broadcast %218 : vector<2x16x1xf32> to vector<2x16x16xf32>
    %220 = arith.mulf %3, %219 : vector<2x16x16xf32>
    %221 = arith.addf %213, %220 : vector<2x16x16xf32>
    %cst_64 = arith.constant 0.353553385 : f32
    %222 = vector.broadcast %cst_64 : f32 to vector<2x16x16xf32>
    %223 = arith.mulf %221, %222 : vector<2x16x16xf32>
    %cst_65 = arith.constant -1.000000e+30 : f32
    %224 = vector.broadcast %cst_65 : f32 to vector<2x16x16xf32>
    %225 = arith.select %6, %223, %224 : vector<2x16x16xi1>, vector<2x16x16xf32>
    %cst_66 = arith.constant dense<0xFF800000> : vector<2x16xf32>
    %226 = vector.multi_reduction <maximumf>, %225, %cst_66 [2] : vector<2x16x16xf32> to vector<2x16xf32>
    %227 = vector.shape_cast %226 : vector<2x16xf32> to vector<2x16x1xf32>
    %228 = vector.broadcast %227 : vector<2x16x1xf32> to vector<2x16x16xf32>
    %229 = arith.subf %225, %228 : vector<2x16x16xf32>
    %230 = math.exp %229 : vector<2x16x16xf32>
    %cst_67 = arith.constant 0.000000e+00 : f32
    %231 = vector.broadcast %cst_67 : f32 to vector<2x16x16xf32>
    %232 = arith.select %6, %230, %231 : vector<2x16x16xi1>, vector<2x16x16xf32>
    %cst_68 = arith.constant dense<0.000000e+00> : vector<2x16xf32>
    %233 = vector.multi_reduction <add>, %232, %cst_68 [2] : vector<2x16x16xf32> to vector<2x16xf32>
    %234 = vector.shape_cast %233 : vector<2x16xf32> to vector<2x16x1xf32>
    %cst_69 = arith.constant 1.000000e-16 : f32
    %235 = vector.broadcast %cst_69 : f32 to vector<2x16x1xf32>
    %236 = arith.addf %234, %235 : vector<2x16x1xf32>
    %237 = vector.broadcast %236 : vector<2x16x1xf32> to vector<2x16x16xf32>
    %238 = arith.divf %232, %237 : vector<2x16x16xf32>
    %239 = arith.mulf %238, %3 : vector<2x16x16xf32>
    %cst_70 = arith.constant dense<0.000000e+00> : vector<2x16xf32>
    %240 = vector.multi_reduction <add>, %239, %cst_70 [2] : vector<2x16x16xf32> to vector<2x16xf32>
    %241 = vector.shape_cast %240 : vector<2x16xf32> to vector<2x16x1xf32>
    "tpu.trace_start"() <{level = 10 : i32, message = "bts,bsc->btc"}> : () -> ()
    %cst_71 = arith.constant dense<0.000000e+00> : vector<2x16x8xf32>
    %242 = tpu.matmul %238, %211, %cst_71 {dimension_numbers = #tpu.dot_dimension_numbers<[2], [1], [1], [2], [0, 0, 0, 1, 1, 2], [0], [0]>} : vector<2x16x16xf32>, vector<2x16x8xf32>, vector<2x16x8xf32> -> vector<2x16x8xf32>
    "tpu.trace_stop"() : () -> ()
    %243 = vector.shape_cast %208 : vector<1x8xf32> to vector<1x1x8xf32>
    %244 = vector.broadcast %241 : vector<2x16x1xf32> to vector<2x16x8xf32>
    %245 = vector.broadcast %243 : vector<1x1x8xf32> to vector<2x16x8xf32>
    %246 = arith.mulf %244, %245 : vector<2x16x8xf32>
    %247 = arith.addf %242, %246 : vector<2x16x8xf32>
    %248 = arith.addf %247, %212 : vector<2x16x8xf32>
    %c72 = arith.constant 72 : index
    %c0_72 = arith.constant 0 : index
    %249 = vector.load %arg2[%c72, %c0_72] : memref<96x32xf32, #tpu.memory_space<vmem>>, vector<8x32xf32>
    %c80 = arith.constant 80 : index
    %c0_73 = arith.constant 0 : index
    %250 = vector.load %arg2[%c80, %c0_73] : memref<96x32xf32, #tpu.memory_space<vmem>>, vector<1x32xf32>
    %251 = vector.shape_cast %248 : vector<2x16x8xf32> to vector<32x8xf32>
    %cst_74 = arith.constant dense<0.000000e+00> : vector<32x32xf32>
    %252 = tpu.matmul %251, %249, %cst_74 {dimension_numbers = #tpu.dot_dimension_numbers<[1], [0], [0], [1], [0, 0, 1, 1], [], []>} : vector<32x8xf32>, vector<8x32xf32>, vector<32x32xf32> -> vector<32x32xf32>
    %253 = vector.broadcast %250 : vector<1x32xf32> to vector<32x32xf32>
    %254 = arith.addf %252, %253 : vector<32x32xf32>
    %255 = vector.shape_cast %254 : vector<32x32xf32> to vector<2x16x32xf32>
    %c93 = arith.constant 93 : index
    %c0_75 = arith.constant 0 : index
    %256 = vector.load %arg2[%c93, %c0_75] : memref<96x32xf32, #tpu.memory_space<vmem>>, vector<1x8xf32>
    %257 = vector.extract_strided_slice %255 {offsets = [0, 0, 0], sizes = [2, 16, 8], strides = [1, 1, 1]} : vector<2x16x32xf32> to vector<2x16x8xf32>
    %258 = vector.extract_strided_slice %255 {offsets = [0, 0, 8], sizes = [2, 16, 8], strides = [1, 1, 1]} : vector<2x16x32xf32> to vector<2x16x8xf32>
    %259 = vector.extract_strided_slice %255 {offsets = [0, 0, 16], sizes = [2, 16, 8], strides = [1, 1, 1]} : vector<2x16x32xf32> to vector<2x16x8xf32>
    %260 = vector.extract_strided_slice %255 {offsets = [0, 0, 24], sizes = [2, 16, 8], strides = [1, 1, 1]} : vector<2x16x32xf32> to vector<2x16x8xf32>
    "tpu.trace_start"() <{level = 10 : i32, message = "btc,bsc->bts"}> : () -> ()
    %cst_76 = arith.constant dense<0.000000e+00> : vector<2x16x16xf32>
    %261 = tpu.matmul %257, %258, %cst_76 {dimension_numbers = #tpu.dot_dimension_numbers<[2], [2], [1], [1], [0, 0, 0, 1, 1, 1], [0], [0]>} : vector<2x16x8xf32>, vector<2x16x8xf32>, vector<2x16x16xf32> -> vector<2x16x16xf32>
    "tpu.trace_stop"() : () -> ()
    %262 = vector.shape_cast %256 : vector<1x8xf32> to vector<1x1x8xf32>
    %263 = vector.broadcast %262 : vector<1x1x8xf32> to vector<2x16x8xf32>
    %264 = arith.mulf %257, %263 : vector<2x16x8xf32>
    %cst_77 = arith.constant dense<0.000000e+00> : vector<2x16xf32>
    %265 = vector.multi_reduction <add>, %264, %cst_77 [2] : vector<2x16x8xf32> to vector<2x16xf32>
    %266 = vector.shape_cast %265 : vector<2x16xf32> to vector<2x16x1xf32>
    %267 = vector.broadcast %266 : vector<2x16x1xf32> to vector<2x16x16xf32>
    %268 = arith.mulf %3, %267 : vector<2x16x16xf32>
    %269 = arith.addf %261, %268 : vector<2x16x16xf32>
    %cst_78 = arith.constant 0.353553385 : f32
    %270 = vector.broadcast %cst_78 : f32 to vector<2x16x16xf32>
    %271 = arith.mulf %269, %270 : vector<2x16x16xf32>
    %cst_79 = arith.constant -1.000000e+30 : f32
    %272 = vector.broadcast %cst_79 : f32 to vector<2x16x16xf32>
    %273 = arith.select %6, %271, %272 : vector<2x16x16xi1>, vector<2x16x16xf32>
    %cst_80 = arith.constant dense<0xFF800000> : vector<2x16xf32>
    %274 = vector.multi_reduction <maximumf>, %273, %cst_80 [2] : vector<2x16x16xf32> to vector<2x16xf32>
    %275 = vector.shape_cast %274 : vector<2x16xf32> to vector<2x16x1xf32>
    %276 = vector.broadcast %275 : vector<2x16x1xf32> to vector<2x16x16xf32>
    %277 = arith.subf %273, %276 : vector<2x16x16xf32>
    %278 = math.exp %277 : vector<2x16x16xf32>
    %cst_81 = arith.constant 0.000000e+00 : f32
    %279 = vector.broadcast %cst_81 : f32 to vector<2x16x16xf32>
    %280 = arith.select %6, %278, %279 : vector<2x16x16xi1>, vector<2x16x16xf32>
    %cst_82 = arith.constant dense<0.000000e+00> : vector<2x16xf32>
    %281 = vector.multi_reduction <add>, %280, %cst_82 [2] : vector<2x16x16xf32> to vector<2x16xf32>
    %282 = vector.shape_cast %281 : vector<2x16xf32> to vector<2x16x1xf32>
    %cst_83 = arith.constant 1.000000e-16 : f32
    %283 = vector.broadcast %cst_83 : f32 to vector<2x16x1xf32>
    %284 = arith.addf %282, %283 : vector<2x16x1xf32>
    %285 = vector.broadcast %284 : vector<2x16x1xf32> to vector<2x16x16xf32>
    %286 = arith.divf %280, %285 : vector<2x16x16xf32>
    %287 = arith.mulf %286, %3 : vector<2x16x16xf32>
    %cst_84 = arith.constant dense<0.000000e+00> : vector<2x16xf32>
    %288 = vector.multi_reduction <add>, %287, %cst_84 [2] : vector<2x16x16xf32> to vector<2x16xf32>
    %289 = vector.shape_cast %288 : vector<2x16xf32> to vector<2x16x1xf32>
    "tpu.trace_start"() <{level = 10 : i32, message = "bts,bsc->btc"}> : () -> ()
    %cst_85 = arith.constant dense<0.000000e+00> : vector<2x16x8xf32>
    %290 = tpu.matmul %286, %259, %cst_85 {dimension_numbers = #tpu.dot_dimension_numbers<[2], [1], [1], [2], [0, 0, 0, 1, 1, 2], [0], [0]>} : vector<2x16x16xf32>, vector<2x16x8xf32>, vector<2x16x8xf32> -> vector<2x16x8xf32>
    "tpu.trace_stop"() : () -> ()
    %291 = vector.shape_cast %256 : vector<1x8xf32> to vector<1x1x8xf32>
    %292 = vector.broadcast %289 : vector<2x16x1xf32> to vector<2x16x8xf32>
    %293 = vector.broadcast %291 : vector<1x1x8xf32> to vector<2x16x8xf32>
    %294 = arith.mulf %292, %293 : vector<2x16x8xf32>
    %295 = arith.addf %290, %294 : vector<2x16x8xf32>
    %296 = arith.addf %295, %260 : vector<2x16x8xf32>
    %297 = vector.shape_cast %296 : vector<2x16x8xf32> to vector<2x1x128xf32>
    %c0_86 = arith.constant 0 : index
    %c0_87 = arith.constant 0 : index
    %c0_88 = arith.constant 0 : index
    %298 = vector.load %arg3[%c0_86, %c0_87, %c0_88] : memref<2x1x128xf32, #tpu.memory_space<vmem>>, vector<2x1x128xf32>
    tpu.vector_store %arg3[%c0_86, %c0_87, %c0_88], %297 {strides = array<i32>} : memref<2x1x128xf32, #tpu.memory_space<vmem>>, vector<2x1x128xf32>,
    return
  }
  func.func @transform_0(%arg0: i32) -> (i32, i32, i32) {
    %c0_i32 = arith.constant 0 : i32
    %c0_i32_0 = arith.constant 0 : i32
    %c0_i32_1 = arith.constant 0 : i32
    return %arg0, %c0_i32, %c0_i32_0 : i32, i32, i32
  }
  func.func @transform_1(%arg0: i32) -> (i32, i32) {
    %c0_i32 = arith.constant 0 : i32
    %c0_i32_0 = arith.constant 0 : i32
    %c0_i32_1 = arith.constant 0 : i32
    return %c0_i32, %c0_i32_0 : i32, i32
  }
  func.func @transform_2(%arg0: i32) -> (i32, i32, i32) {
    %c0_i32 = arith.constant 0 : i32
    %c0_i32_0 = arith.constant 0 : i32
    %c0_i32_1 = arith.constant 0 : i32
    return %arg0, %c0_i32, %c0_i32_0 : i32, i32, i32
  }
}

</mosaic_0001>

<bundles_post_ra>
// kernel: transformer_conv_layer.1
= control target key start
LH: loop header
LB: loop body
LE: loop exit
PB: predicated region body
PF: predicated region fallthrough
CT: control target
= control target key end

     0   :  { %v2780_v0 = vmov 32   ;;  %s2782_s21 = smov 112   ;;  %vm73_vm0 = vcmask 64512   ;;  %vm172_vm1 = vcmask 130048   ;;  %s2783_s24 = smov 104   ;;  %s3744_s0 = inlined_call_operand.vmem [shape: f32[2,16,33], index: 0, kind: input, shape index: {}]   ;;  %s3745_s1 = inlined_call_operand.vmem [shape: f32[96,32], index: 1, kind: input, shape index: {}]   ;;  %s3746_s2 = inlined_call_operand.vmem [shape: f32[2,1,128], index: 2, kind: output, shape index: {}]  }
   0x1   :  { %2610 = vset.pattern.permute.xlu1 %v2780_v0  ;;  %2609 = vset.pattern.permute.xlu0 %v2780_v0  ;;  %v2816_v1 = vld [vmem:[%s3744_s0 + $0x18] sm:$0xff]  ;;  %v2821_v2 = vld [vmem:[%s3744_s0 + $0x8] sm:$0xff]  ;;  %v2828_v3 = vld [vmem:[%s3744_s0 + $0x10] sm:$0xff]  ;;  %s2787_s29 = smov 16   ;;  %s2788_s30 = smov 24  }
   0x2   :  { %54 = vperm.xlu1 %2610, %v2816_v1   ;;  %46 = vperm.xlu0 %2609, %v2821_v2   ;;  %v11_v4 = vld [vmem:[%s3744_s0] sm:$0xff]  ;;  %s2781_s0 = smov 120   ;;  %v2864_v19 = vld [vmem:[%s3745_s1 + $0x58] ss:$0 sm:$0xff]  ;;  %s2789_s3 = smov 32  }
   0x3   :  { %v2671_v5 = vld [vmem:[%s3745_s1] ss:$0 sm:$0xff]  ;;  %v2672_v6 = vld [vmem:[%s3745_s1 + $0x1] ss:$0 sm:$0xff]  ;;  %s2790_s4 = smov 48   ;;  %s2791_s5 = smov 56  }
   0x4   :  { %s2792_s6 = smov 40   ;;  %s2793_s7 = smov 72  }
   0x5   :  { %s2794_s8 = smov 80   ;;  %s2795_s9 = smov 64  }
   0x6   :  { %s2796_s10 = smov 96   ;;  %s2797_s11 = smov 88  }
   0xa   :  { %50 = vperm.xlu1 %2610, %v2828_v3   ;;  %42 = vperm.xlu0 %2609, %v11_v4  }
  0x74   :  { %v55_v7 = vpop.permute.xlu1 %54  ;;  %v47_v8 = vpop.permute.xlu0 %46 }
  0x75   :  { %v61_v9 = vmul.f32 %v2671_v5, %v55_v7  ;;  %v59_v10 = vmul.f32 %v2671_v5, %v47_v8 }
  0x77   :  { %v2840_v11 = vadd.f32 %v2672_v6, %v61_v9  ;;  %v2842_v12 = vadd.f32 %v2672_v6, %v59_v10 }
  0x79   :  { %94 = vrot.lane.b32.xlu2 %v2842_v12, %s2781_s0  ;;  %131 = vrot.lane.b32.xlu0 %v2840_v11, %s2781_s0  ;;  %v72_v22 = vmul.f32 %v2864_v19, %v2840_v11  ;;  %v70_v24 = vmul.f32 %v2864_v19, %v2842_v12 }
  0x7b   :  { %v83_v23 = vsel %vm73_vm0, %v72_v22, 0.0  ;;  %v77_v25 = vsel %vm73_vm0, %v70_v24, 0.0 }
  0x7c   :  { %v51_v13 = vpop.permute.xlu1 %50  ;;  %v43_v14 = vpop.permute.xlu0 %42 }
  0x7d   :  { %v60_v15 = vmul.f32 %v2671_v5, %v51_v13  ;;  %v58_v16 = vmul.f32 %v2671_v5, %v43_v14 }
  0x7f   :  { %v2848_v17 = vadd.f32 %v2672_v6, %v60_v15  ;;  %v2850_v18 = vadd.f32 %v2672_v6, %v58_v16 }
  0x81   :  { %129 = vrot.lane.b32.xlu1 %v2848_v17, %s2781_s0  ;;  %92 = vrot.lane.b32.xlu2 %v2850_v18, %s2781_s0  ;;  %v69_v20 = vmul.f32 %v2864_v19, %v2850_v18  ;;  %v71_v26 = vmul.f32 %v2864_v19, %v2848_v17 }
  0x83   :  { %v74_v21 = vsel %vm73_vm0, %v69_v20, 0.0  ;;  %v80_v27 = vsel %vm73_vm0, %v71_v26, 0.0 }
  0x89   :  { %21 = vrot.lane.b32.xlu1 %v2821_v2, %s2782_s21  ;;  %19 = vrot.lane.b32.xlu2 %v11_v4, %s2782_s21 }
  0x91   :  { %23 = vrot.lane.b32.xlu1 %v2828_v3, %s2782_s21 }
  0xa3   :  { %75 = vadd.xlane.f32.xlu0 %v74_v21 }
  0xab   :  { %84 = vadd.xlane.f32.xlu0 %v83_v23 }
  0xb2   :  { %78 = vadd.xlane.f32.xlu2 %v77_v25 }
  0xbb   :  { %81 = vadd.xlane.f32.xlu1 %v80_v27 }
  0xca   :  { %25 = vrot.lane.b32.xlu2 %v2816_v1, %s2782_s21 }
  0xd3   :  { %v95_v28 = vpop.permute.xlu2 %94 }
  0xd4   :  { %2495 = vmatpush.xpose.msk.msra.mxu0 %vm73_vm0, %v95_v28 }
  0xdb   :  { %v93_v29 = vpop.permute.xlu2 %92 }
  0xdc   :  { %2496 = vmatpush.xpose.msk.msra.mxu0 %vm73_vm0, %v93_v29 }
  0xdf   :  { %2497 = vmatmul.msk.f32.vlgmr.msra.gmra.mxu0 %vm73_vm0, %v2850_v18 }
  0xe3   :  { %v20_v32 = vpop.permute.xlu2 %19 }
  0xe4   :  { %v2892_v33 = vmul.f32 %v20_v32, %v11_v4 }
  0xe6   :  { %vm35_vm2 = vcmp.ne.f32.partialorder %v2892_v33, 0.0 }
  0xe7   :  { %2498 = vmatmul.msk.f32.gmra.mxu0 %vm73_vm0, %v2842_v12 }
  0xeb   :  { %v132_v30 = vpop.permute.xlu0 %131 }
  0xec   :  { %2499 = vmatpush.xpose.msk.msra.mxu1 %vm73_vm0, %v132_v30 }
  0xf3   :  { %v130_v31 = vpop.permute.xlu1 %129 }
  0xf4   :  { %2500 = vmatpush.xpose.msk.msra.mxu1 %vm73_vm0, %v130_v31 }
  0xf7   :  { %2501 = vmatmul.msk.f32.vlgmr.msra.gmra.mxu1 %vm73_vm0, %v2848_v17 }
  0xfb   :  { %v22_v36 = vpop.permute.xlu1 %21 }
  0xfc   :  { %v2896_v39 = vmul.f32 %v22_v36, %v2821_v2 }
  0xfe   :  { %vm36_vm3 = vcmp.ne.f32.partialorder %v2896_v39, 0.0 }
  0xff   :  { %2502 = vmatmul.msk.f32.gmra.mxu1 %vm73_vm0, %v2840_v11 }
 0x103   :  { %v24_v47 = vpop.permute.xlu1 %23 }
 0x104   :  { %v2908_v51 = vmul.f32 %v24_v47, %v2828_v3 }
 0x106   :  { %vm37_vm4 = vcmp.ne.f32.partialorder %v2908_v51, 0.0 }
 0x116   :  { %v76_v34 = vpop.xlane.xlu0 %75 }
 0x117   :  { %v86_v35 = vmul.f32 %v76_v34, %v2892_v33  ;;  %v2611_v34 = vpack.i.bf16 %v2850_v18, %v2842_v12 }
 0x11e   :  { %v85_v60 = vpop.xlane.xlu0 %84 }
 0x125   :  { %v79_v41 = vpop.xlane.xlu2 %78 }
 0x126   :  { %v87_v44 = vmul.f32 %v79_v41, %v2896_v39 }
 0x12d   :  { %v26_v54 = vpop.permute.xlu2 %25 }
 0x12e   :  { %v82_v52 = vpop.xlane.xlu1 %81  ;;  %v2912_v57 = vmul.f32 %v26_v54, %v2816_v1 }
 0x12f   :  { %v88_v53 = vmul.f32 %v82_v52, %v2908_v51 }
 0x130   :  { %v89_v62 = vmul.f32 %v85_v60, %v2912_v57  ;;  %vm38_vm5 = vcmp.ne.f32.partialorder %v2912_v57, 0.0 }
 0x15c   :  { %v121_v37 = vpop.f32.mrf.mxu0 }
 0x15d   :  { %v122_v38 = vadd.f32 %v121_v37, %v86_v35  ;;  %v2616_v35 = vpack.i.bf16 %v2848_v17, %v2840_v11 }
 0x15f   :  { %v164_v40 = vmul.f32 0.35355338, %v122_v38 }
 0x161   :  { %v168_v42 = vsel %vm35_vm2, %v164_v40, -1e+30 }
 0x162   :  { %v173_v43 = vsel %vm172_vm1, %v168_v42, -inf }
 0x163   :  { %174 = vmax.xlane.f32.xlu0 %v173_v43 }
 0x164   :  { %v124_v45 = vpop.f32.mrf.mxu0 }
 0x165   :  { %v125_v46 = vadd.f32 %v124_v45, %v87_v44 }
 0x167   :  { %v165_v48 = vmul.f32 0.35355338, %v125_v46 }
 0x169   :  { %v169_v49 = vsel %vm36_vm3, %v165_v48, -1e+30 }
 0x16a   :  { %v176_v50 = vsel %vm172_vm1, %v169_v49, -inf }
 0x16b   :  { %177 = vmax.xlane.f32.xlu0 %v176_v50 }
 0x174   :  { %v158_v55 = vpop.f32.mrf.mxu1 }
 0x175   :  { %v159_v56 = vadd.f32 %v158_v55, %v88_v53 }
 0x177   :  { %v166_v58 = vmul.f32 0.35355338, %v159_v56 }
 0x179   :  { %v170_v59 = vsel %vm37_vm4, %v166_v58, -1e+30 }
 0x17a   :  { %v179_v61 = vsel %vm172_vm1, %v170_v59, -inf }
 0x17b   :  { %180 = vmax.xlane.f32.xlu1 %v179_v61 }
 0x17c   :  { %v161_v63 = vpop.f32.mrf.mxu1 }
 0x17d   :  { %v162_v0 = vadd.f32 %v161_v63, %v89_v62 }
 0x17f   :  { %v167_v2 = vmul.f32 0.35355338, %v162_v0 }
 0x181   :  { %v171_v1 = vsel %vm38_vm5, %v167_v2, -1e+30 }
 0x182   :  { %v182_v3 = vsel %vm172_vm1, %v171_v1, -inf }
 0x183   :  { %183 = vmax.xlane.f32.xlu2 %v182_v3 }
 0x19b   :  { %367 = vrot.lane.b32.xlu2 %v2850_v18, %s2783_s24 }
 0x1a3   :  { %369 = vrot.lane.b32.xlu2 %v2842_v12, %s2783_s24 }
 0x1d6   :  { %v175_v4 = vpop.xlane.xlu0 %174 }
 0x1d7   :  { %v185_v5 = vsub.f32 %v168_v42, %v175_v4 }
 0x1d9   :  { %v189_v6 = vmul.f32 1.442695, %v185_v5 }
 0x1db   :  { %2684 = vpow2.f32 %v189_v6 }
 0x1de   :  { %v178_v7 = vpop.xlane.xlu0 %177 }
 0x1df   :  { %v186_v8 = vsub.f32 %v169_v49, %v178_v7 }
 0x1e1   :  { %v2685_v9 = vpop.eup %2684  ;;  %v191_v10 = vmul.f32 1.442695, %v186_v8 }
 0x1e2   :  { %v197_v13 = vsel %vm35_vm2, %v2685_v9, 0.0 }
 0x1e3   :  { %2686 = vpow2.f32 %v191_v10  ;;  %v201_v14 = vsel %vm172_vm1, %v197_v13, 0.0 }
 0x1e4   :  { %202 = vadd.xlane.f32.xlu0 %v201_v14 }
 0x1e9   :  { %v2687_v15 = vpop.eup %2686 }
 0x1ea   :  { %v2932_v16 = vsel %vm36_vm3, %v2687_v15, 0.0 }
 0x1eb   :  { %v204_v20 = vsel %vm172_vm1, %v2932_v16, 0.0 }
 0x1ec   :  { %205 = vadd.xlane.f32.xlu1 %v204_v20 }
 0x1ee   :  { %v181_v21 = vpop.xlane.xlu1 %180 }
 0x1ef   :  { %v187_v22 = vsub.f32 %v170_v59, %v181_v21 }
 0x1f1   :  { %v193_v23 = vmul.f32 1.442695, %v187_v22 }
 0x1f3   :  { %2688 = vpow2.f32 %v193_v23 }
 0x1f6   :  { %v184_v24 = vpop.xlane.xlu2 %183 }
 0x1f7   :  { %v188_v25 = vsub.f32 %v171_v1, %v184_v24 }
 0x1f9   :  { %v2689_v26 = vpop.eup %2688  ;;  %v195_v27 = vmul.f32 1.442695, %v188_v25 }
 0x1fa   :  { %v2938_v28 = vsel %vm37_vm4, %v2689_v26, 0.0 }
 0x1fb   :  { %2690 = vpow2.f32 %v195_v27  ;;  %v207_v29 = vsel %vm172_vm1, %v2938_v28, 0.0 }
 0x1fc   :  { %208 = vadd.xlane.f32.xlu0 %v207_v29 }
 0x201   :  { %v2691_v30 = vpop.eup %2690 }
 0x202   :  { %v2944_v31 = vsel %vm38_vm5, %v2691_v30, 0.0 }
 0x203   :  { %v210_v32 = vsel %vm172_vm1, %v2944_v31, 0.0 }
 0x204   :  { %211 = vadd.xlane.f32.xlu1 %v210_v32 }
 0x210   :  { %2612 = vrot.lane.b32.xlu0 %v2611_v34, %s2782_s21 }
 0x21d   :  { %2617 = vrot.lane.b32.xlu1 %v2616_v35, %s2782_s21 }
 0x257   :  { %v203_v36 = vpop.xlane.xlu0 %202 }
 0x258   :  { %v213_v37 = vadd.f32 1e-16, %v203_v36 }
 0x25a   :  { %2692 = vrcp.f32 %v213_v37  ;;  %v228_v44 = vand.u32 2147483648, %v213_v37  ;;  %v226_v12 = vand.u32 2147483647, %v213_v37  ;;  %vm222_vm7 = vweird.f32 %v213_v37 }
 0x25c   :  { %v229_v47 = vor.u32 1.1754944e-38, %v228_v44  ;;  %vm227_vm9 = vcmp.eq.f32.partialorder %v226_v12, 8.507059e+37  ;;  %v368_v12 = vpop.permute.xlu2 %367 }
 0x25f   :  { %v206_v38 = vpop.xlane.xlu1 %205 }
 0x260   :  { %v2693_v40 = vpop.eup %2692  ;;  %v214_v41 = vadd.f32 1e-16, %v206_v38 }
 0x261   :  { %v218_v42 = vmul.f32 %v2693_v40, %v213_v37  ;;  %vm223_vm6 = vweird.f32 %v2693_v40 }
 0x262   :  { %2694 = vrcp.f32 %v214_v41  ;;  %vm224_vm8 = vmor %vm222_vm7, %vm223_vm6  ;;  %v243_v54 = vand.u32 2147483648, %v214_v41  ;;  %v241_v58 = vand.u32 2147483647, %v214_v41  ;;  %vm237_vm11 = vweird.f32 %v214_v41 }
 0x263   :  { %v219_v43 = vsub.f32 1.0, %v218_v42 }
 0x264   :  { %v244_v63 = vor.u32 1.1754944e-38, %v243_v54  ;;  %vm242_vm13 = vcmp.eq.f32.partialorder %v241_v58, 8.507059e+37 }
 0x265   :  { %v220_v45 = vmul.f32 %v2693_v40, %v219_v43 }
 0x267   :  { %v221_v18 = vadd.f32 %v2693_v40, %v220_v45 }
 0x268   :  { %v2695_v46 = vpop.eup %2694 }
 0x269   :  { %v233_v48 = vmul.f32 %v2695_v46, %v214_v41  ;;  %v225_v49 = vsel %vm224_vm8, %v2693_v40, %v221_v18  ;;  %vm238_vm10 = vweird.f32 %v2695_v46 }
 0x26a   :  { %v230_v50 = vsel %vm227_vm9, %v229_v47, %v225_v49  ;;  %vm239_vm12 = vmor %vm237_vm11, %vm238_vm10  ;;  %v370_v49 = vpop.permute.xlu2 %369 }
 0x26b   :  { %v234_v52 = vsub.f32 1.0, %v233_v48  ;;  %v231_v53 = vmul.f32 %v230_v50, %v197_v13 }
 0x26d   :  { %v277_v55 = vmul.f32 %v231_v53, %v2892_v33  ;;  %v235_v56 = vmul.f32 %v2695_v46, %v234_v52 }
 0x26f   :  { %v209_v59 = vpop.xlane.xlu0 %208  ;;  %v281_v60 = vsel %vm172_vm1, %v277_v55, 0.0  ;;  %v236_v61 = vadd.f32 %v2695_v46, %v235_v56 }
 0x270   :  { %v215_v62 = vadd.f32 1e-16, %v209_v59  ;;  %282 = vadd.xlane.f32.xlu0 %v281_v60 }
 0x271   :  { %v240_v0 = vsel %vm239_vm12, %v2695_v46, %v236_v61 }
 0x272   :  { %2696 = vrcp.f32 %v215_v62  ;;  %v245_v2 = vsel %vm242_vm13, %v244_v63, %v240_v0  ;;  %v258_v10 = vand.u32 2147483648, %v215_v62  ;;  %v256_v14 = vand.u32 2147483647, %v215_v62 }
 0x273   :  { %v246_v1 = vmul.f32 %v245_v2, %v2932_v16  ;;  %vm252_vm15 = vweird.f32 %v215_v62 }
 0x274   :  { %v259_v16 = vor.u32 1.1754944e-38, %v258_v10  ;;  %vm257_vm7 = vcmp.eq.f32.partialorder %v256_v14, 8.507059e+37 }
 0x275   :  { %v278_v3 = vmul.f32 %v246_v1, %v2896_v39 }
 0x277   :  { %v212_v4 = vpop.xlane.xlu1 %211  ;;  %v284_v5 = vsel %vm172_vm1, %v278_v3, 0.0 }
 0x278   :  { %v2697_v6 = vpop.eup %2696  ;;  %v216_v7 = vadd.f32 1e-16, %v212_v4  ;;  %285 = vadd.xlane.f32.xlu1 %v284_v5  ;;  %v2674_v5 = vld [vmem:[%s3745_s1 + $0x10] ss:$0 sm:$0xff] }
 0x279   :  { %v248_v8 = vmul.f32 %v2697_v6, %v215_v62  ;;  %vm253_vm14 = vweird.f32 %v2697_v6 }
 0x27a   :  { %2698 = vrcp.f32 %v216_v7  ;;  %vm254_vm6 = vmor %vm252_vm15, %vm253_vm14  ;;  %v271_v29 = vand.u32 2147483647, %v216_v7  ;;  %v273_v30 = vand.u32 2147483648, %v216_v7  ;;  %vm267_vm9 = vweird.f32 %v216_v7 }
 0x27b   :  { %v249_v9 = vsub.f32 1.0, %v248_v8 }
 0x27c   :  { %vm272_vm11 = vcmp.eq.f32.partialorder %v271_v29, 8.507059e+37 }
 0x27d   :  { %v250_v13 = vmul.f32 %v2697_v6, %v249_v9 }
 0x27f   :  { %v251_v15 = vadd.f32 %v2697_v6, %v250_v13 }
 0x280   :  { %v2699_v20 = vpop.eup %2698 }
 0x281   :  { %v263_v21 = vmul.f32 %v2699_v20, %v216_v7  ;;  %v255_v22 = vsel %vm254_vm6, %v2697_v6, %v251_v15  ;;  %vm268_vm8 = vweird.f32 %v2699_v20  ;;  %v2990_v6 = vld [vmem:[%s3745_s1 + $0x59] ss:$0 sm:$0xff] }
 0x282   :  { %v2613_v23 = vpop.permute.xlu0 %2612  ;;  %v260_v24 = vsel %vm257_vm7, %v259_v16, %v255_v22  ;;  %vm269_vm10 = vmor %vm267_vm9, %vm268_vm8 }
 0x283   :  { %v264_v25 = vsub.f32 1.0, %v263_v21  ;;  %v2614_v26 = vunpack.i.l.bf16 %v2613_v23  ;;  %v261_v27 = vmul.f32 %v260_v24, %v2938_v28  ;;  %v2615_v32 = vunpack.i.h.bf16 %v2613_v23 }
 0x284   :  { %371 = vrot.lane.b32.xlu0 %v2848_v17, %s2783_s24  ;;  %v274_v17 = vor.u32 1.1754944e-38, %v273_v30 }
 0x285   :  { %323 = vmatpush.msrb.mxu0 %v2614_v26  ;;  %2587 = vmatpush.msra.mxu2 %v2614_v26  ;;  %v279_v34 = vmul.f32 %v261_v27, %v2908_v51  ;;  %v265_v35 = vmul.f32 %v2699_v20, %v264_v25 }
 0x287   :  { %324 = vmatpush.msrb.mxu0 %v2615_v32  ;;  %2588 = vmatpush.msra.mxu2 %v2615_v32  ;;  %v287_v36 = vsel %vm172_vm1, %v279_v34, 0.0  ;;  %v266_v37 = vadd.f32 %v2699_v20, %v265_v35 }
 0x288   :  { %288 = vadd.xlane.f32.xlu2 %v287_v36  ;;  %2503 = vmatmul.msk.f32.vlgmr.msrb.gmra.mxu0 %vm172_vm1, %v231_v53 }
 0x289   :  { %2504 = vmatmul.msk.f32.vlgmr.msra.gmra.mxu2 %vm172_vm1, %v246_v1  ;;  %v270_v28 = vsel %vm269_vm10, %v2699_v20, %v266_v37 }
 0x28a   :  { %v275_v38 = vsel %vm272_vm11, %v274_v17, %v270_v28 }
 0x28b   :  { %v276_v40 = vmul.f32 %v275_v38, %v2944_v31  ;;  %v383_v31 = vld [vmem:[%s3745_s1 + $0x8] sm:$0xff] }
 0x28c   :  { %413 = vmatpush.msrb.mxu2 %v383_v31 }
 0x28d   :  { %v280_v41 = vmul.f32 %v276_v40, %v2912_v57 }
 0x28f   :  { %v2618_v42 = vpop.permute.xlu1 %2617  ;;  %v290_v43 = vsel %vm172_vm1, %v280_v41, 0.0 }
 0x290   :  { %291 = vadd.xlane.f32.xlu1 %v290_v43  ;;  %v2619_v44 = vunpack.i.l.bf16 %v2618_v42  ;;  %v2620_v45 = vunpack.i.h.bf16 %v2618_v42 }
 0x292   :  { %358 = vmatpush.msrb.mxu1 %v2619_v44  ;;  %2589 = vmatpush.msra.mxu3 %v2619_v44 }
 0x294   :  { %359 = vmatpush.msrb.mxu1 %v2620_v45  ;;  %2590 = vmatpush.msra.mxu3 %v2620_v45 }
 0x295   :  { %2505 = vmatmul.msk.f32.vlgmr.msrb.gmra.mxu1 %vm172_vm1, %v261_v27  ;;  %2506 = vmatmul.msk.f32.vlgmr.msra.gmra.mxu3 %vm172_vm1, %v276_v40 }
 0x2a9   :  { %373 = vrot.lane.b32.xlu1 %v2840_v11, %s2783_s24 }
 0x2e3   :  { %v283_v18 = vpop.xlane.xlu0 %282 }
 0x2e4   :  { %v293_v46 = vmul.f32 %v2864_v19, %v283_v18 }
 0x2eb   :  { %v286_v50 = vpop.xlane.xlu1 %285 }
 0x2ec   :  { %v294_v53 = vmul.f32 %v2864_v19, %v286_v50 }
 0x2f6   :  { %v372_v62 = vpop.permute.xlu0 %371 }
 0x2fb   :  { %v289_v55 = vpop.xlane.xlu2 %288 }
 0x2fc   :  { %v295_v58 = vmul.f32 %v2864_v19, %v289_v55 }
 0x303   :  { %v292_v61 = vpop.xlane.xlu1 %291 }
 0x304   :  { %v296_v2 = vmul.f32 %v2864_v19, %v292_v61 }
 0x305   :  { %v326_v47 = vpop.f32.mrf.mxu0 }
 0x306   :  { %v327_v48 = vadd.f32 %v326_v47, %v293_v46 }
 0x308   :  { %v379_v52 = vadd.f32 %v368_v12, %v327_v48 }
 0x30a   :  { %2507 = vmatmul.msk.f32.vlgmr.msrb.gmra.mxu2 %vm73_vm0, %v379_v52 }
 0x30c   :  { %v329_v54 = vpop.f32.mrf.mxu2 }
 0x30d   :  { %v330_v11 = vadd.f32 %v329_v54, %v294_v53 }
 0x30f   :  { %v380_v56 = vadd.f32 %v370_v49, %v330_v11 }
 0x312   :  { %v361_v59 = vpop.f32.mrf.mxu1  ;;  %2508 = vmatmul.msk.f32.gmra.mxu2 %vm73_vm0, %v380_v56 }
 0x313   :  { %v362_v60 = vadd.f32 %v361_v59, %v295_v58 }
 0x315   :  { %v381_v63 = vadd.f32 %v372_v62, %v362_v60 }
 0x318   :  { %v364_v0 = vpop.f32.mrf.mxu3 }
 0x319   :  { %v365_v1 = vadd.f32 %v364_v0, %v296_v2 }
 0x31a   :  { %2509 = vmatmul.msk.f32.gmra.mxu2 %vm73_vm0, %v381_v63 }
 0x31b   :  { %v374_v3 = vpop.permute.xlu1 %373 }
 0x31c   :  { %v382_v4 = vadd.f32 %v374_v3, %v365_v1 }
 0x322   :  { %2510 = vmatmul.msk.f32.gmra.mxu2 %vm73_vm0, %v382_v4 }
 0x38d   :  { %v415_v7 = vpop.f32.mrf.mxu2 }
 0x38e   :  { %v2992_v8 = vadd.f32 %v2674_v5, %v415_v7 }
 0x390   :  { %v429_v19 = vmul.f32 %v2990_v6, %v2992_v8 }
 0x392   :  { %v433_v9 = vsel %vm73_vm0, %v429_v19, 0.0 }
 0x393   :  { %434 = vadd.xlane.f32.xlu1 %v433_v9 }
 0x395   :  { %v418_v10 = vpop.f32.mrf.mxu2 }
 0x396   :  { %v2997_v13 = vadd.f32 %v2674_v5, %v418_v10 }
 0x398   :  { %453 = vrot.lane.b32.xlu0 %v2997_v13, %s2781_s0  ;;  %v430_v24 = vmul.f32 %v2990_v6, %v2997_v13 }
 0x39a   :  { %v436_v26 = vsel %vm73_vm0, %v430_v24, 0.0 }
 0x39d   :  { %v421_v14 = vpop.f32.mrf.mxu2 }
 0x39e   :  { %v3003_v20 = vadd.f32 %v2674_v5, %v421_v14 }
 0x3a0   :  { %451 = vrot.lane.b32.xlu0 %v2992_v8, %s2781_s0  ;;  %v431_v23 = vmul.f32 %v2990_v6, %v3003_v20 }
 0x3a2   :  { %v439_v25 = vsel %vm73_vm0, %v431_v23, 0.0 }
 0x3a5   :  { %v424_v15 = vpop.f32.mrf.mxu2 }
 0x3a6   :  { %v3005_v16 = vadd.f32 %v2674_v5, %v424_v15 }
 0x3a8   :  { %490 = vrot.lane.b32.xlu2 %v3005_v16, %s2781_s0  ;;  %488 = vrot.lane.b32.xlu0 %v3003_v20, %s2781_s0  ;;  %v432_v21 = vmul.f32 %v2990_v6, %v3005_v16 }
 0x3aa   :  { %v442_v22 = vsel %vm73_vm0, %v432_v21, 0.0 }
 0x3ab   :  { %443 = vadd.xlane.f32.xlu1 %v442_v22 }
 0x3d1   :  { %440 = vadd.xlane.f32.xlu2 %v439_v25 }
 0x3d2   :  { %437 = vadd.xlane.f32.xlu0 %v436_v26 }
 0x402   :  { %v491_v27 = vpop.permute.xlu2 %490 }
 0x403   :  { %2515 = vmatpush.xpose.msk.msra.mxu0 %vm73_vm0, %v491_v27 }
 0x406   :  { %v435_v34 = vpop.xlane.xlu1 %434 }
 0x407   :  { %v445_v36 = vmul.f32 %v435_v34, %v2892_v33 }
 0x40a   :  { %v454_v29 = vpop.permute.xlu0 %453 }
 0x40b   :  { %2511 = vmatpush.xpose.msk.msrb.mxu3 %vm73_vm0, %v454_v29  ;;  %v2621_v29 = vpack.i.bf16 %v2992_v8, %v2997_v13 }
 0x412   :  { %v452_v30 = vpop.permute.xlu0 %451 }
 0x413   :  { %2512 = vmatpush.xpose.msk.msrb.mxu3 %vm73_vm0, %v452_v30  ;;  %v2626_v30 = vpack.i.bf16 %v3003_v20, %v3005_v16 }
 0x416   :  { %2513 = vmatmul.msk.f32.vlgmr.msrb.gmra.mxu3 %vm73_vm0, %v2992_v8 }
 0x41a   :  { %v489_v32 = vpop.permute.xlu0 %488 }
 0x41b   :  { %2516 = vmatpush.xpose.msk.msra.mxu0 %vm73_vm0, %v489_v32 }
 0x41e   :  { %2514 = vmatmul.msk.f32.gmra.mxu3 %vm73_vm0, %v2997_v13  ;;  %2517 = vmatmul.msk.f32.vlgmr.msra.gmra.mxu0 %vm73_vm0, %v3003_v20  ;;  %v444_v44 = vpop.xlane.xlu1 %443 }
 0x41f   :  { %v448_v46 = vmul.f32 %v444_v44, %v2912_v57 }
 0x426   :  { %2518 = vmatmul.msk.f32.gmra.mxu0 %vm73_vm0, %v3005_v16 }
 0x444   :  { %v441_v35 = vpop.xlane.xlu2 %440 }
 0x445   :  { %v447_v17 = vmul.f32 %v441_v35, %v2908_v51  ;;  %v438_v42 = vpop.xlane.xlu0 %437 }
 0x446   :  { %v446_v31 = vmul.f32 %v438_v42, %v2896_v39 }
 0x499   :  { %v480_v37 = vpop.f32.mrf.mxu3 }
 0x49a   :  { %v481_v28 = vadd.f32 %v480_v37, %v445_v36 }
 0x49b   :  { %v517_v38 = vpop.f32.mrf.mxu0 }
 0x49c   :  { %v523_v40 = vmul.f32 0.35355338, %v481_v28  ;;  %v518_v41 = vadd.f32 %v517_v38, %v447_v17 }
 0x49e   :  { %v527_v43 = vsel %vm35_vm2, %v523_v40, -1e+30  ;;  %v525_v12 = vmul.f32 0.35355338, %v518_v41 }
 0x49f   :  { %v531_v45 = vsel %vm172_vm1, %v527_v43, -inf }
 0x4a0   :  { %532 = vmax.xlane.f32.xlu0 %v531_v45  ;;  %v529_v52 = vsel %vm37_vm4, %v525_v12, -1e+30 }
 0x4a1   :  { %v483_v18 = vpop.f32.mrf.mxu3  ;;  %v537_v11 = vsel %vm172_vm1, %v529_v52, -inf }
 0x4a2   :  { %v484_v47 = vadd.f32 %v483_v18, %v446_v31 }
 0x4a3   :  { %v520_v48 = vpop.f32.mrf.mxu0 }
 0x4a4   :  { %v524_v49 = vmul.f32 0.35355338, %v484_v47  ;;  %v521_v50 = vadd.f32 %v520_v48, %v448_v46 }
 0x4a6   :  { %v528_v53 = vsel %vm36_vm3, %v524_v49, -1e+30  ;;  %v526_v55 = vmul.f32 0.35355338, %v521_v50 }
 0x4a7   :  { %v534_v54 = vsel %vm172_vm1, %v528_v53, -inf }
 0x4a8   :  { %535 = vmax.xlane.f32.xlu1 %v534_v54  ;;  %538 = vmax.xlane.f32.xlu0 %v537_v11  ;;  %v530_v56 = vsel %vm38_vm5, %v526_v55, -1e+30 }
 0x4a9   :  { %v540_v58 = vsel %vm172_vm1, %v530_v56, -inf }
 0x4b0   :  { %541 = vmax.xlane.f32.xlu1 %v540_v58 }
 0x513   :  { %v533_v59 = vpop.xlane.xlu0 %532 }
 0x514   :  { %v543_v60 = vsub.f32 %v527_v43, %v533_v59 }
 0x516   :  { %v547_v61 = vmul.f32 1.442695, %v543_v60 }
 0x518   :  { %2700 = vpow2.f32 %v547_v61 }
 0x51b   :  { %v539_v62 = vpop.xlane.xlu0 %538  ;;  %v536_v63 = vpop.xlane.xlu1 %535 }
 0x51c   :  { %v545_v0 = vsub.f32 %v529_v52, %v539_v62  ;;  %v544_v2 = vsub.f32 %v528_v53, %v536_v63 }
 0x51e   :  { %v2701_v1 = vpop.eup %2700  ;;  %v551_v3 = vmul.f32 1.442695, %v545_v0  ;;  %v549_v4 = vmul.f32 1.442695, %v544_v2 }
 0x51f   :  { %v555_v5 = vsel %vm35_vm2, %v2701_v1, 0.0 }
 0x520   :  { %2702 = vpow2.f32 %v551_v3  ;;  %v559_v7 = vsel %vm172_vm1, %v555_v5, 0.0 }
 0x521   :  { %2704 = vpow2.f32 %v549_v4  ;;  %560 = vadd.xlane.f32.xlu2 %v559_v7 }
 0x523   :  { %v542_v19 = vpop.xlane.xlu1 %541 }
 0x524   :  { %v546_v9 = vsub.f32 %v530_v56, %v542_v19 }
 0x526   :  { %v2703_v10 = vpop.eup %2702  ;;  %v553_v14 = vmul.f32 1.442695, %v546_v9 }
 0x527   :  { %v2705_v15 = vpop.eup %2704  ;;  %v3053_v21 = vsel %vm37_vm4, %v2703_v10, 0.0 }
 0x528   :  { %2706 = vpow2.f32 %v553_v14  ;;  %v565_v22 = vsel %vm172_vm1, %v3053_v21, 0.0  ;;  %v3059_v23 = vsel %vm36_vm3, %v2705_v15, 0.0 }
 0x529   :  { %566 = vadd.xlane.f32.xlu1 %v565_v22  ;;  %v562_v24 = vsel %vm172_vm1, %v3059_v23, 0.0 }
 0x52a   :  { %563 = vadd.xlane.f32.xlu0 %v562_v24 }
 0x52e   :  { %v2707_v25 = vpop.eup %2706 }
 0x52f   :  { %v3065_v26 = vsel %vm38_vm5, %v2707_v25, 0.0 }
 0x530   :  { %v568_v27 = vsel %vm172_vm1, %v3065_v26, 0.0 }
 0x531   :  { %569 = vadd.xlane.f32.xlu2 %v568_v27 }
 0x53e   :  { %2622 = vrot.lane.b32.xlu0 %v2621_v29, %s2782_s21 }
 0x542   :  { %2627 = vrot.lane.b32.xlu1 %v2626_v30, %s2782_s21 }
 0x549   :  { %725 = vrot.lane.b32.xlu2 %v2992_v8, %s2783_s24 }
 0x54a   :  { %727 = vrot.lane.b32.xlu1 %v2997_v13, %s2783_s24 }
 0x594   :  { %v561_v32 = vpop.xlane.xlu2 %560 }
 0x595   :  { %v571_v34 = vadd.f32 1e-16, %v561_v32 }
 0x597   :  { %2708 = vrcp.f32 %v571_v34  ;;  %v586_v41 = vand.u32 2147483648, %v571_v34  ;;  %v584_v43 = vand.u32 2147483647, %v571_v34  ;;  %vm580_vm13 = vweird.f32 %v571_v34 }
 0x599   :  { %v587_v31 = vor.u32 1.1754944e-38, %v586_v41  ;;  %vm585_vm15 = vcmp.eq.f32.partialorder %v584_v43, 8.507059e+37 }
 0x59c   :  { %v567_v35 = vpop.xlane.xlu1 %566 }
 0x59d   :  { %v2709_v36 = vpop.eup %2708  ;;  %v564_v37 = vpop.xlane.xlu0 %563  ;;  %v573_v17 = vadd.f32 1e-16, %v567_v35 }
 0x59e   :  { %v576_v28 = vmul.f32 %v2709_v36, %v571_v34  ;;  %v572_v38 = vadd.f32 1e-16, %v564_v37  ;;  %vm581_vm12 = vweird.f32 %v2709_v36 }
 0x59f   :  { %2710 = vrcp.f32 %v573_v17  ;;  %vm582_vm14 = vmor %vm580_vm13, %vm581_vm12  ;;  %v614_v53 = vand.u32 2147483647, %v573_v17  ;;  %v616_v54 = vand.u32 2147483648, %v573_v17  ;;  %vm610_vm8 = vweird.f32 %v573_v17 }
 0x5a0   :  { %v577_v40 = vsub.f32 1.0, %v576_v28  ;;  %2712 = vrcp.f32 %v572_v38  ;;  %v601_v55 = vand.u32 2147483648, %v572_v38  ;;  %v599_v59 = vand.u32 2147483647, %v572_v38 }
 0x5a1   :  { %vm595_vm9 = vweird.f32 %v572_v38  ;;  %v617_v0 = vor.u32 1.1754944e-38, %v616_v54  ;;  %vm615_vm12 = vcmp.eq.f32.partialorder %v614_v53, 8.507059e+37 }
 0x5a2   :  { %v578_v42 = vmul.f32 %v2709_v36, %v577_v40  ;;  %v602_v1 = vor.u32 1.1754944e-38, %v601_v55  ;;  %vm600_vm13 = vcmp.eq.f32.partialorder %v599_v59, 8.507059e+37 }
 0x5a4   :  { %v570_v8 = vpop.xlane.xlu2 %569  ;;  %v579_v44 = vadd.f32 %v2709_v36, %v578_v42  ;;  %v741_v42 = vld [vmem:[%s3745_s1 + $0x18] sm:$0xff] }
 0x5a5   :  { %v2711_v13 = vpop.eup %2710  ;;  %v3079_v45 = vadd.f32 1e-16, %v570_v8  ;;  %771 = vmatpush.msrb.mxu0 %v741_v42 }
 0x5a6   :  { %v2713_v12 = vpop.eup %2712  ;;  %v606_v18 = vmul.f32 %v2711_v13, %v573_v17  ;;  %v583_v46 = vsel %vm582_vm14, %v2709_v36, %v579_v44  ;;  %vm611_vm6 = vweird.f32 %v2711_v13 }
 0x5a7   :  { %v591_v47 = vmul.f32 %v2713_v12, %v572_v38  ;;  %2714 = vrcp.f32 %v3079_v45  ;;  %v588_v48 = vsel %vm585_vm15, %v587_v31, %v583_v46  ;;  %vm596_vm7 = vweird.f32 %v2713_v12  ;;  %vm612_vm10 = vmor %vm610_vm8, %vm611_vm6 }
 0x5a8   :  { %v607_v49 = vsub.f32 1.0, %v606_v18  ;;  %v589_v50 = vmul.f32 %v588_v48, %v555_v5  ;;  %vm597_vm11 = vmor %vm595_vm9, %vm596_vm7  ;;  %v631_v35 = vand.u32 2147483648, %v3079_v45  ;;  %vm625_vm15 = vweird.f32 %v3079_v45 }
 0x5a9   :  { %v592_v52 = vsub.f32 1.0, %v591_v47  ;;  %v629_v36 = vand.u32 2147483647, %v3079_v45 }
 0x5aa   :  { %v635_v11 = vmul.f32 %v589_v50, %v2892_v33  ;;  %v608_v56 = vmul.f32 %v2711_v13, %v607_v49  ;;  %v632_v17 = vor.u32 1.1754944e-38, %v631_v35 }
 0x5ab   :  { %v593_v58 = vmul.f32 %v2713_v12, %v592_v52  ;;  %vm630_vm7 = vcmp.eq.f32.partialorder %v629_v36, 8.507059e+37 }
 0x5ac   :  { %v639_v60 = vsel %vm172_vm1, %v635_v11, 0.0  ;;  %v609_v61 = vadd.f32 %v2711_v13, %v608_v56  ;;  %v726_v43 = vpop.permute.xlu2 %725 }
 0x5ad   :  { %v2715_v62 = vpop.eup %2714  ;;  %640 = vadd.xlane.f32.xlu2 %v639_v60  ;;  %v594_v63 = vadd.f32 %v2713_v12, %v593_v58  ;;  %v2676_v60 = vld [vmem:[%s3745_s1 + $0x20] ss:$0 sm:$0xff] }
 0x5ae   :  { %v621_v2 = vmul.f32 %v2715_v62, %v3079_v45  ;;  %v613_v3 = vsel %vm612_vm10, %v2711_v13, %v609_v61  ;;  %vm626_vm14 = vweird.f32 %v2715_v62 }
 0x5af   :  { %v598_v4 = vsel %vm597_vm11, %v2713_v12, %v594_v63  ;;  %v618_v5 = vsel %vm615_vm12, %v617_v0, %v613_v3  ;;  %vm627_vm6 = vmor %vm625_vm15, %vm626_vm14 }
 0x5b0   :  { %v622_v7 = vsub.f32 1.0, %v621_v2  ;;  %v2623_v19 = vpop.permute.xlu0 %2622  ;;  %v603_v9 = vsel %vm600_vm13, %v602_v1, %v598_v4  ;;  %v619_v10 = vmul.f32 %v618_v5, %v3053_v21  ;;  %v3134_v1 = vld [vmem:[%s3745_s1 + $0x5a] ss:$0 sm:$0xff] }
 0x5b1   :  { %v2624_v14 = vunpack.i.l.bf16 %v2623_v19  ;;  %v604_v15 = vmul.f32 %v603_v9, %v3059_v23  ;;  %v2625_v25 = vunpack.i.h.bf16 %v2623_v19 }
 0x5b2   :  { %v637_v22 = vmul.f32 %v619_v10, %v2908_v51  ;;  %v623_v24 = vmul.f32 %v2715_v62, %v622_v7 }
 0x5b3   :  { %681 = vmatpush.msra.mxu1 %v2624_v14  ;;  %v636_v27 = vmul.f32 %v604_v15, %v2896_v39 }
 0x5b4   :  { %v2628_v29 = vpop.permute.xlu1 %2627  ;;  %v645_v30 = vsel %vm172_vm1, %v637_v22, 0.0  ;;  %v624_v21 = vadd.f32 %v2715_v62, %v623_v24 }
 0x5b5   :  { %682 = vmatpush.msra.mxu1 %v2625_v25  ;;  %v2629_v32 = vunpack.i.l.bf16 %v2628_v29  ;;  %v642_v34 = vsel %vm172_vm1, %v636_v27, 0.0  ;;  %646 = vadd.xlane.f32.xlu1 %v645_v30  ;;  %v2630_v23 = vunpack.i.h.bf16 %v2628_v29 }
 0x5b6   :  { %643 = vadd.xlane.f32.xlu0 %v642_v34  ;;  %2519 = vmatmul.msk.f32.vlgmr.msra.gmra.mxu1 %vm172_vm1, %v589_v50  ;;  %v628_v37 = vsel %vm627_vm6, %v2715_v62, %v624_v21 }
 0x5b7   :  { %716 = vmatpush.msra.mxu3 %v2629_v32  ;;  %v633_v28 = vsel %vm630_vm7, %v632_v17, %v628_v37 }
 0x5b8   :  { %v634_v38 = vmul.f32 %v633_v28, %v3065_v26 }
 0x5b9   :  { %717 = vmatpush.msra.mxu3 %v2630_v23 }
 0x5ba   :  { %2521 = vmatmul.msk.f32.vlgmr.msra.gmra.mxu3 %vm172_vm1, %v619_v10  ;;  %v638_v40 = vmul.f32 %v634_v38, %v2912_v57 }
 0x5bc   :  { %v648_v41 = vsel %vm172_vm1, %v638_v40, 0.0 }
 0x5be   :  { %2520 = vmatmul.msk.f32.gmra.mxu1 %vm172_vm1, %v604_v15 }
 0x5c2   :  { %2522 = vmatmul.msk.f32.gmra.mxu3 %vm172_vm1, %v634_v38 }
 0x5c5   :  { %729 = vrot.lane.b32.xlu2 %v3003_v20, %s2783_s24  ;;  %v728_v20 = vpop.permute.xlu1 %727 }
 0x5ca   :  { %731 = vrot.lane.b32.xlu0 %v3005_v16, %s2783_s24 }
 0x5ee   :  { %649 = vadd.xlane.f32.xlu2 %v648_v41 }
 0x620   :  { %v641_v26 = vpop.xlane.xlu2 %640 }
 0x621   :  { %v651_v8 = vmul.f32 %v2990_v6, %v641_v26 }
 0x628   :  { %v647_v46 = vpop.xlane.xlu1 %646  ;;  %v730_v52 = vpop.permute.xlu2 %729 }
 0x629   :  { %v644_v31 = vpop.xlane.xlu0 %643  ;;  %v653_v49 = vmul.f32 %v2990_v6, %v647_v46 }
 0x62a   :  { %v652_v16 = vmul.f32 %v2990_v6, %v644_v31 }
 0x633   :  { %v684_v44 = vpop.f32.mrf.mxu1 }
 0x634   :  { %v685_v13 = vadd.f32 %v684_v44, %v651_v8 }
 0x636   :  { %v737_v45 = vadd.f32 %v726_v43, %v685_v13 }
 0x638   :  { %2523 = vmatmul.msk.f32.vlgmr.msrb.gmra.mxu0 %vm73_vm0, %v737_v45 }
 0x63b   :  { %v687_v12 = vpop.f32.mrf.mxu1 }
 0x63c   :  { %v688_v18 = vadd.f32 %v687_v12, %v652_v16  ;;  %v732_v58 = vpop.permute.xlu0 %731 }
 0x63d   :  { %v719_v48 = vpop.f32.mrf.mxu3 }
 0x63e   :  { %v738_v47 = vadd.f32 %v728_v20, %v688_v18  ;;  %v720_v50 = vadd.f32 %v719_v48, %v653_v49 }
 0x640   :  { %2524 = vmatmul.msk.f32.gmra.mxu0 %vm73_vm0, %v738_v47  ;;  %v739_v53 = vadd.f32 %v730_v52, %v720_v50 }
 0x645   :  { %v722_v55 = vpop.f32.mrf.mxu3 }
 0x648   :  { %2525 = vmatmul.msk.f32.gmra.mxu0 %vm73_vm0, %v739_v53 }
 0x661   :  { %v650_v54 = vpop.xlane.xlu2 %649 }
 0x662   :  { %v654_v11 = vmul.f32 %v2990_v6, %v650_v54 }
 0x664   :  { %v723_v56 = vadd.f32 %v722_v55, %v654_v11 }
 0x666   :  { %v740_v59 = vadd.f32 %v732_v58, %v723_v56 }
 0x668   :  { %2526 = vmatmul.msk.f32.gmra.mxu0 %vm73_vm0, %v740_v59 }
 0x6b5   :  { %v773_v61 = vpop.f32.mrf.mxu0 }
 0x6b6   :  { %v3119_v62 = vadd.f32 %v2676_v60, %v773_v61 }
 0x6b8   :  { %809 = vrot.lane.b32.xlu0 %v3119_v62, %s2781_s0  ;;  %v787_v19 = vmul.f32 %v3134_v1, %v3119_v62 }
 0x6ba   :  { %v791_v9 = vsel %vm73_vm0, %v787_v19, 0.0 }
 0x6bd   :  { %v776_v63 = vpop.f32.mrf.mxu0 }
 0x6be   :  { %v3123_v0 = vadd.f32 %v2676_v60, %v776_v63 }
 0x6c0   :  { %811 = vrot.lane.b32.xlu1 %v3123_v0, %s2781_s0  ;;  %v788_v4 = vmul.f32 %v3134_v1, %v3123_v0  ;;  %v2631_v49 = vpack.i.bf16 %v3119_v62, %v3123_v0 }
 0x6c2   :  { %v794_v7 = vsel %vm73_vm0, %v788_v4, 0.0 }
 0x6c5   :  { %v779_v6 = vpop.f32.mrf.mxu0 }
 0x6c6   :  { %v3127_v2 = vadd.f32 %v2676_v60, %v779_v6 }
 0x6c8   :  { %846 = vrot.lane.b32.xlu0 %v3127_v2, %s2781_s0  ;;  %v789_v15 = vmul.f32 %v3134_v1, %v3127_v2 }
 0x6ca   :  { %v797_v22 = vsel %vm73_vm0, %v789_v15, 0.0 }
 0x6e5   :  { %v782_v3 = vpop.f32.mrf.mxu0 }
 0x6e6   :  { %v3138_v5 = vadd.f32 %v2676_v60, %v782_v3 }
 0x6e8   :  { %848 = vrot.lane.b32.xlu2 %v3138_v5, %s2781_s0  ;;  %v790_v10 = vmul.f32 %v3134_v1, %v3138_v5 }
 0x6ea   :  { %795 = vadd.xlane.f32.xlu1 %v794_v7  ;;  %v800_v14 = vsel %vm73_vm0, %v790_v10, 0.0 }
 0x6f2   :  { %792 = vadd.xlane.f32.xlu0 %v791_v9 }
 0x6fa   :  { %801 = vadd.xlane.f32.xlu0 %v800_v14 }
 0x711   :  { %798 = vadd.xlane.f32.xlu2 %v797_v22 }
 0x72a   :  { %v810_v25 = vpop.permute.xlu0 %809 }
 0x732   :  { %v812_v24 = vpop.permute.xlu1 %811 }
 0x733   :  { %2527 = vmatpush.xpose.msk.msrb.mxu1 %vm73_vm0, %v812_v24 }
 0x737   :  { %2528 = vmatpush.xpose.msk.msrb.mxu1 %vm73_vm0, %v810_v25 }
 0x73a   :  { %2529 = vmatmul.msk.f32.vlgmr.msrb.gmra.mxu1 %vm73_vm0, %v3119_v62  ;;  %v847_v29 = vpop.permute.xlu0 %846 }
 0x742   :  { %2530 = vmatmul.msk.f32.gmra.mxu1 %vm73_vm0, %v3123_v0  ;;  %v849_v27 = vpop.permute.xlu2 %848 }
 0x743   :  { %2531 = vmatpush.xpose.msk.msra.mxu2 %vm73_vm0, %v849_v27 }
 0x747   :  { %2532 = vmatpush.xpose.msk.msra.mxu2 %vm73_vm0, %v847_v29 }
 0x74a   :  { %2533 = vmatmul.msk.f32.vlgmr.msra.gmra.mxu2 %vm73_vm0, %v3127_v2 }
 0x752   :  { %2534 = vmatmul.msk.f32.gmra.mxu2 %vm73_vm0, %v3138_v5 }
 0x75d   :  { %v796_v35 = vpop.xlane.xlu1 %795 }
 0x75e   :  { %v804_v17 = vmul.f32 %v796_v35, %v2896_v39 }
 0x765   :  { %v793_v30 = vpop.xlane.xlu0 %792 }
 0x766   :  { %v803_v32 = vmul.f32 %v793_v30, %v2892_v33 }
 0x76d   :  { %v802_v20 = vpop.xlane.xlu0 %801 }
 0x76e   :  { %v806_v16 = vmul.f32 %v802_v20, %v2912_v57 }
 0x784   :  { %v799_v43 = vpop.xlane.xlu2 %798 }
 0x785   :  { %v805_v26 = vmul.f32 %v799_v43, %v2908_v51 }
 0x7b7   :  { %v838_v34 = vpop.f32.mrf.mxu1 }
 0x7b8   :  { %v839_v21 = vadd.f32 %v838_v34, %v803_v32  ;;  %v2636_v32 = vpack.i.bf16 %v3127_v2, %v3138_v5 }
 0x7ba   :  { %v881_v23 = vmul.f32 0.35355338, %v839_v21 }
 0x7bc   :  { %v885_v36 = vsel %vm35_vm2, %v881_v23, -1e+30 }
 0x7bd   :  { %v889_v37 = vsel %vm172_vm1, %v885_v36, -inf }
 0x7be   :  { %890 = vmax.xlane.f32.xlu1 %v889_v37 }
 0x7bf   :  { %v841_v28 = vpop.f32.mrf.mxu1 }
 0x7c0   :  { %v842_v38 = vadd.f32 %v841_v28, %v804_v17 }
 0x7c2   :  { %v882_v40 = vmul.f32 0.35355338, %v842_v38 }
 0x7c4   :  { %v886_v41 = vsel %vm36_vm3, %v882_v40, -1e+30 }
 0x7c5   :  { %v892_v42 = vsel %vm172_vm1, %v886_v41, -inf }
 0x7c6   :  { %893 = vmax.xlane.f32.xlu0 %v892_v42 }
 0x7cd   :  { %v875_v8 = vpop.f32.mrf.mxu2 }
 0x7ce   :  { %v876_v44 = vadd.f32 %v875_v8, %v805_v26 }
 0x7d0   :  { %v883_v13 = vmul.f32 0.35355338, %v876_v44 }
 0x7d2   :  { %v887_v45 = vsel %vm37_vm4, %v883_v13, -1e+30 }
 0x7d3   :  { %v895_v31 = vsel %vm172_vm1, %v887_v45, -inf }
 0x7d4   :  { %896 = vmax.xlane.f32.xlu1 %v895_v31 }
 0x7d5   :  { %v878_v12 = vpop.f32.mrf.mxu2 }
 0x7d6   :  { %v879_v18 = vadd.f32 %v878_v12, %v806_v16 }
 0x7d8   :  { %v884_v46 = vmul.f32 0.35355338, %v879_v18 }
 0x7da   :  { %v888_v47 = vsel %vm38_vm5, %v884_v46, -1e+30 }
 0x7db   :  { %v898_v48 = vsel %vm172_vm1, %v888_v47, -inf }
 0x7dc   :  { %899 = vmax.xlane.f32.xlu2 %v898_v48 }
 0x7f4   :  { %2632 = vrot.lane.b32.xlu2 %v2631_v49, %s2782_s21 }
 0x831   :  { %v891_v50 = vpop.xlane.xlu1 %890 }
 0x832   :  { %v901_v52 = vsub.f32 %v885_v36, %v891_v50 }
 0x834   :  { %v905_v53 = vmul.f32 1.442695, %v901_v52 }
 0x836   :  { %2716 = vpow2.f32 %v905_v53 }
 0x839   :  { %v894_v54 = vpop.xlane.xlu0 %893 }
 0x83a   :  { %v902_v11 = vsub.f32 %v886_v41, %v894_v54 }
 0x83c   :  { %v2717_v55 = vpop.eup %2716  ;;  %v907_v56 = vmul.f32 1.442695, %v902_v11 }
 0x83d   :  { %v913_v58 = vsel %vm35_vm2, %v2717_v55, 0.0 }
 0x83e   :  { %2718 = vpow2.f32 %v907_v56  ;;  %v917_v59 = vsel %vm172_vm1, %v913_v58, 0.0 }
 0x83f   :  { %918 = vadd.xlane.f32.xlu0 %v917_v59 }
 0x844   :  { %v2719_v60 = vpop.eup %2718 }
 0x845   :  { %v3188_v61 = vsel %vm36_vm3, %v2719_v60, 0.0 }
 0x846   :  { %v920_v63 = vsel %vm172_vm1, %v3188_v61, 0.0 }
 0x847   :  { %921 = vadd.xlane.f32.xlu1 %v920_v63  ;;  %v897_v6 = vpop.xlane.xlu1 %896 }
 0x848   :  { %v903_v3 = vsub.f32 %v887_v45, %v897_v6 }
 0x84a   :  { %v909_v4 = vmul.f32 1.442695, %v903_v3 }
 0x84c   :  { %2720 = vpow2.f32 %v909_v4 }
 0x84f   :  { %v900_v7 = vpop.xlane.xlu2 %899 }
 0x850   :  { %v904_v19 = vsub.f32 %v888_v47, %v900_v7 }
 0x852   :  { %v2721_v9 = vpop.eup %2720  ;;  %v911_v10 = vmul.f32 1.442695, %v904_v19 }
 0x853   :  { %v3194_v14 = vsel %vm37_vm4, %v2721_v9, 0.0 }
 0x854   :  { %2722 = vpow2.f32 %v911_v10  ;;  %v923_v15 = vsel %vm172_vm1, %v3194_v14, 0.0 }
 0x855   :  { %924 = vadd.xlane.f32.xlu0 %v923_v15 }
 0x857   :  { %v2633_v22 = vpop.permute.xlu2 %2632 }
 0x858   :  { %v2634_v24 = vunpack.i.l.bf16 %v2633_v22  ;;  %v2635_v27 = vunpack.i.h.bf16 %v2633_v22 }
 0x85a   :  { %v2723_v25 = vpop.eup %2722  ;;  %1039 = vmatpush.msrb.mxu3 %v2634_v24 }
 0x85b   :  { %v3200_v29 = vsel %vm38_vm5, %v2723_v25, 0.0 }
 0x85c   :  { %1040 = vmatpush.msrb.mxu3 %v2635_v27  ;;  %v926_v30 = vsel %vm172_vm1, %v3200_v29, 0.0 }
 0x85d   :  { %927 = vadd.xlane.f32.xlu1 %v926_v30 }
 0x869   :  { %2637 = vrot.lane.b32.xlu0 %v2636_v32, %s2782_s21 }
 0x871   :  { %1085 = vrot.lane.b32.xlu0 %v3123_v0, %s2783_s24 }
 0x876   :  { %1083 = vrot.lane.b32.xlu1 %v3119_v62, %s2783_s24 }
 0x8b2   :  { %v919_v34 = vpop.xlane.xlu0 %918 }
 0x8b3   :  { %v929_v21 = vadd.f32 1e-16, %v919_v34 }
 0x8b5   :  { %2724 = vrcp.f32 %v929_v21  ;;  %v944_v28 = vand.u32 2147483648, %v929_v21  ;;  %v942_v40 = vand.u32 2147483647, %v929_v21  ;;  %vm938_vm9 = vweird.f32 %v929_v21 }
 0x8b7   :  { %v945_v0 = vor.u32 1.1754944e-38, %v944_v28  ;;  %vm943_vm11 = vcmp.eq.f32.partialorder %v942_v40, 8.507059e+37  ;;  %v1099_v28 = vld [vmem:[%s3745_s1 + $0x28] sm:$0xff] }
 0x8b8   :  { %1129 = vmatpush.msrb.mxu2 %v1099_v28 }
 0x8ba   :  { %v922_v23 = vpop.xlane.xlu1 %921 }
 0x8bb   :  { %v2725_v35 = vpop.eup %2724  ;;  %v930_v36 = vadd.f32 1e-16, %v922_v23 }
 0x8bc   :  { %v934_v37 = vmul.f32 %v2725_v35, %v929_v21  ;;  %vm939_vm8 = vweird.f32 %v2725_v35 }
 0x8bd   :  { %2726 = vrcp.f32 %v930_v36  ;;  %vm940_vm10 = vmor %vm938_vm9, %vm939_vm8  ;;  %v959_v13 = vand.u32 2147483648, %v930_v36  ;;  %v957_v16 = vand.u32 2147483647, %v930_v36  ;;  %vm953_vm13 = vweird.f32 %v930_v36 }
 0x8be   :  { %v935_v17 = vsub.f32 1.0, %v934_v37 }
 0x8bf   :  { %v960_v47 = vor.u32 1.1754944e-38, %v959_v13  ;;  %vm958_vm15 = vcmp.eq.f32.partialorder %v957_v16, 8.507059e+37 }
 0x8c0   :  { %v936_v38 = vmul.f32 %v2725_v35, %v935_v17 }
 0x8c2   :  { %v937_v41 = vadd.f32 %v2725_v35, %v936_v38 }
 0x8c3   :  { %v2727_v42 = vpop.eup %2726 }
 0x8c4   :  { %v949_v62 = vmul.f32 %v2727_v42, %v930_v36  ;;  %v941_v43 = vsel %vm940_vm10, %v2725_v35, %v937_v41  ;;  %vm954_vm12 = vweird.f32 %v2727_v42 }
 0x8c5   :  { %v946_v26 = vsel %vm943_vm11, %v945_v0, %v941_v43  ;;  %vm955_vm14 = vmor %vm953_vm13, %vm954_vm12 }
 0x8c6   :  { %v950_v8 = vsub.f32 1.0, %v949_v62  ;;  %v947_v44 = vmul.f32 %v946_v26, %v913_v58 }
 0x8c8   :  { %2535 = vmatmul.msk.f32.vlgmr.msrb.gmra.mxu3 %vm172_vm1, %v947_v44  ;;  %v925_v20 = vpop.xlane.xlu0 %924  ;;  %v993_v45 = vmul.f32 %v947_v44, %v2892_v33  ;;  %v951_v31 = vmul.f32 %v2727_v42, %v950_v8 }
 0x8c9   :  { %v931_v12 = vadd.f32 1e-16, %v925_v20 }
 0x8ca   :  { %v997_v18 = vsel %vm172_vm1, %v993_v45, 0.0  ;;  %v952_v46 = vadd.f32 %v2727_v42, %v951_v31 }
 0x8cb   :  { %2728 = vrcp.f32 %v931_v12  ;;  %998 = vadd.xlane.f32.xlu1 %v997_v18  ;;  %v974_v59 = vand.u32 2147483648, %v931_v12  ;;  %v972_v63 = vand.u32 2147483647, %v931_v12  ;;  %vm968_vm7 = vweird.f32 %v931_v12 }
 0x8cc   :  { %v956_v48 = vsel %vm955_vm14, %v2727_v42, %v952_v46 }
 0x8cd   :  { %v961_v49 = vsel %vm958_vm15, %v960_v47, %v956_v48  ;;  %v975_v3 = vor.u32 1.1754944e-38, %v974_v59  ;;  %vm973_vm9 = vcmp.eq.f32.partialorder %v972_v63, 8.507059e+37 }
 0x8ce   :  { %v962_v50 = vmul.f32 %v961_v49, %v3188_v61 }
 0x8d0   :  { %2536 = vmatmul.msk.f32.gmra.mxu3 %vm172_vm1, %v962_v50  ;;  %v928_v52 = vpop.xlane.xlu1 %927  ;;  %v994_v53 = vmul.f32 %v962_v50, %v2896_v39  ;;  %v2678_v50 = vld [vmem:[%s3745_s1 + $0x30] ss:$0 sm:$0xff] }
 0x8d1   :  { %v2729_v54 = vpop.eup %2728  ;;  %v932_v11 = vadd.f32 1e-16, %v928_v52 }
 0x8d2   :  { %v964_v55 = vmul.f32 %v2729_v54, %v931_v12  ;;  %v1000_v56 = vsel %vm172_vm1, %v994_v53, 0.0  ;;  %vm969_vm6 = vweird.f32 %v2729_v54 }
 0x8d3   :  { %2730 = vrcp.f32 %v932_v11  ;;  %1001 = vadd.xlane.f32.xlu2 %v1000_v56  ;;  %vm970_vm8 = vmor %vm968_vm7, %vm969_vm6  ;;  %v989_v24 = vand.u32 2147483648, %v932_v11  ;;  %v987_v32 = vand.u32 2147483647, %v932_v11  ;;  %vm983_vm11 = vweird.f32 %v932_v11  ;;  %v3259_v56 = vld [vmem:[%s3745_s1 + $0x5b] ss:$0 sm:$0xff] }
 0x8d4   :  { %v965_v58 = vsub.f32 1.0, %v964_v55 }
 0x8d5   :  { %v990_v35 = vor.u32 1.1754944e-38, %v989_v24  ;;  %vm988_vm13 = vcmp.eq.f32.partialorder %v987_v32, 8.507059e+37 }
 0x8d6   :  { %v966_v60 = vmul.f32 %v2729_v54, %v965_v58 }
 0x8d8   :  { %v967_v6 = vadd.f32 %v2729_v54, %v966_v60 }
 0x8d9   :  { %v2731_v61 = vpop.eup %2730 }
 0x8da   :  { %v979_v4 = vmul.f32 %v2731_v61, %v932_v11  ;;  %v971_v7 = vsel %vm970_vm8, %v2729_v54, %v967_v6  ;;  %vm984_vm10 = vweird.f32 %v2731_v61 }
 0x8db   :  { %v2638_v19 = vpop.permute.xlu0 %2637  ;;  %v976_v9 = vsel %vm973_vm9, %v975_v3, %v971_v7  ;;  %vm985_vm12 = vmor %vm983_vm11, %vm984_vm10 }
 0x8dc   :  { %v980_v10 = vsub.f32 1.0, %v979_v4  ;;  %v2639_v15 = vunpack.i.l.bf16 %v2638_v19  ;;  %v977_v22 = vmul.f32 %v976_v9, %v3194_v14  ;;  %v2640_v25 = vunpack.i.h.bf16 %v2638_v19 }
 0x8de   :  { %1074 = vmatpush.msra.mxu1 %v2639_v15  ;;  %v995_v27 = vmul.f32 %v977_v22, %v2908_v51  ;;  %v981_v30 = vmul.f32 %v2731_v61, %v980_v10 }
 0x8e0   :  { %1075 = vmatpush.msra.mxu1 %v2640_v25  ;;  %v1003_v34 = vsel %vm172_vm1, %v995_v27, 0.0  ;;  %v982_v21 = vadd.f32 %v2731_v61, %v981_v30 }
 0x8e1   :  { %1004 = vadd.xlane.f32.xlu0 %v1003_v34  ;;  %2537 = vmatmul.msk.f32.vlgmr.msra.gmra.mxu1 %vm172_vm1, %v977_v22 }
 0x8e2   :  { %v986_v23 = vsel %vm985_vm12, %v2731_v61, %v982_v21 }
 0x8e3   :  { %v991_v14 = vsel %vm988_vm13, %v990_v35, %v986_v23 }
 0x8e4   :  { %1087 = vrot.lane.b32.xlu1 %v3127_v2, %s2783_s24  ;;  %v992_v36 = vmul.f32 %v991_v14, %v3200_v29 }
 0x8e6   :  { %v996_v37 = vmul.f32 %v992_v36, %v2912_v57 }
 0x8e8   :  { %v1006_v17 = vsel %vm172_vm1, %v996_v37, 0.0  ;;  %v1084_v38 = vpop.permute.xlu1 %1083 }
 0x8e9   :  { %2538 = vmatmul.msk.f32.gmra.mxu1 %vm172_vm1, %v992_v36 }
 0x8eb   :  { %1089 = vrot.lane.b32.xlu2 %v3138_v5, %s2783_s24  ;;  %v1086_v5 = vpop.permute.xlu0 %1085 }
 0x90e   :  { %1007 = vadd.xlane.f32.xlu1 %v1006_v17 }
 0x93e   :  { %v999_v2 = vpop.xlane.xlu1 %998 }
 0x93f   :  { %v1009_v40 = vmul.f32 %v3134_v1, %v999_v2 }
 0x946   :  { %v1002_v0 = vpop.xlane.xlu2 %1001 }
 0x947   :  { %v1010_v62 = vmul.f32 %v3134_v1, %v1002_v0 }
 0x94b   :  { %v1042_v29 = vpop.f32.mrf.mxu3 }
 0x94c   :  { %v1043_v41 = vadd.f32 %v1042_v29, %v1009_v40 }
 0x94e   :  { %v1095_v42 = vadd.f32 %v1084_v38, %v1043_v41  ;;  %v1090_v48 = vpop.permute.xlu2 %1089 }
 0x950   :  { %2539 = vmatmul.msk.f32.vlgmr.msrb.gmra.mxu2 %vm73_vm0, %v1095_v42 }
 0x953   :  { %v1045_v43 = vpop.f32.mrf.mxu3 }
 0x954   :  { %v1046_v26 = vadd.f32 %v1045_v43, %v1010_v62  ;;  %v1005_v44 = vpop.xlane.xlu0 %1004 }
 0x955   :  { %v1011_v13 = vmul.f32 %v3134_v1, %v1005_v44 }
 0x956   :  { %v1096_v8 = vadd.f32 %v1086_v5, %v1046_v26  ;;  %v1088_v31 = vpop.permute.xlu1 %1087 }
 0x958   :  { %2540 = vmatmul.msk.f32.gmra.mxu2 %vm73_vm0, %v1096_v8 }
 0x95e   :  { %v1077_v20 = vpop.f32.mrf.mxu1 }
 0x95f   :  { %v1078_v45 = vadd.f32 %v1077_v20, %v1011_v13 }
 0x961   :  { %v1097_v16 = vadd.f32 %v1088_v31, %v1078_v45 }
 0x963   :  { %2541 = vmatmul.msk.f32.gmra.mxu2 %vm73_vm0, %v1097_v16 }
 0x966   :  { %v1080_v46 = vpop.f32.mrf.mxu1 }
 0x981   :  { %v1008_v12 = vpop.xlane.xlu1 %1007 }
 0x982   :  { %v1012_v18 = vmul.f32 %v3134_v1, %v1008_v12 }
 0x984   :  { %v1081_v47 = vadd.f32 %v1080_v46, %v1012_v18 }
 0x986   :  { %v1098_v49 = vadd.f32 %v1090_v48, %v1081_v47 }
 0x988   :  { %2542 = vmatmul.msk.f32.gmra.mxu2 %vm73_vm0, %v1098_v49 }
 0x9d3   :  { %v1131_v52 = vpop.f32.mrf.mxu2 }
 0x9d4   :  { %v3244_v53 = vadd.f32 %v2678_v50, %v1131_v52 }
 0x9d6   :  { %1167 = vrot.lane.b32.xlu2 %v3244_v53, %s2781_s0  ;;  %v1145_v58 = vmul.f32 %v3259_v56, %v3244_v53 }
 0x9d8   :  { %v1149_v59 = vsel %vm73_vm0, %v1145_v58, 0.0 }
 0x9db   :  { %v1134_v54 = vpop.f32.mrf.mxu2 }
 0x9dc   :  { %v3248_v11 = vadd.f32 %v2678_v50, %v1134_v54 }
 0x9de   :  { %1169 = vrot.lane.b32.xlu0 %v3248_v11, %s2781_s0  ;;  %v1146_v7 = vmul.f32 %v3259_v56, %v3248_v11 }
 0x9e0   :  { %v1152_v19 = vsel %vm73_vm0, %v1146_v7, 0.0 }
 0x9e6   :  { %v1137_v1 = vpop.f32.mrf.mxu2 }
 0x9e7   :  { %v3252_v55 = vadd.f32 %v2678_v50, %v1137_v1 }
 0x9e9   :  { %1204 = vrot.lane.b32.xlu1 %v3252_v55, %s2781_s0  ;;  %v1147_v61 = vmul.f32 %v3259_v56, %v3252_v55 }
 0x9eb   :  { %v1155_v4 = vsel %vm73_vm0, %v1147_v61, 0.0 }
 0xa08   :  { %1150 = vadd.xlane.f32.xlu0 %v1149_v59 }
 0xa0b   :  { %v1140_v60 = vpop.f32.mrf.mxu2 }
 0xa0c   :  { %v3264_v63 = vadd.f32 %v2678_v50, %v1140_v60 }
 0xa0e   :  { %1206 = vrot.lane.b32.xlu2 %v3264_v63, %s2781_s0  ;;  %v1148_v6 = vmul.f32 %v3259_v56, %v3264_v63 }
 0xa10   :  { %v1158_v3 = vsel %vm73_vm0, %v1148_v6, 0.0 }
 0xa11   :  { %1159 = vadd.xlane.f32.xlu0 %v1158_v3 }
 0xa13   :  { %1156 = vadd.xlane.f32.xlu1 %v1155_v4 }
 0xa30   :  { %v1168_v10 = vpop.permute.xlu2 %1167 }
 0xa37   :  { %1153 = vadd.xlane.f32.xlu2 %v1152_v19 }
 0xa50   :  { %v1170_v9 = vpop.permute.xlu0 %1169 }
 0xa51   :  { %2543 = vmatpush.xpose.msk.msra.mxu3 %vm73_vm0, %v1170_v9 }
 0xa55   :  { %2544 = vmatpush.xpose.msk.msra.mxu3 %vm73_vm0, %v1168_v10  ;;  %v2641_v10 = vpack.i.bf16 %v3244_v53, %v3248_v11 }
 0xa58   :  { %2545 = vmatmul.msk.f32.vlgmr.msra.gmra.mxu3 %vm73_vm0, %v3244_v53 }
 0xa5b   :  { %v1205_v22 = vpop.permute.xlu1 %1204 }
 0xa60   :  { %2546 = vmatmul.msk.f32.gmra.mxu3 %vm73_vm0, %v3248_v11 }
 0xa68   :  { %v1207_v15 = vpop.permute.xlu2 %1206 }
 0xa69   :  { %2547 = vmatpush.xpose.msk.msra.mxu0 %vm73_vm0, %v1207_v15  ;;  %v2646_v15 = vpack.i.bf16 %v3252_v55, %v3264_v63 }
 0xa6d   :  { %2548 = vmatpush.xpose.msk.msra.mxu0 %vm73_vm0, %v1205_v22 }
 0xa70   :  { %2549 = vmatmul.msk.f32.vlgmr.msra.gmra.mxu0 %vm73_vm0, %v3252_v55 }
 0xa78   :  { %2550 = vmatmul.msk.f32.gmra.mxu0 %vm73_vm0, %v3264_v63 }
 0xa7b   :  { %v1151_v24 = vpop.xlane.xlu0 %1150 }
 0xa7c   :  { %v1161_v25 = vmul.f32 %v1151_v24, %v2892_v33 }
 0xa84   :  { %v1160_v42 = vpop.xlane.xlu0 %1159 }
 0xa85   :  { %v1164_v62 = vmul.f32 %v1160_v42, %v2912_v57 }
 0xa86   :  { %v1157_v28 = vpop.xlane.xlu1 %1156 }
 0xa87   :  { %v1163_v2 = vmul.f32 %v1157_v28, %v2908_v51 }
 0xaaa   :  { %v1154_v34 = vpop.xlane.xlu2 %1153 }
 0xaab   :  { %v1162_v35 = vmul.f32 %v1154_v34, %v2896_v39 }
 0xadb   :  { %v1196_v27 = vpop.f32.mrf.mxu3 }
 0xadc   :  { %v1197_v30 = vadd.f32 %v1196_v27, %v1161_v25 }
 0xade   :  { %v1239_v32 = vmul.f32 0.35355338, %v1197_v30 }
 0xae0   :  { %v1243_v21 = vsel %vm35_vm2, %v1239_v32, -1e+30 }
 0xae1   :  { %v1247_v23 = vsel %vm172_vm1, %v1243_v21, -inf }
 0xae2   :  { %1248 = vmax.xlane.f32.xlu2 %v1247_v23 }
 0xae3   :  { %v1199_v14 = vpop.f32.mrf.mxu3 }
 0xae4   :  { %v1200_v36 = vadd.f32 %v1199_v14, %v1162_v35 }
 0xae6   :  { %v1240_v37 = vmul.f32 0.35355338, %v1200_v36 }
 0xae8   :  { %v1244_v17 = vsel %vm36_vm3, %v1240_v37, -1e+30 }
 0xae9   :  { %v1250_v38 = vsel %vm172_vm1, %v1244_v17, -inf }
 0xaea   :  { %1251 = vmax.xlane.f32.xlu0 %v1250_v38 }
 0xaed   :  { %v1233_v40 = vpop.f32.mrf.mxu0 }
 0xaee   :  { %v1234_v29 = vadd.f32 %v1233_v40, %v1163_v2 }
 0xaf0   :  { %v1241_v41 = vmul.f32 0.35355338, %v1234_v29 }
 0xaf2   :  { %v1245_v0 = vsel %vm37_vm4, %v1241_v41, -1e+30 }
 0xaf3   :  { %v1253_v5 = vsel %vm172_vm1, %v1245_v0, -inf }
 0xaf4   :  { %1254 = vmax.xlane.f32.xlu2 %v1253_v5 }
 0xaf5   :  { %v1236_v43 = vpop.f32.mrf.mxu0 }
 0xaf6   :  { %v1237_v26 = vadd.f32 %v1236_v43, %v1164_v62 }
 0xaf8   :  { %v1242_v8 = vmul.f32 0.35355338, %v1237_v26 }
 0xafa   :  { %v1246_v44 = vsel %vm38_vm5, %v1242_v8, -1e+30 }
 0xafb   :  { %v1256_v13 = vsel %vm172_vm1, %v1246_v44, -inf }
 0xafc   :  { %1257 = vmax.xlane.f32.xlu0 %v1256_v13 }
 0xb55   :  { %v1249_v20 = vpop.xlane.xlu2 %1248 }
 0xb56   :  { %v1259_v45 = vsub.f32 %v1243_v21, %v1249_v20 }
 0xb58   :  { %v1263_v31 = vmul.f32 1.442695, %v1259_v45 }
 0xb5a   :  { %2732 = vpow2.f32 %v1263_v31 }
 0xb5d   :  { %v1252_v16 = vpop.xlane.xlu0 %1251 }
 0xb5e   :  { %v1260_v12 = vsub.f32 %v1244_v17, %v1252_v16 }
 0xb60   :  { %v2733_v18 = vpop.eup %2732  ;;  %v1265_v46 = vmul.f32 1.442695, %v1260_v12 }
 0xb61   :  { %v1271_v47 = vsel %vm35_vm2, %v2733_v18, 0.0 }
 0xb62   :  { %2734 = vpow2.f32 %v1265_v46  ;;  %v1275_v48 = vsel %vm172_vm1, %v1271_v47, 0.0 }
 0xb63   :  { %1276 = vadd.xlane.f32.xlu2 %v1275_v48 }
 0xb67   :  { %v1255_v49 = vpop.xlane.xlu2 %1254 }
 0xb68   :  { %v2735_v50 = vpop.eup %2734  ;;  %v1261_v52 = vsub.f32 %v1245_v0, %v1255_v49 }
 0xb69   :  { %v3310_v54 = vsel %vm36_vm3, %v2735_v50, 0.0 }
 0xb6a   :  { %v1267_v1 = vmul.f32 1.442695, %v1261_v52  ;;  %v1278_v58 = vsel %vm172_vm1, %v3310_v54, 0.0 }
 0xb6b   :  { %1279 = vadd.xlane.f32.xlu1 %v1278_v58 }
 0xb6c   :  { %2736 = vpow2.f32 %v1267_v1 }
 0xb6f   :  { %v1258_v59 = vpop.xlane.xlu0 %1257 }
 0xb70   :  { %v1262_v60 = vsub.f32 %v1246_v44, %v1258_v59 }
 0xb72   :  { %v2737_v6 = vpop.eup %2736  ;;  %v1269_v61 = vmul.f32 1.442695, %v1262_v60 }
 0xb73   :  { %v3316_v3 = vsel %vm37_vm4, %v2737_v6, 0.0 }
 0xb74   :  { %2738 = vpow2.f32 %v1269_v61  ;;  %v1281_v4 = vsel %vm172_vm1, %v3316_v3, 0.0 }
 0xb75   :  { %1282 = vadd.xlane.f32.xlu0 %v1281_v4 }
 0xb7a   :  { %v2739_v7 = vpop.eup %2738 }
 0xb7b   :  { %v3322_v19 = vsel %vm38_vm5, %v2739_v7, 0.0 }
 0xb7c   :  { %v1284_v9 = vsel %vm172_vm1, %v3322_v19, 0.0 }
 0xb7d   :  { %1285 = vadd.xlane.f32.xlu2 %v1284_v9 }
 0xb84   :  { %2642 = vrot.lane.b32.xlu1 %v2641_v10, %s2782_s21 }
 0xb89   :  { %2647 = vrot.lane.b32.xlu0 %v2646_v15, %s2782_s21 }
 0xb8c   :  { %1443 = vrot.lane.b32.xlu1 %v3248_v11, %s2783_s24 }
 0xb95   :  { %1441 = vrot.lane.b32.xlu2 %v3244_v53, %s2783_s24 }
 0xbd6   :  { %v1277_v22 = vpop.xlane.xlu2 %1276 }
 0xbd7   :  { %v1287_v24 = vadd.f32 1e-16, %v1277_v22 }
 0xbd9   :  { %2740 = vrcp.f32 %v1287_v24  ;;  %v1302_v21 = vand.u32 2147483648, %v1287_v24  ;;  %v1300_v35 = vand.u32 2147483647, %v1287_v24  ;;  %vm1296_vm15 = vweird.f32 %v1287_v24 }
 0xbdb   :  { %v1303_v11 = vor.u32 1.1754944e-38, %v1302_v21  ;;  %vm1301_vm7 = vcmp.eq.f32.partialorder %v1300_v35, 8.507059e+37 }
 0xbde   :  { %v1280_v25 = vpop.xlane.xlu1 %1279 }
 0xbdf   :  { %v2741_v27 = vpop.eup %2740  ;;  %v1288_v30 = vadd.f32 1e-16, %v1280_v25 }
 0xbe0   :  { %v1292_v32 = vmul.f32 %v2741_v27, %v1287_v24  ;;  %vm1297_vm14 = vweird.f32 %v2741_v27 }
 0xbe1   :  { %2742 = vrcp.f32 %v1288_v30  ;;  %vm1298_vm6 = vmor %vm1296_vm15, %vm1297_vm14  ;;  %v1317_v29 = vand.u32 2147483648, %v1288_v30  ;;  %v1315_v0 = vand.u32 2147483647, %v1288_v30  ;;  %vm1311_vm9 = vweird.f32 %v1288_v30 }
 0xbe2   :  { %v1293_v34 = vsub.f32 1.0, %v1292_v32 }
 0xbe3   :  { %v1318_v43 = vor.u32 1.1754944e-38, %v1317_v29  ;;  %vm1316_vm11 = vcmp.eq.f32.partialorder %v1315_v0, 8.507059e+37 }
 0xbe4   :  { %v1294_v23 = vmul.f32 %v2741_v27, %v1293_v34 }
 0xbe6   :  { %v1295_v14 = vadd.f32 %v2741_v27, %v1294_v23 }
 0xbe7   :  { %v2743_v36 = vpop.eup %2742 }
 0xbe8   :  { %v1307_v37 = vmul.f32 %v2743_v36, %v1288_v30  ;;  %v1283_v53 = vpop.xlane.xlu0 %1282  ;;  %v1299_v17 = vsel %vm1298_vm6, %v2741_v27, %v1295_v14  ;;  %vm1312_vm8 = vweird.f32 %v2743_v36  ;;  %v1457_v14 = vld [vmem:[%s3745_s1 + $0x38] sm:$0xff] }
 0xbe9   :  { %v1289_v28 = vadd.f32 1e-16, %v1283_v53  ;;  %v1304_v38 = vsel %vm1301_vm7, %v1303_v11, %v1299_v17  ;;  %vm1313_vm10 = vmor %vm1311_vm9, %vm1312_vm8  ;;  %1487 = vmatpush.msrb.mxu0 %v1457_v14 }
 0xbea   :  { %v1308_v2 = vsub.f32 1.0, %v1307_v37  ;;  %v1305_v40 = vmul.f32 %v1304_v38, %v1271_v47 }
 0xbeb   :  { %2744 = vrcp.f32 %v1289_v28  ;;  %v1332_v18 = vand.u32 2147483648, %v1289_v28  ;;  %v1330_v49 = vand.u32 2147483647, %v1289_v28  ;;  %vm1326_vm13 = vweird.f32 %v1289_v28 }
 0xbec   :  { %v1351_v41 = vmul.f32 %v1305_v40, %v2892_v33  ;;  %v1309_v42 = vmul.f32 %v2743_v36, %v1308_v2 }
 0xbed   :  { %vm1331_vm15 = vcmp.eq.f32.partialorder %v1330_v49, 8.507059e+37  ;;  %v3386_v49 = vld [vmem:[%s3745_s1 + $0x5c] ss:$0 sm:$0xff] }
 0xbee   :  { %v1355_v5 = vsel %vm172_vm1, %v1351_v41, 0.0  ;;  %v1310_v62 = vadd.f32 %v2743_v36, %v1309_v42 }
 0xbef   :  { %1356 = vadd.xlane.f32.xlu2 %v1355_v5 }
 0xbf0   :  { %v1286_v26 = vpop.xlane.xlu2 %1285  ;;  %v1314_v8 = vsel %vm1313_vm10, %v2743_v36, %v1310_v62 }
 0xbf1   :  { %v2745_v44 = vpop.eup %2744  ;;  %v1290_v13 = vadd.f32 1e-16, %v1286_v26  ;;  %v1319_v20 = vsel %vm1316_vm11, %v1318_v43, %v1314_v8 }
 0xbf2   :  { %v1322_v45 = vmul.f32 %v2745_v44, %v1289_v28  ;;  %v1320_v31 = vmul.f32 %v1319_v20, %v3310_v54  ;;  %vm1327_vm12 = vweird.f32 %v2745_v44  ;;  %v1333_v54 = vor.u32 1.1754944e-38, %v1332_v18 }
 0xbf3   :  { %2746 = vrcp.f32 %v1290_v13  ;;  %vm1328_vm14 = vmor %vm1326_vm13, %vm1327_vm12  ;;  %v1347_v10 = vand.u32 2147483648, %v1290_v13  ;;  %v1345_v25 = vand.u32 2147483647, %v1290_v13  ;;  %vm1341_vm7 = vweird.f32 %v1290_v13 }
 0xbf4   :  { %v1323_v16 = vsub.f32 1.0, %v1322_v45  ;;  %v1352_v12 = vmul.f32 %v1320_v31, %v2896_v39  ;;  %v2680_v45 = vld [vmem:[%s3745_s1 + $0x40] ss:$0 sm:$0xff] }
 0xbf5   :  { %v1348_v34 = vor.u32 1.1754944e-38, %v1347_v10  ;;  %vm1346_vm9 = vcmp.eq.f32.partialorder %v1345_v25, 8.507059e+37 }
 0xbf6   :  { %v2643_v46 = vpop.permute.xlu1 %2642  ;;  %v1358_v47 = vsel %vm172_vm1, %v1352_v12, 0.0  ;;  %v1324_v48 = vmul.f32 %v2745_v44, %v1323_v16 }
 0xbf7   :  { %v2644_v50 = vunpack.i.l.bf16 %v2643_v46  ;;  %1359 = vadd.xlane.f32.xlu0 %v1358_v47  ;;  %v2645_v58 = vunpack.i.h.bf16 %v2643_v46 }
 0xbf8   :  { %v1325_v52 = vadd.f32 %v2745_v44, %v1324_v48  ;;  %v1442_v36 = vpop.permute.xlu2 %1441 }
 0xbf9   :  { %v2747_v1 = vpop.eup %2746  ;;  %1397 = vmatpush.msrb.mxu1 %v2644_v50 }
 0xbfa   :  { %v1337_v59 = vmul.f32 %v2747_v1, %v1290_v13  ;;  %v1329_v60 = vsel %vm1328_vm14, %v2745_v44, %v1325_v52  ;;  %vm1342_vm6 = vweird.f32 %v2747_v1 }
 0xbfb   :  { %1398 = vmatpush.msrb.mxu1 %v2645_v58  ;;  %v2648_v6 = vpop.permute.xlu0 %2647  ;;  %v1334_v61 = vsel %vm1331_vm15, %v1333_v54, %v1329_v60  ;;  %vm1343_vm8 = vmor %vm1341_vm7, %vm1342_vm6 }
 0xbfc   :  { %v1338_v4 = vsub.f32 1.0, %v1337_v59  ;;  %v2649_v7 = vunpack.i.l.bf16 %v2648_v6  ;;  %2551 = vmatmul.msk.f32.vlgmr.msrb.gmra.mxu1 %vm172_vm1, %v1305_v40  ;;  %v1335_v9 = vmul.f32 %v1334_v61, %v3316_v3  ;;  %v2650_v15 = vunpack.i.h.bf16 %v2648_v6 }
 0xbfe   :  { %1432 = vmatpush.msrb.mxu3 %v2649_v7  ;;  %v1353_v22 = vmul.f32 %v1335_v9, %v2908_v51  ;;  %v1339_v24 = vmul.f32 %v2747_v1, %v1338_v4  ;;  %v1444_v53 = vpop.permute.xlu1 %1443 }
 0xc00   :  { %1433 = vmatpush.msrb.mxu3 %v2650_v15  ;;  %v1361_v27 = vsel %vm172_vm1, %v1353_v22, 0.0  ;;  %v1340_v30 = vadd.f32 %v2747_v1, %v1339_v24 }
 0xc01   :  { %1362 = vadd.xlane.f32.xlu1 %v1361_v27  ;;  %2553 = vmatmul.msk.f32.vlgmr.msrb.gmra.mxu3 %vm172_vm1, %v1335_v9 }
 0xc02   :  { %v1344_v32 = vsel %vm1343_vm8, %v2747_v1, %v1340_v30 }
 0xc03   :  { %v1349_v3 = vsel %vm1346_vm9, %v1348_v34, %v1344_v32 }
 0xc04   :  { %2552 = vmatmul.msk.f32.gmra.mxu1 %vm172_vm1, %v1320_v31  ;;  %v1350_v21 = vmul.f32 %v1349_v3, %v3322_v19 }
 0xc06   :  { %v1354_v23 = vmul.f32 %v1350_v21, %v2912_v57 }
 0xc07   :  { %1445 = vrot.lane.b32.xlu2 %v3252_v55, %s2783_s24 }
 0xc08   :  { %v1364_v35 = vsel %vm172_vm1, %v1354_v23, 0.0 }
 0xc09   :  { %2554 = vmatmul.msk.f32.gmra.mxu3 %vm172_vm1, %v1350_v21 }
 0xc0b   :  { %1447 = vrot.lane.b32.xlu0 %v3264_v63, %s2783_s24 }
 0xc30   :  { %1365 = vadd.xlane.f32.xlu2 %v1364_v35 }
 0xc62   :  { %v1357_v11 = vpop.xlane.xlu2 %1356 }
 0xc63   :  { %v1367_v55 = vmul.f32 %v3259_v56, %v1357_v11 }
 0xc6a   :  { %v1360_v28 = vpop.xlane.xlu0 %1359  ;;  %v1446_v5 = vpop.permute.xlu2 %1445 }
 0xc6b   :  { %v1368_v63 = vmul.f32 %v3259_v56, %v1360_v28 }
 0xc74   :  { %v1363_v40 = vpop.xlane.xlu1 %1362 }
 0xc75   :  { %v1369_v42 = vmul.f32 %v3259_v56, %v1363_v40 }
 0xc79   :  { %v1400_v19 = vpop.f32.mrf.mxu1 }
 0xc7a   :  { %v1401_v37 = vadd.f32 %v1400_v19, %v1367_v55 }
 0xc7c   :  { %v1453_v17 = vadd.f32 %v1442_v36, %v1401_v37 }
 0xc7d   :  { %v1448_v13 = vpop.permute.xlu0 %1447 }
 0xc7e   :  { %2555 = vmatmul.msk.f32.vlgmr.msrb.gmra.mxu0 %vm73_vm0, %v1453_v17 }
 0xc81   :  { %v1403_v38 = vpop.f32.mrf.mxu1 }
 0xc82   :  { %v1404_v2 = vadd.f32 %v1403_v38, %v1368_v63 }
 0xc84   :  { %v1454_v29 = vadd.f32 %v1444_v53, %v1404_v2  ;;  %v1435_v41 = vpop.f32.mrf.mxu3 }
 0xc85   :  { %v1436_v0 = vadd.f32 %v1435_v41, %v1369_v42 }
 0xc86   :  { %2556 = vmatmul.msk.f32.gmra.mxu0 %vm73_vm0, %v1454_v29 }
 0xc87   :  { %v1455_v62 = vadd.f32 %v1446_v5, %v1436_v0 }
 0xc8c   :  { %v1438_v8 = vpop.f32.mrf.mxu3 }
 0xc8e   :  { %2557 = vmatmul.msk.f32.gmra.mxu0 %vm73_vm0, %v1455_v62 }
 0xca3   :  { %v1366_v43 = vpop.xlane.xlu2 %1365 }
 0xca4   :  { %v1370_v26 = vmul.f32 %v3259_v56, %v1366_v43 }
 0xca6   :  { %v1439_v44 = vadd.f32 %v1438_v8, %v1370_v26 }
 0xca8   :  { %v1456_v20 = vadd.f32 %v1448_v13, %v1439_v44 }
 0xcaa   :  { %2558 = vmatmul.msk.f32.gmra.mxu0 %vm73_vm0, %v1456_v20 }
 0xcfb   :  { %v1489_v31 = vpop.f32.mrf.mxu0 }
 0xcfc   :  { %v3369_v16 = vadd.f32 %v2680_v45, %v1489_v31 }
 0xcfe   :  { %1525 = vrot.lane.b32.xlu0 %v3369_v16, %s2781_s0  ;;  %v1503_v1 = vmul.f32 %v3386_v49, %v3369_v16 }
 0xd00   :  { %v1507_v58 = vsel %vm73_vm0, %v1503_v1, 0.0 }
 0xd03   :  { %v1492_v12 = vpop.f32.mrf.mxu0 }
 0xd04   :  { %v3373_v18 = vadd.f32 %v2680_v45, %v1492_v12 }
 0xd06   :  { %1527 = vrot.lane.b32.xlu1 %v3373_v18, %s2781_s0  ;;  %v1504_v50 = vmul.f32 %v3386_v49, %v3373_v18  ;;  %v2651_v42 = vpack.i.bf16 %v3369_v16, %v3373_v18 }
 0xd08   :  { %v1510_v52 = vsel %vm73_vm0, %v1504_v50, 0.0 }
 0xd0b   :  { %v1495_v56 = vpop.f32.mrf.mxu0 }
 0xd0c   :  { %v3377_v46 = vadd.f32 %v2680_v45, %v1495_v56 }
 0xd0e   :  { %1562 = vrot.lane.b32.xlu0 %v3377_v46, %s2781_s0  ;;  %v1505_v60 = vmul.f32 %v3386_v49, %v3377_v46 }
 0xd10   :  { %v1513_v6 = vsel %vm73_vm0, %v1505_v60, 0.0 }
 0xd27   :  { %v1498_v47 = vpop.f32.mrf.mxu0 }
 0xd28   :  { %v3381_v48 = vadd.f32 %v2680_v45, %v1498_v47 }
 0xd2a   :  { %1564 = vrot.lane.b32.xlu2 %v3381_v48, %s2781_s0  ;;  %v1506_v54 = vmul.f32 %v3386_v49, %v3381_v48 }
 0xd2c   :  { %v1516_v59 = vsel %vm73_vm0, %v1506_v54, 0.0 }
 0xd30   :  { %1511 = vadd.xlane.f32.xlu1 %v1510_v52 }
 0xd38   :  { %1508 = vadd.xlane.f32.xlu0 %v1507_v58 }
 0xd40   :  { %1517 = vadd.xlane.f32.xlu0 %v1516_v59 }
 0xd53   :  { %1514 = vadd.xlane.f32.xlu2 %v1513_v6 }
 0xd70   :  { %v1526_v4 = vpop.permute.xlu0 %1525 }
 0xd78   :  { %v1528_v61 = vpop.permute.xlu1 %1527 }
 0xd79   :  { %2559 = vmatpush.xpose.msk.msra.mxu1 %vm73_vm0, %v1528_v61 }
 0xd7d   :  { %2560 = vmatpush.xpose.msk.msra.mxu1 %vm73_vm0, %v1526_v4 }
 0xd80   :  { %2561 = vmatmul.msk.f32.vlgmr.msra.gmra.mxu1 %vm73_vm0, %v3369_v16  ;;  %v1563_v9 = vpop.permute.xlu0 %1562 }
 0xd84   :  { %v1565_v7 = vpop.permute.xlu2 %1564 }
 0xd85   :  { %2563 = vmatpush.xpose.msk.msra.mxu2 %vm73_vm0, %v1565_v7 }
 0xd88   :  { %2562 = vmatmul.msk.f32.gmra.mxu1 %vm73_vm0, %v3373_v18 }
 0xd89   :  { %2564 = vmatpush.xpose.msk.msra.mxu2 %vm73_vm0, %v1563_v9 }
 0xd8c   :  { %2565 = vmatmul.msk.f32.vlgmr.msra.gmra.mxu2 %vm73_vm0, %v3377_v46 }
 0xd94   :  { %2566 = vmatmul.msk.f32.gmra.mxu2 %vm73_vm0, %v3381_v48 }
 0xda3   :  { %v1512_v27 = vpop.xlane.xlu1 %1511 }
 0xda4   :  { %v1520_v34 = vmul.f32 %v1512_v27, %v2896_v39 }
 0xdab   :  { %v1509_v10 = vpop.xlane.xlu0 %1508 }
 0xdac   :  { %v1519_v15 = vmul.f32 %v1509_v10, %v2892_v33 }
 0xdb3   :  { %v1518_v53 = vpop.xlane.xlu0 %1517 }
 0xdb4   :  { %v1522_v63 = vmul.f32 %v1518_v53, %v2912_v57 }
 0xdc6   :  { %v1515_v14 = vpop.xlane.xlu2 %1514 }
 0xdc7   :  { %v1521_v11 = vmul.f32 %v1515_v14, %v2908_v51 }
 0xdfd   :  { %v1554_v22 = vpop.f32.mrf.mxu1 }
 0xdfe   :  { %v1555_v24 = vadd.f32 %v1554_v22, %v1519_v15  ;;  %v2656_v15 = vpack.i.bf16 %v3377_v46, %v3381_v48 }
 0xe00   :  { %v1597_v25 = vmul.f32 0.35355338, %v1555_v24 }
 0xe02   :  { %v1601_v30 = vsel %vm35_vm2, %v1597_v25, -1e+30 }
 0xe03   :  { %v1605_v32 = vsel %vm172_vm1, %v1601_v30, -inf }
 0xe04   :  { %1606 = vmax.xlane.f32.xlu1 %v1605_v32 }
 0xe05   :  { %v1557_v3 = vpop.f32.mrf.mxu1 }
 0xe06   :  { %v1558_v21 = vadd.f32 %v1557_v3, %v1520_v34 }
 0xe08   :  { %v1598_v23 = vmul.f32 0.35355338, %v1558_v21 }
 0xe0a   :  { %v1602_v35 = vsel %vm36_vm3, %v1598_v23, -1e+30 }
 0xe0b   :  { %v1608_v36 = vsel %vm172_vm1, %v1602_v35, -inf }
 0xe0c   :  { %1609 = vmax.xlane.f32.xlu0 %v1608_v36 }
 0xe0f   :  { %v1591_v55 = vpop.f32.mrf.mxu2 }
 0xe10   :  { %v1592_v19 = vadd.f32 %v1591_v55, %v1521_v11 }
 0xe12   :  { %v1599_v37 = vmul.f32 0.35355338, %v1592_v19 }
 0xe14   :  { %v1603_v17 = vsel %vm37_vm4, %v1599_v37, -1e+30 }
 0xe15   :  { %v1611_v28 = vsel %vm172_vm1, %v1603_v17, -inf }
 0xe16   :  { %1612 = vmax.xlane.f32.xlu1 %v1611_v28 }
 0xe17   :  { %v1594_v38 = vpop.f32.mrf.mxu2 }
 0xe18   :  { %v1595_v2 = vadd.f32 %v1594_v38, %v1522_v63 }
 0xe1a   :  { %v1600_v40 = vmul.f32 0.35355338, %v1595_v2 }
 0xe1c   :  { %v1604_v29 = vsel %vm38_vm5, %v1600_v40, -1e+30 }
 0xe1d   :  { %v1614_v41 = vsel %vm172_vm1, %v1604_v29, -inf }
 0xe1e   :  { %1615 = vmax.xlane.f32.xlu2 %v1614_v41 }
 0xe36   :  { %2652 = vrot.lane.b32.xlu2 %v2651_v42, %s2782_s21 }
 0xe77   :  { %v1607_v0 = vpop.xlane.xlu1 %1606 }
 0xe78   :  { %v1617_v5 = vsub.f32 %v1601_v30, %v1607_v0 }
 0xe7a   :  { %v1621_v62 = vmul.f32 1.442695, %v1617_v5 }
 0xe7c   :  { %2748 = vpow2.f32 %v1621_v62 }
 0xe7f   :  { %v1610_v43 = vpop.xlane.xlu0 %1609 }
 0xe80   :  { %v1618_v26 = vsub.f32 %v1602_v35, %v1610_v43 }
 0xe82   :  { %v2749_v8 = vpop.eup %2748  ;;  %v1623_v44 = vmul.f32 1.442695, %v1618_v26 }
 0xe83   :  { %v1629_v13 = vsel %vm35_vm2, %v2749_v8, 0.0 }
 0xe84   :  { %2750 = vpow2.f32 %v1623_v44  ;;  %v1633_v20 = vsel %vm172_vm1, %v1629_v13, 0.0 }
 0xe85   :  { %1634 = vadd.xlane.f32.xlu0 %v1633_v20 }
 0xe89   :  { %v1613_v45 = vpop.xlane.xlu1 %1612 }
 0xe8a   :  { %v2751_v31 = vpop.eup %2750  ;;  %v1619_v12 = vsub.f32 %v1603_v17, %v1613_v45 }
 0xe8b   :  { %v3438_v56 = vsel %vm36_vm3, %v2751_v31, 0.0 }
 0xe8c   :  { %v1625_v47 = vmul.f32 1.442695, %v1619_v12  ;;  %v1636_v50 = vsel %vm172_vm1, %v3438_v56, 0.0 }
 0xe8d   :  { %1637 = vadd.xlane.f32.xlu1 %v1636_v50 }
 0xe8e   :  { %2752 = vpow2.f32 %v1625_v47 }
 0xe91   :  { %v1616_v52 = vpop.xlane.xlu2 %1615 }
 0xe92   :  { %v1620_v1 = vsub.f32 %v1604_v29, %v1616_v52 }
 0xe94   :  { %v2753_v58 = vpop.eup %2752  ;;  %v1627_v54 = vmul.f32 1.442695, %v1620_v1 }
 0xe95   :  { %v3444_v59 = vsel %vm37_vm4, %v2753_v58, 0.0 }
 0xe96   :  { %2754 = vpow2.f32 %v1627_v54  ;;  %v1639_v60 = vsel %vm172_vm1, %v3444_v59, 0.0 }
 0xe97   :  { %1640 = vadd.xlane.f32.xlu0 %v1639_v60 }
 0xe99   :  { %v2653_v6 = vpop.permute.xlu2 %2652 }
 0xe9a   :  { %v2654_v61 = vunpack.i.l.bf16 %v2653_v6  ;;  %v2655_v7 = vunpack.i.h.bf16 %v2653_v6 }
 0xe9c   :  { %v2755_v4 = vpop.eup %2754  ;;  %1755 = vmatpush.msra.mxu3 %v2654_v61 }
 0xe9d   :  { %v3450_v9 = vsel %vm38_vm5, %v2755_v4, 0.0 }
 0xe9e   :  { %1756 = vmatpush.msra.mxu3 %v2655_v7  ;;  %v1642_v10 = vsel %vm172_vm1, %v3450_v9, 0.0 }
 0xe9f   :  { %1643 = vadd.xlane.f32.xlu1 %v1642_v10 }
 0xeab   :  { %2657 = vrot.lane.b32.xlu0 %v2656_v15, %s2782_s21 }
 0xeb3   :  { %1801 = vrot.lane.b32.xlu0 %v3373_v18, %s2783_s24 }
 0xeb8   :  { %1799 = vrot.lane.b32.xlu1 %v3369_v16, %s2783_s24 }
 0xef8   :  { %v1635_v22 = vpop.xlane.xlu0 %1634 }
 0xef9   :  { %v1645_v24 = vadd.f32 1e-16, %v1635_v22 }
 0xefb   :  { %2756 = vrcp.f32 %v1645_v24  ;;  %v1660_v3 = vand.u32 2147483648, %v1645_v24  ;;  %v1658_v23 = vand.u32 2147483647, %v1645_v24  ;;  %vm1654_vm11 = vweird.f32 %v1645_v24 }
 0xefd   :  { %v1661_v18 = vor.u32 1.1754944e-38, %v1660_v3  ;;  %vm1659_vm13 = vcmp.eq.f32.partialorder %v1658_v23, 8.507059e+37  ;;  %v1815_v3 = vld [vmem:[%s3745_s1 + $0x48] sm:$0xff] }
 0xefe   :  { %1845 = vmatpush.msrb.mxu2 %v1815_v3 }
 0xf00   :  { %v1638_v25 = vpop.xlane.xlu1 %1637 }
 0xf01   :  { %v2757_v27 = vpop.eup %2756  ;;  %v1646_v30 = vadd.f32 1e-16, %v1638_v25 }
 0xf02   :  { %v1650_v32 = vmul.f32 %v2757_v27, %v1645_v24  ;;  %vm1655_vm10 = vweird.f32 %v2757_v27 }
 0xf03   :  { %2758 = vrcp.f32 %v1646_v30  ;;  %vm1656_vm12 = vmor %vm1654_vm11, %vm1655_vm10  ;;  %v1675_v17 = vand.u32 2147483648, %v1646_v30  ;;  %v1673_v38 = vand.u32 2147483647, %v1646_v30  ;;  %vm1669_vm15 = vweird.f32 %v1646_v30 }
 0xf04   :  { %v1651_v34 = vsub.f32 1.0, %v1650_v32 }
 0xf05   :  { %v1676_v29 = vor.u32 1.1754944e-38, %v1675_v17  ;;  %vm1674_vm7 = vcmp.eq.f32.partialorder %v1673_v38, 8.507059e+37 }
 0xf06   :  { %v1652_v21 = vmul.f32 %v2757_v27, %v1651_v34 }
 0xf08   :  { %v1653_v35 = vadd.f32 %v2757_v27, %v1652_v21 }
 0xf09   :  { %v2759_v14 = vpop.eup %2758 }
 0xf0a   :  { %v1665_v16 = vmul.f32 %v2759_v14, %v1646_v30  ;;  %v1641_v36 = vpop.xlane.xlu0 %1640  ;;  %v1657_v11 = vsel %vm1656_vm12, %v2757_v27, %v1653_v35  ;;  %vm1670_vm14 = vweird.f32 %v2759_v14 }
 0xf0b   :  { %v1647_v55 = vadd.f32 1e-16, %v1641_v36  ;;  %v1662_v19 = vsel %vm1659_vm13, %v1661_v18, %v1657_v11  ;;  %vm1671_vm6 = vmor %vm1669_vm15, %vm1670_vm14 }
 0xf0c   :  { %v1666_v37 = vsub.f32 1.0, %v1665_v16  ;;  %v1663_v53 = vmul.f32 %v1662_v19, %v1629_v13 }
 0xf0d   :  { %2760 = vrcp.f32 %v1647_v55  ;;  %v1690_v13 = vand.u32 2147483648, %v1647_v55  ;;  %v1688_v31 = vand.u32 2147483647, %v1647_v55  ;;  %vm1684_vm9 = vweird.f32 %v1647_v55 }
 0xf0e   :  { %2567 = vmatmul.msk.f32.vlgmr.msra.gmra.mxu3 %vm172_vm1, %v1663_v53  ;;  %v1709_v28 = vmul.f32 %v1663_v53, %v2892_v33  ;;  %v1667_v63 = vmul.f32 %v2759_v14, %v1666_v37 }
 0xf0f   :  { %v1691_v50 = vor.u32 1.1754944e-38, %v1690_v13  ;;  %vm1689_vm11 = vcmp.eq.f32.partialorder %v1688_v31, 8.507059e+37 }
 0xf10   :  { %v1713_v2 = vsel %vm172_vm1, %v1709_v28, 0.0  ;;  %v1668_v40 = vadd.f32 %v2759_v14, %v1667_v63 }
 0xf11   :  { %1714 = vadd.xlane.f32.xlu1 %v1713_v2 }
 0xf12   :  { %v1644_v41 = vpop.xlane.xlu1 %1643  ;;  %v1672_v42 = vsel %vm1671_vm6, %v2759_v14, %v1668_v40 }
 0xf13   :  { %v2761_v0 = vpop.eup %2760  ;;  %v1648_v5 = vadd.f32 1e-16, %v1644_v41  ;;  %v1677_v62 = vsel %vm1674_vm7, %v1676_v29, %v1672_v42 }
 0xf14   :  { %v1680_v43 = vmul.f32 %v2761_v0, %v1647_v55  ;;  %v1678_v26 = vmul.f32 %v1677_v62, %v3438_v56  ;;  %vm1685_vm8 = vweird.f32 %v2761_v0 }
 0xf15   :  { %2762 = vrcp.f32 %v1648_v5  ;;  %vm1686_vm10 = vmor %vm1684_vm9, %vm1685_vm8  ;;  %v1705_v61 = vand.u32 2147483648, %v1648_v5  ;;  %v1703_v15 = vand.u32 2147483647, %v1648_v5  ;;  %vm1699_vm13 = vweird.f32 %v1648_v5 }
 0xf16   :  { %v1681_v8 = vsub.f32 1.0, %v1680_v43  ;;  %2568 = vmatmul.msk.f32.gmra.mxu3 %vm172_vm1, %v1678_v26  ;;  %v1710_v44 = vmul.f32 %v1678_v26, %v2896_v39 }
 0xf17   :  { %v1706_v27 = vor.u32 1.1754944e-38, %v1705_v61  ;;  %vm1704_vm15 = vcmp.eq.f32.partialorder %v1703_v15, 8.507059e+37 }
 0xf18   :  { %v1716_v20 = vsel %vm172_vm1, %v1710_v44, 0.0  ;;  %v1682_v45 = vmul.f32 %v2761_v0, %v1681_v8  ;;  %v3507_v44 = vld [vmem:[%s3745_s1 + $0x5d] ss:$0 sm:$0xff] }
 0xf19   :  { %1717 = vadd.xlane.f32.xlu2 %v1716_v20 }
 0xf1a   :  { %v1683_v12 = vadd.f32 %v2761_v0, %v1682_v45 }
 0xf1b   :  { %v2763_v47 = vpop.eup %2762 }
 0xf1c   :  { %v1695_v52 = vmul.f32 %v2763_v47, %v1648_v5  ;;  %v1687_v56 = vsel %vm1686_vm10, %v2761_v0, %v1683_v12  ;;  %vm1700_vm12 = vweird.f32 %v2763_v47  ;;  %v2682_v5 = vld [vmem:[%s3745_s1 + $0x50] ss:$0 sm:$0xff]  ;;  %s2786_s1 = smov 8  }
 0xf1d   :  { %v2658_v1 = vpop.permute.xlu0 %2657  ;;  %v1692_v58 = vsel %vm1689_vm11, %v1691_v50, %v1687_v56  ;;  %vm1701_vm14 = vmor %vm1699_vm13, %vm1700_vm12 }
 0xf1e   :  { %v1696_v54 = vsub.f32 1.0, %v1695_v52  ;;  %v2659_v60 = vunpack.i.l.bf16 %v2658_v1  ;;  %v1693_v6 = vmul.f32 %v1692_v58, %v3444_v59  ;;  %v2660_v4 = vunpack.i.h.bf16 %v2658_v1 }
 0xf20   :  { %1790 = vmatpush.msrb.mxu1 %v2659_v60  ;;  %v1711_v7 = vmul.f32 %v1693_v6, %v2908_v51  ;;  %v1697_v10 = vmul.f32 %v2763_v47, %v1696_v54 }
 0xf22   :  { %1791 = vmatpush.msrb.mxu1 %v2660_v4  ;;  %v1719_v22 = vsel %vm172_vm1, %v1711_v7, 0.0  ;;  %v1698_v24 = vadd.f32 %v2763_v47, %v1697_v10 }
 0xf23   :  { %1720 = vadd.xlane.f32.xlu0 %v1719_v22  ;;  %2569 = vmatmul.msk.f32.vlgmr.msrb.gmra.mxu1 %vm172_vm1, %v1693_v6 }
 0xf24   :  { %v1702_v25 = vsel %vm1701_vm14, %v2763_v47, %v1698_v24 }
 0xf25   :  { %v1707_v59 = vsel %vm1704_vm15, %v1706_v27, %v1702_v25  ;;  %v1802_v14 = vpop.permute.xlu0 %1801 }
 0xf26   :  { %v1708_v30 = vmul.f32 %v1707_v59, %v3450_v9 }
 0xf28   :  { %v1712_v32 = vmul.f32 %v1708_v30, %v2912_v57 }
 0xf2a   :  { %1803 = vrot.lane.b32.xlu1 %v3377_v46, %s2783_s24  ;;  %v1722_v34 = vsel %vm172_vm1, %v1712_v32, 0.0  ;;  %v1800_v21 = vpop.permute.xlu1 %1799 }
 0xf2b   :  { %2570 = vmatmul.msk.f32.gmra.mxu1 %vm172_vm1, %v1708_v30 }
 0xf31   :  { %1805 = vrot.lane.b32.xlu2 %v3381_v48, %s2783_s24 }
 0xf54   :  { %1723 = vadd.xlane.f32.xlu1 %v1722_v34 }
 0xf84   :  { %v1715_v9 = vpop.xlane.xlu1 %1714 }
 0xf85   :  { %v1725_v23 = vmul.f32 %v3386_v49, %v1715_v9 }
 0xf8c   :  { %v1718_v16 = vpop.xlane.xlu2 %1717 }
 0xf8d   :  { %v1726_v48 = vmul.f32 %v3386_v49, %v1718_v16 }
 0xf91   :  { %v1758_v46 = vpop.f32.mrf.mxu3 }
 0xf92   :  { %v1759_v35 = vadd.f32 %v1758_v46, %v1725_v23 }
 0xf94   :  { %v1811_v18 = vadd.f32 %v1800_v21, %v1759_v35  ;;  %v1806_v41 = vpop.permute.xlu2 %1805 }
 0xf96   :  { %2571 = vmatmul.msk.f32.vlgmr.msrb.gmra.mxu2 %vm73_vm0, %v1811_v18  ;;  %v1721_v55 = vpop.xlane.xlu0 %1720 }
 0xf97   :  { %v1727_v37 = vmul.f32 %v3386_v49, %v1721_v55 }
 0xf99   :  { %v1761_v36 = vpop.f32.mrf.mxu3 }
 0xf9a   :  { %v1762_v11 = vadd.f32 %v1761_v36, %v1726_v48 }
 0xf9c   :  { %v1812_v19 = vadd.f32 %v1802_v14, %v1762_v11  ;;  %v1804_v28 = vpop.permute.xlu1 %1803 }
 0xf9e   :  { %2572 = vmatmul.msk.f32.gmra.mxu2 %vm73_vm0, %v1812_v19 }
 0xfa0   :  { %v1793_v53 = vpop.f32.mrf.mxu1 }
 0xfa1   :  { %v1794_v17 = vadd.f32 %v1793_v53, %v1727_v37 }
 0xfa3   :  { %v1813_v63 = vadd.f32 %v1804_v28, %v1794_v17 }
 0xfa6   :  { %2573 = vmatmul.msk.f32.gmra.mxu2 %vm73_vm0, %v1813_v63 }
 0xfa8   :  { %v1796_v40 = vpop.f32.mrf.mxu1 }
 0xfc7   :  { %v1724_v38 = vpop.xlane.xlu1 %1723 }
 0xfc8   :  { %v1728_v2 = vmul.f32 %v3386_v49, %v1724_v38 }
 0xfca   :  { %v1797_v29 = vadd.f32 %v1796_v40, %v1728_v2 }
 0xfcc   :  { %v1814_v42 = vadd.f32 %v1806_v41, %v1797_v29 }
 0xfce   :  { %2574 = vmatmul.msk.f32.gmra.mxu2 %vm73_vm0, %v1814_v42 }
0x1019   :  { %v1847_v0 = vpop.f32.mrf.mxu2 }
0x101a   :  { %v3502_v49 = vadd.f32 %v2682_v5, %v1847_v0 }
0x101c   :  { %v1861_v13 = vmul.f32 %v3507_v44, %v3502_v49 }
0x101e   :  { %v1865_v20 = vsel %vm73_vm0, %v1861_v13, 0.0 }
0x1021   :  { %v1850_v62 = vpop.f32.mrf.mxu2 }
0x1022   :  { %v3494_v43 = vadd.f32 %v2682_v5, %v1850_v62 }
0x1024   :  { %1885 = vrot.lane.b32.xlu0 %v3494_v43, %s2781_s0  ;;  %v1862_v56 = vmul.f32 %v3507_v44, %v3494_v43 }
0x1026   :  { %v1868_v1 = vsel %vm73_vm0, %v1862_v56, 0.0 }
0x1029   :  { %v1853_v26 = vpop.f32.mrf.mxu2 }
0x102a   :  { %v3498_v8 = vadd.f32 %v2682_v5, %v1853_v26 }
0x102c   :  { %1920 = vrot.lane.b32.xlu1 %v3498_v8, %s2781_s0  ;;  %v1863_v50 = vmul.f32 %v3507_v44, %v3498_v8 }
0x102e   :  { %v1871_v52 = vsel %vm73_vm0, %v1863_v50, 0.0 }
0x104e   :  { %1866 = vadd.xlane.f32.xlu0 %v1865_v20 }
0x1051   :  { %v1856_v45 = vpop.f32.mrf.mxu2 }
0x1052   :  { %v3512_v31 = vadd.f32 %v2682_v5, %v1856_v45 }
0x1054   :  { %1922 = vrot.lane.b32.xlu2 %v3512_v31, %s2781_s0  ;;  %v1864_v12 = vmul.f32 %v3507_v44, %v3512_v31 }
0x1056   :  { %v1874_v47 = vsel %vm73_vm0, %v1864_v12, 0.0 }
0x1057   :  { %1875 = vadd.xlane.f32.xlu1 %v1874_v47 }
0x105c   :  { %1883 = vrot.lane.b32.xlu2 %v3502_v49, %s2781_s0 }
0x1085   :  { %1872 = vadd.xlane.f32.xlu2 %v1871_v52 }
0x108d   :  { %1869 = vadd.xlane.f32.xlu2 %v1868_v1 }
0x1096   :  { %v1886_v58 = vpop.permute.xlu0 %1885 }
0x1097   :  { %2575 = vmatpush.xpose.msk.msrb.mxu3 %vm73_vm0, %v1886_v58 }
0x109e   :  { %v1921_v60 = vpop.permute.xlu1 %1920 }
0x10ae   :  { %v1923_v54 = vpop.permute.xlu2 %1922 }
0x10af   :  { %2579 = vmatpush.xpose.msk.msra.mxu0 %vm73_vm0, %v1923_v54  ;;  %v2666_v54 = vpack.i.bf16 %v3502_v49, %v3494_v43 }
0x10b3   :  { %2580 = vmatpush.xpose.msk.msra.mxu0 %vm73_vm0, %v1921_v60  ;;  %v2661_v60 = vpack.i.bf16 %v3498_v8, %v3512_v31 }
0x10b6   :  { %2581 = vmatmul.msk.f32.vlgmr.msra.gmra.mxu0 %vm73_vm0, %v3498_v8  ;;  %v1884_v6 = vpop.permute.xlu2 %1883 }
0x10b7   :  { %2576 = vmatpush.xpose.msk.msrb.mxu3 %vm73_vm0, %v1884_v6 }
0x10ba   :  { %2577 = vmatmul.msk.f32.vlgmr.msrb.gmra.mxu3 %vm73_vm0, %v3502_v49 }
0x10be   :  { %2582 = vmatmul.msk.f32.gmra.mxu0 %vm73_vm0, %v3512_v31 }
0x10c1   :  { %v1867_v25 = vpop.xlane.xlu0 %1866 }
0x10c2   :  { %2578 = vmatmul.msk.f32.gmra.mxu3 %vm73_vm0, %v3494_v43  ;;  %v1877_v32 = vmul.f32 %v1867_v25, %v2892_v33 }
0x10ca   :  { %v1876_v22 = vpop.xlane.xlu1 %1875 }
0x10cb   :  { %v1880_v59 = vmul.f32 %v1876_v22, %v2912_v57 }
0x10f8   :  { %v1873_v61 = vpop.xlane.xlu2 %1872 }
0x10f9   :  { %v1879_v4 = vmul.f32 %v1873_v61, %v2908_v51 }
0x1100   :  { %v1870_v35 = vpop.xlane.xlu2 %1869 }
0x1101   :  { %v1878_v48 = vmul.f32 %v1870_v35, %v2896_v39 }
0x1133   :  { %v1949_v7 = vpop.f32.mrf.mxu0 }
0x1134   :  { %v1950_v10 = vadd.f32 %v1949_v7, %v1879_v4 }
0x1136   :  { %v1957_v15 = vmul.f32 0.35355338, %v1950_v10 }
0x1138   :  { %v1961_v24 = vsel %vm37_vm4, %v1957_v15, -1e+30 }
0x1139   :  { %v1969_v27 = vsel %vm172_vm1, %v1961_v24, -inf }
0x113a   :  { %1970 = vmax.xlane.f32.xlu0 %v1969_v27 }
0x113b   :  { %v1952_v30 = vpop.f32.mrf.mxu0 }
0x113c   :  { %v1953_v34 = vadd.f32 %v1952_v30, %v1880_v59 }
0x113d   :  { %v1912_v3 = vpop.f32.mrf.mxu3 }
0x113e   :  { %v1958_v21 = vmul.f32 0.35355338, %v1953_v34  ;;  %v1913_v9 = vadd.f32 %v1912_v3, %v1877_v32 }
0x1140   :  { %v1955_v23 = vmul.f32 0.35355338, %v1913_v9  ;;  %v1962_v46 = vsel %vm38_vm5, %v1958_v21, -1e+30 }
0x1141   :  { %v1972_v14 = vsel %vm172_vm1, %v1962_v46, -inf }
0x1142   :  { %1973 = vmax.xlane.f32.xlu0 %v1972_v14  ;;  %v1959_v18 = vsel %vm35_vm2, %v1955_v23, -1e+30 }
0x1143   :  { %v1963_v16 = vsel %vm172_vm1, %v1959_v18, -inf }
0x1144   :  { %1964 = vmax.xlane.f32.xlu2 %v1963_v16 }
0x1145   :  { %v1915_v36 = vpop.f32.mrf.mxu3 }
0x1146   :  { %v1916_v11 = vadd.f32 %v1915_v36, %v1878_v48 }
0x1148   :  { %v1956_v55 = vmul.f32 0.35355338, %v1916_v11 }
0x114a   :  { %v1960_v19 = vsel %vm36_vm3, %v1956_v55, -1e+30 }
0x114b   :  { %v1966_v37 = vsel %vm172_vm1, %v1960_v19, -inf }
0x114c   :  { %1967 = vmax.xlane.f32.xlu2 %v1966_v37 }
0x11ad   :  { %v1971_v53 = vpop.xlane.xlu0 %1970 }
0x11ae   :  { %v1977_v42 = vsub.f32 %v1961_v24, %v1971_v53 }
0x11b0   :  { %v1983_v45 = vmul.f32 1.442695, %v1977_v42 }
0x11b5   :  { %v1974_v17 = vpop.xlane.xlu0 %1973 }
0x11b6   :  { %v1978_v28 = vsub.f32 %v1962_v46, %v1974_v17 }
0x11b7   :  { %v1965_v63 = vpop.xlane.xlu2 %1964 }
0x11b8   :  { %v1985_v38 = vmul.f32 1.442695, %v1978_v28  ;;  %v1975_v2 = vsub.f32 %v1959_v18, %v1965_v63 }
0x11ba   :  { %2764 = vpow2.f32 %v1985_v38  ;;  %v1979_v40 = vmul.f32 1.442695, %v1975_v2 }
0x11bc   :  { %2766 = vpow2.f32 %v1979_v40 }
0x11bf   :  { %v1968_v29 = vpop.xlane.xlu2 %1967 }
0x11c0   :  { %v2765_v41 = vpop.eup %2764  ;;  %v1976_v0 = vsub.f32 %v1960_v19, %v1968_v29 }
0x11c1   :  { %v3557_v5 = vsel %vm38_vm5, %v2765_v41, 0.0 }
0x11c2   :  { %v2767_v62 = vpop.eup %2766  ;;  %v1981_v26 = vmul.f32 1.442695, %v1976_v0  ;;  %v2000_v13 = vsel %vm172_vm1, %v3557_v5, 0.0 }
0x11c3   :  { %2001 = vadd.xlane.f32.xlu2 %v2000_v13  ;;  %v3563_v20 = vsel %vm35_vm2, %v2767_v62, 0.0 }
0x11c4   :  { %2768 = vpow2.f32 %v1981_v26  ;;  %v1991_v12 = vsel %vm172_vm1, %v3563_v20, 0.0 }
0x11c5   :  { %1992 = vadd.xlane.f32.xlu1 %v1991_v12  ;;  %2770 = vpow2.f32 %v1983_v45 }
0x11ca   :  { %v2769_v47 = vpop.eup %2768 }
0x11cb   :  { %v3569_v50 = vsel %vm36_vm3, %v2769_v47, 0.0  ;;  %v2771_v56 = vpop.eup %2770 }
0x11cc   :  { %v1994_v52 = vsel %vm172_vm1, %v3569_v50, 0.0  ;;  %v3575_v1 = vsel %vm37_vm4, %v2771_v56, 0.0 }
0x11cd   :  { %1995 = vadd.xlane.f32.xlu0 %v1994_v52  ;;  %v1997_v58 = vsel %vm172_vm1, %v3575_v1, 0.0 }
0x11d5   :  { %1998 = vadd.xlane.f32.xlu0 %v1997_v58 }
0x11db   :  { %2667 = vrot.lane.b32.xlu2 %v2666_v54, %s2782_s21 }
0x11de   :  { %2662 = vrot.lane.b32.xlu1 %v2661_v60, %s2782_s21 }
0x11e6   :  { %2161 = vrot.lane.b32.xlu1 %v3498_v8, %s2783_s24 }
0x11e9   :  { %2157 = vrot.lane.b32.xlu0 %v3502_v49, %s2783_s24 }
0x11f1   :  { %2159 = vrot.lane.b32.xlu0 %v3494_v43, %s2783_s24 }
0x11f9   :  { %2163 = vrot.lane.b32.xlu0 %v3512_v31, %s2783_s24 }
0x1236   :  { %v2002_v6 = vpop.xlane.xlu2 %2001 }
0x1237   :  { %v2006_v61 = vadd.f32 1e-16, %v2002_v6 }
0x1238   :  { %v1993_v4 = vpop.xlane.xlu1 %1992 }
0x1239   :  { %2772 = vrcp.f32 %v2006_v61  ;;  %v2003_v7 = vadd.f32 1e-16, %v1993_v4  ;;  %v2063_v31 = vand.u32 2147483648, %v2006_v61  ;;  %v2061_v34 = vand.u32 2147483647, %v2006_v61 }
0x123a   :  { %vm2057_vm3 = vweird.f32 %v2006_v61 }
0x123b   :  { %2774 = vrcp.f32 %v2003_v7  ;;  %v2018_v21 = vand.u32 2147483648, %v2003_v7  ;;  %v2016_v23 = vand.u32 2147483647, %v2003_v7  ;;  %v2064_v46 = vor.u32 1.1754944e-38, %v2063_v31 }
0x123c   :  { %vm2012_vm6 = vweird.f32 %v2003_v7  ;;  %vm2062_vm7 = vcmp.eq.f32.partialorder %v2061_v34, 8.507059e+37 }
0x123d   :  { %v2019_v11 = vor.u32 1.1754944e-38, %v2018_v21  ;;  %vm2017_vm9 = vcmp.eq.f32.partialorder %v2016_v23, 8.507059e+37 }
0x123e   :  { %v2668_v10 = vpop.permute.xlu2 %2667 }
0x123f   :  { %v2773_v15 = vpop.eup %2772  ;;  %v2669_v22 = vunpack.i.l.bf16 %v2668_v10  ;;  %v2670_v27 = vunpack.i.h.bf16 %v2668_v10 }
0x1240   :  { %v2053_v24 = vmul.f32 %v2773_v15, %v2006_v61  ;;  %v1996_v8 = vpop.xlane.xlu0 %1995  ;;  %vm2058_vm2 = vweird.f32 %v2773_v15 }
0x1241   :  { %v2775_v25 = vpop.eup %2774  ;;  %v2004_v49 = vadd.f32 1e-16, %v1996_v8  ;;  %2113 = vmatpush.msra.mxu1 %v2669_v22  ;;  %vm2059_vm5 = vmor %vm2057_vm3, %vm2058_vm2 }
0x1242   :  { %v2054_v59 = vsub.f32 1.0, %v2053_v24  ;;  %v2008_v43 = vmul.f32 %v2775_v25, %v2003_v7  ;;  %vm2013_vm4 = vweird.f32 %v2775_v25 }
0x1243   :  { %2776 = vrcp.f32 %v2004_v49  ;;  %2114 = vmatpush.msra.mxu1 %v2670_v27  ;;  %vm2014_vm8 = vmor %vm2012_vm6, %vm2013_vm4  ;;  %v2033_v38 = vand.u32 2147483648, %v2004_v49  ;;  %v2031_v29 = vand.u32 2147483647, %v2004_v49  ;;  %vm2027_vm11 = vweird.f32 %v2004_v49 }
0x1244   :  { %v2009_v30 = vsub.f32 1.0, %v2008_v43  ;;  %v2055_v32 = vmul.f32 %v2773_v15, %v2054_v59  ;;  %v2785_v59 = vmov 1934713408   ;;  %vm2174_vm4 = vcmask 1047556  }
0x1245   :  { %v2034_v26 = vor.u32 1.1754944e-38, %v2033_v38  ;;  %vm2032_vm13 = vcmp.eq.f32.partialorder %v2031_v29, 8.507059e+37  ;;  %vm2453_vm6 = vcmask 261120  }
0x1246   :  { %v2010_v3 = vmul.f32 %v2775_v25, %v2009_v30  ;;  %v2056_v9 = vadd.f32 %v2773_v15, %v2055_v32 }
0x1248   :  { %v2011_v35 = vadd.f32 %v2775_v25, %v2010_v3  ;;  %v1999_v14 = vpop.xlane.xlu0 %1998  ;;  %v2060_v18 = vsel %vm2059_vm5, %v2773_v15, %v2056_v9  ;;  %vm2450_vm5 = vcmask 195584  }
0x1249   :  { %v2777_v16 = vpop.eup %2776  ;;  %v2005_v48 = vadd.f32 1e-16, %v1999_v14  ;;  %v2065_v36 = vsel %vm2062_vm7, %v2064_v46, %v2060_v18  ;;  %vm2456_vm7 = vcmask 326656  }
0x124a   :  { %v2023_v55 = vmul.f32 %v2777_v16, %v2004_v49  ;;  %v2015_v19 = vsel %vm2014_vm8, %v2775_v25, %v2011_v35  ;;  %v2066_v37 = vmul.f32 %v2065_v36, %v3557_v5  ;;  %vm2028_vm10 = vweird.f32 %v2777_v16 }
0x124b   :  { %2778 = vrcp.f32 %v2005_v48  ;;  %v2020_v17 = vsel %vm2017_vm9, %v2019_v11, %v2015_v19  ;;  %vm2029_vm12 = vmor %vm2027_vm11, %vm2028_vm10  ;;  %v2046_v58 = vand.u32 2147483647, %v2005_v48  ;;  %vm2042_vm15 = vweird.f32 %v2005_v48 }
0x124c   :  { %v2024_v53 = vsub.f32 1.0, %v2023_v55  ;;  %v2070_v28 = vmul.f32 %v2066_v37, %v2912_v57  ;;  %v2021_v63 = vmul.f32 %v2020_v17, %v3563_v20  ;;  %v2784_v25 = vmov 1983009808  }
0x124d   :  { %vm2047_vm3 = vcmp.eq.f32.partialorder %v2046_v58, 8.507059e+37  ;;  %v2177_v27 = vunpack.c.l.s4 %v2784_v25  ;;  %vm2459_vm8 = vcmask 392192   ;;  %vm2462_vm9 = vcmask 457728  }
0x124e   :  { %v2080_v2 = vsel %vm172_vm1, %v2070_v28, 0.0  ;;  %v2025_v40 = vmul.f32 %v2777_v16, %v2024_v53  ;;  %2583 = vmatmul.msk.f32.vlgmr.msra.gmra.mxu1 %vm172_vm1, %v2021_v63  ;;  %v2067_v41 = vmul.f32 %v2021_v63, %v2892_v33  ;;  %v2048_v33 = vand.u32 2147483648, %v2005_v48 }
0x124f   :  { %2081 = vadd.xlane.f32.xlu1 %v2080_v2  ;;  %v3612_v30 = vunpack.c.0.s8 %v2177_v27  ;;  %vm2465_vm10 = vcmask 523264   ;;  %vm2468_vm11 = vcmask 588800  }
0x1250   :  { %v2663_v42 = vpop.permute.xlu1 %2662  ;;  %v2026_v0 = vadd.f32 %v2777_v16, %v2025_v40  ;;  %v2071_v57 = vsel %vm172_vm1, %v2067_v41, 0.0  ;;  %v2049_v61 = vor.u32 1.1754944e-38, %v2048_v33 }
0x1251   :  { %v2779_v5 = vpop.eup %2778  ;;  %v2664_v62 = vunpack.i.l.bf16 %v2663_v42  ;;  %2072 = vadd.xlane.f32.xlu0 %v2071_v57  ;;  %v2665_v45 = vunpack.i.h.bf16 %v2663_v42 }
0x1252   :  { %v2038_v13 = vmul.f32 %v2779_v5, %v2005_v48  ;;  %v2030_v20 = vsel %vm2029_vm12, %v2777_v16, %v2026_v0  ;;  %vm2043_vm14 = vweird.f32 %v2779_v5  ;;  %vm2471_vm12 = vcmask 654336  }
0x1253   :  { %2148 = vmatpush.msra.mxu3 %v2664_v62  ;;  %v2035_v12 = vsel %vm2032_vm13, %v2034_v26, %v2030_v20  ;;  %vm2044_vm2 = vmor %vm2042_vm15, %vm2043_vm14  ;;  %vm2474_vm13 = vcmask 719872   ;;  %vm2477_vm14 = vcmask 785408   ;;  %vm2480_vm15 = vcmask 850944  }
0x1254   :  { %v2039_v47 = vsub.f32 1.0, %v2038_v13  ;;  %v2036_v52 = vmul.f32 %v2035_v12, %v3569_v50 }
0x1255   :  { %2149 = vmatpush.msra.mxu3 %v2665_v45 }
0x1256   :  { %v2040_v56 = vmul.f32 %v2779_v5, %v2039_v47  ;;  %v2068_v54 = vmul.f32 %v2036_v52, %v2896_v39  ;;  %2584 = vmatmul.msk.f32.gmra.mxu1 %vm172_vm1, %v2036_v52 }
0x1258   :  { %v2041_v60 = vadd.f32 %v2779_v5, %v2040_v56  ;;  %v2074_v6 = vsel %vm172_vm1, %v2068_v54, 0.0  ;;  %v2162_v62 = vpop.permute.xlu1 %2161 }
0x1259   :  { %2075 = vadd.xlane.f32.xlu2 %v2074_v6 }
0x125a   :  { %v2045_v4 = vsel %vm2044_vm2, %v2779_v5, %v2041_v60  ;;  %vm2483_vm2 = vcmask 916480  }
0x125b   :  { %v2050_v7 = vsel %vm2047_vm3, %v2049_v61, %v2045_v4  ;;  %v2158_v15 = vpop.permute.xlu0 %2157  ;;  %vm2486_vm3 = vcmask 982016  }
0x125c   :  { %v2051_v50 = vmul.f32 %v2050_v7, %v3575_v1  ;;  %v2187_v1 = vunpack.c.l.s4 %v2785_v59 }
0x125e   :  { %2585 = vmatmul.msk.f32.vlgmr.msra.gmra.mxu3 %vm172_vm1, %v2051_v50  ;;  %v2069_v10 = vmul.f32 %v2051_v50, %v2908_v51  ;;  %v3614_v32 = vunpack.c.0.s8 %v2187_v1 }
0x1260   :  { %v2077_v39 = vsel %vm172_vm1, %v2069_v10, 0.0 }
0x1261   :  { %2078 = vadd.xlane.f32.xlu0 %v2077_v39 }
0x1263   :  { %v2160_v22 = vpop.permute.xlu0 %2159 }
0x1266   :  { %2586 = vmatmul.msk.f32.gmra.mxu3 %vm172_vm1, %v2066_v37 }
0x126b   :  { %v3609_v24 = vpop.permute.xlu0 %2163 }
0x12c2   :  { %v2082_v61 = vpop.xlane.xlu1 %2081 }
0x12c3   :  { %v2086_v10 = vmul.f32 %v3507_v44, %v2082_v61 }
0x12c4   :  { %v2073_v8 = vpop.xlane.xlu0 %2072 }
0x12c5   :  { %v2083_v49 = vmul.f32 %v3507_v44, %v2073_v8 }
0x12cb   :  { %v2116_v43 = vpop.f32.mrf.mxu1 }
0x12cc   :  { %v2117_v31 = vadd.f32 %v2116_v43, %v2083_v49  ;;  %v2076_v34 = vpop.xlane.xlu2 %2075 }
0x12cd   :  { %v2084_v35 = vmul.f32 %v3507_v44, %v2076_v34 }
0x12ce   :  { %v2169_v51 = vadd.f32 %v2158_v15, %v2117_v31 }
0x12d0   :  { %v2173_v3 = vrot.slane %v2169_v51, 4  ;;  %v2179_v21 = vperm.slane %v2169_v51, %v3612_v30 }
0x12d2   :  { %v2175_v9 = vsel %vm2174_vm4, 0.0, %v2173_v3  ;;  %v2184_v23 = vrot.slane %v2179_v21, 4  ;;  %v3619_v46 = vperm.slane %v2179_v21, %v3614_v32 }
0x12d3   :  { %v2183_v14 = vperm.slane %v2175_v9, %v3612_v30  ;;  %v2119_v18 = vpop.f32.mrf.mxu1 }
0x12d4   :  { %v2120_v16 = vadd.f32 %v2119_v18, %v2084_v35  ;;  %v2204_v48 = vrot.slane %v3619_v46, 4  ;;  %v2185_v36 = vsel %vm2174_vm4, 0.0, %v2184_v23  ;;  %v2079_v2 = vpop.xlane.xlu0 %2078 }
0x12d5   :  { %v2194_v11 = vrot.slane %v2183_v14, 4  ;;  %v2193_v55 = vperm.slane %v2185_v36, %v3614_v32  ;;  %v2199_v40 = vperm.slane %v2183_v14, %v3614_v32  ;;  %v2085_v0 = vmul.f32 %v3507_v44, %v2079_v2 }
0x12d6   :  { %v2170_v19 = vadd.f32 %v2160_v22, %v2120_v16  ;;  %v2205_v37 = vsel %vm2174_vm4, 0.0, %v2204_v48 }
0x12d7   :  { %2328 = vrot.lane.b32.xlu0 %v2205_v37, %s2786_s1  ;;  %2336 = vrot.lane.b32.xlu2 %v2193_v55, %s2787_s29  ;;  %v2206_v53 = vrot.slane %v2193_v55, 4  ;;  %v2195_v17 = vsel %vm2174_vm4, 0.0, %v2194_v11  ;;  %v2208_v45 = vrot.slane %v2199_v40, 4 }
0x12d8   :  { %v2203_v63 = vperm.slane %v2195_v17, %v3614_v32  ;;  %v2217_v38 = vperm.slane %v2170_v19, %v3612_v30  ;;  %v2212_v41 = vrot.slane %v2170_v19, 4 }
0x12d9   :  { %v2207_v28 = vsel %vm2174_vm4, 0.0, %v2206_v53  ;;  %v2209_v58 = vsel %vm2174_vm4, 0.0, %v2208_v45 }
0x12da   :  { %2344 = vrot.lane.b32.xlu1 %v2207_v28, %s2788_s30  ;;  %v2210_v29 = vrot.slane %v2203_v63, 4  ;;  %v2227_v42 = vperm.slane %v2217_v38, %v3614_v32  ;;  %v2222_v57 = vrot.slane %v2217_v38, 4  ;;  %v2213_v20 = vsel %vm2174_vm4, 0.0, %v2212_v41 }
0x12db   :  { %v2221_v52 = vperm.slane %v2213_v20, %v3612_v30 }
0x12dc   :  { %v2211_v13 = vsel %vm2174_vm4, 0.0, %v2210_v29  ;;  %v2242_v12 = vrot.slane %v2227_v42, 4  ;;  %v2223_v56 = vsel %vm2174_vm4, 0.0, %v2222_v57 }
0x12dd   :  { %v2231_v6 = vperm.slane %v2223_v56, %v3614_v32  ;;  %v2237_v4 = vperm.slane %v2221_v52, %v3614_v32  ;;  %v2232_v1 = vrot.slane %v2221_v52, 4 }
0x12de   :  { %v2243_v54 = vsel %vm2174_vm4, 0.0, %v2242_v12 }
0x12df   :  { %2352 = vrot.lane.b32.xlu0 %v2199_v40, %s2789_s3  ;;  %2368 = vrot.lane.b32.xlu2 %v2203_v63, %s2790_s4  ;;  %v2246_v39 = vrot.slane %v2237_v4, 4  ;;  %v2244_v49 = vrot.slane %v2231_v6, 4  ;;  %v2233_v21 = vsel %vm2174_vm4, 0.0, %v2232_v1 }
0x12e0   :  { %v2241_v35 = vperm.slane %v2233_v21, %v3614_v32 }
0x12e1   :  { %v2151_v5 = vpop.f32.mrf.mxu3  ;;  %v2247_v8 = vsel %vm2174_vm4, 0.0, %v2246_v39  ;;  %v2245_v31 = vsel %vm2174_vm4, 0.0, %v2244_v49 }
0x12e2   :  { %v2152_v26 = vadd.f32 %v2151_v5, %v2085_v0  ;;  %2376 = vrot.lane.b32.xlu1 %v2211_v13, %s2791_s5  ;;  %v2248_v5 = vrot.slane %v2241_v35, 4 }
0x12e4   :  { %v2171_v47 = vadd.f32 %v2162_v62, %v2152_v26  ;;  %v2249_v57 = vsel %vm2174_vm4, 0.0, %v2248_v5 }
0x12e6   :  { %v2250_v33 = vrot.slane %v2171_v47, 4 }
0x12e7   :  { %2360 = vrot.lane.b32.xlu0 %v2209_v58, %s2792_s6  ;;  %2392 = vrot.lane.b32.xlu2 %v2243_v54, %s2793_s7 }
0x12e8   :  { %v2251_v60 = vsel %vm2174_vm4, 0.0, %v2250_v33 }
0x12e9   :  { %v2259_v7 = vperm.slane %v2251_v60, %v3612_v30  ;;  %v2154_v50 = vpop.f32.mrf.mxu3 }
0x12ea   :  { %2400 = vrot.lane.b32.xlu1 %v2231_v6, %s2794_s8  ;;  %v2155_v15 = vadd.f32 %v2154_v50, %v2086_v10 }
0x12eb   :  { %v2270_v22 = vrot.slane %v2259_v7, 4  ;;  %v2275_v25 = vperm.slane %v2259_v7, %v3614_v32 }
0x12ec   :  { %v2172_v27 = vadd.f32 %v3609_v24, %v2155_v15  ;;  %v2255_v24 = vperm.slane %v2171_v47, %v3612_v30 }
0x12ed   :  { %v2271_v44 = vsel %vm2174_vm4, 0.0, %v2270_v22  ;;  %v2284_v59 = vrot.slane %v2275_v25, 4 }
0x12ee   :  { %v2293_v43 = vperm.slane %v2172_v27, %v3612_v30  ;;  %v2279_v51 = vperm.slane %v2271_v44, %v3614_v32  ;;  %v2288_v23 = vrot.slane %v2172_v27, 4  ;;  %v3671_v14 = vperm.slane %v2255_v24, %v3614_v32 }
0x12ef   :  { %2384 = vrot.lane.b32.xlu0 %v2227_v42, %s2795_s9  ;;  %2416 = vrot.lane.b32.xlu2 %v2237_v4, %s2796_s10  ;;  %v2285_v34 = vsel %vm2174_vm4, 0.0, %v2284_v59  ;;  %v2260_v53 = vrot.slane %v2255_v24, 4 }
0x12f0   :  { %v2298_v3 = vrot.slane %v2293_v43, 4  ;;  %v2286_v9 = vrot.slane %v2279_v51, 4  ;;  %v2289_v48 = vsel %vm2174_vm4, 0.0, %v2288_v23  ;;  %v2303_v36 = vperm.slane %v2293_v43, %v3614_v32 }
0x12f1   :  { %v2297_v55 = vperm.slane %v2289_v48, %v3612_v30  ;;  %v2280_v19 = vrot.slane %v3671_v14, 4  ;;  %v2261_v30 = vsel %vm2174_vm4, 0.0, %v2260_v53 }
0x12f2   :  { %2424 = vrot.lane.b32.xlu1 %v2247_v8, %s2783_s24  ;;  %v2287_v18 = vsel %vm2174_vm4, 0.0, %v2286_v9  ;;  %v2299_v16 = vsel %vm2174_vm4, 0.0, %v2298_v3  ;;  %v2269_v40 = vperm.slane %v2261_v30, %v3614_v32  ;;  %v2318_v26 = vrot.slane %v2303_v36, 4 }
0x12f3   :  { %v2307_v11 = vperm.slane %v2299_v16, %v3614_v32  ;;  %v2281_v17 = vsel %vm2174_vm4, 0.0, %v2280_v19  ;;  %v2313_v28 = vperm.slane %v2297_v55, %v3614_v32  ;;  %v2308_v63 = vrot.slane %v2297_v55, 4 }
0x12f4   :  { %v2282_v0 = vrot.slane %v2269_v40, 4  ;;  %v2319_v13 = vsel %vm2174_vm4, 0.0, %v2318_v26 }
0x12f5   :  { %v2320_v37 = vrot.slane %v2307_v11, 4  ;;  %v2322_v2 = vrot.slane %v2313_v28, 4  ;;  %v2309_v29 = vsel %vm2174_vm4, 0.0, %v2308_v63 }
0x12f6   :  { %v2317_v42 = vperm.slane %v2309_v29, %v3614_v32  ;;  %v2283_v62 = vsel %vm2174_vm4, 0.0, %v2282_v0 }
0x12f7   :  { %2408 = vrot.lane.b32.xlu0 %v2245_v31, %s2797_s11  ;;  %2354 = vrot.lane.b32.xlu2 %v2275_v25, %s2789_s3  ;;  %v2321_v38 = vsel %vm2174_vm4, 0.0, %v2320_v37  ;;  %v2323_v41 = vsel %vm2174_vm4, 0.0, %v2322_v2 }
0x12f8   :  { %v2324_v20 = vrot.slane %v2317_v42, 4 }
0x12fa   :  { %2362 = vrot.lane.b32.xlu1 %v2285_v34, %s2792_s6  ;;  %v2325_v45 = vsel %vm2174_vm4, 0.0, %v2324_v20 }
0x12ff   :  { %2432 = vrot.lane.b32.xlu0 %v2241_v35, %s2782_s21  ;;  %2378 = vrot.lane.b32.xlu2 %v2287_v18, %s2791_s5 }
0x1302   :  { %2386 = vrot.lane.b32.xlu1 %v2303_v36, %s2795_s9 }
0x1307   :  { %2330 = vrot.lane.b32.xlu0 %v2281_v17, %s2786_s1  ;;  %2402 = vrot.lane.b32.xlu2 %v2307_v11, %s2794_s8 }
0x130a   :  { %2410 = vrot.lane.b32.xlu1 %v2321_v38, %s2797_s11 }
0x130f   :  { %2338 = vrot.lane.b32.xlu0 %v2269_v40, %s2787_s29  ;;  %2426 = vrot.lane.b32.xlu2 %v2323_v41, %s2783_s24 }
0x1312   :  { %2434 = vrot.lane.b32.xlu1 %v2317_v42, %s2782_s21 }
0x1317   :  { %2346 = vrot.lane.b32.xlu0 %v2283_v62, %s2788_s30  ;;  %2440 = vrot.lane.b32.xlu2 %v2249_v57, %s2781_s0 }
0x131f   :  { %2370 = vrot.lane.b32.xlu0 %v2279_v51, %s2790_s4 }
0x1327   :  { %2394 = vrot.lane.b32.xlu0 %v2319_v13, %s2793_s7 }
0x132f   :  { %2418 = vrot.lane.b32.xlu0 %v2313_v28, %s2796_s10 }
0x1331   :  { %v2337_v32 = vpop.permute.xlu2 %2336 }
0x1337   :  { %2442 = vrot.lane.b32.xlu0 %v2325_v45, %s2781_s0 }
0x1339   :  { %v2369_v12 = vpop.permute.xlu2 %2368 }
0x1341   :  { %v2393_v47 = vpop.permute.xlu2 %2392 }
0x1349   :  { %v2417_v52 = vpop.permute.xlu2 %2416  ;;  %v2329_v33 = vpop.permute.xlu0 %2328 }
0x134a   :  { %v2446_v60 = vsel %vm73_vm0, %v3619_v46, %v2329_v33 }
0x134b   :  { %v2448_v6 = vsel %vm172_vm1, %v2446_v60, %v2337_v32 }
0x134c   :  { %v2345_v54 = vpop.permute.xlu1 %2344 }
0x134d   :  { %v2451_v7 = vsel %vm2450_vm5, %v2448_v6, %v2345_v54 }
0x1351   :  { %v2355_v56 = vpop.permute.xlu2 %2354  ;;  %v2353_v58 = vpop.permute.xlu0 %2352 }
0x1352   :  { %v2454_v50 = vsel %vm2453_vm6, %v2451_v7, %v2353_v58 }
0x1354   :  { %v2377_v10 = vpop.permute.xlu1 %2376 }
0x1359   :  { %v2379_v61 = vpop.permute.xlu2 %2378  ;;  %v2361_v4 = vpop.permute.xlu0 %2360 }
0x135a   :  { %v2457_v39 = vsel %vm2456_vm7, %v2454_v50, %v2361_v4 }
0x135b   :  { %v2460_v15 = vsel %vm2459_vm8, %v2457_v39, %v2369_v12 }
0x135c   :  { %v2463_v8 = vsel %vm2462_vm9, %v2460_v15, %v2377_v10  ;;  %v2401_v27 = vpop.permute.xlu1 %2400 }
0x1361   :  { %v2403_v22 = vpop.permute.xlu2 %2402  ;;  %v2385_v46 = vpop.permute.xlu0 %2384 }
0x1362   :  { %v2466_v25 = vsel %vm2465_vm10, %v2463_v8, %v2385_v46 }
0x1363   :  { %v2469_v49 = vsel %vm2468_vm11, %v2466_v25, %v2393_v47 }
0x1364   :  { %v2472_v1 = vsel %vm2471_vm12, %v2469_v49, %v2401_v27  ;;  %v2425_v51 = vpop.permute.xlu1 %2424 }
0x1369   :  { %v2427_v44 = vpop.permute.xlu2 %2426  ;;  %v2409_v59 = vpop.permute.xlu0 %2408 }
0x136a   :  { %v2475_v43 = vsel %vm2474_vm13, %v2472_v1, %v2409_v59 }
0x136b   :  { %v2478_v31 = vsel %vm2477_vm14, %v2475_v43, %v2417_v52 }
0x136c   :  { %v2481_v24 = vsel %vm2480_vm15, %v2478_v31, %v2425_v51  ;;  %v2363_v48 = vpop.permute.xlu1 %2362 }
0x1371   :  { %v2441_v34 = vpop.permute.xlu2 %2440  ;;  %v2433_v3 = vpop.permute.xlu0 %2432 }
0x1372   :  { %v2484_v21 = vsel %vm2483_vm2, %v2481_v24, %v2433_v3 }
0x1373   :  { %v2487_v9 = vsel %vm2486_vm3, %v2484_v21, %v2441_v34 }
0x1374   :  { %2489 = vst [vmem:[%s3746_s2] sm:$0x1] %v2487_v9  ;;  %v2387_v28 = vpop.permute.xlu1 %2386 }
0x1379   :  { %v2331_v23 = vpop.permute.xlu0 %2330 }
0x137a   :  { %v2447_v18 = vsel %vm73_vm0, %v3671_v14, %v2331_v23 }
0x137c   :  { %v2411_v2 = vpop.permute.xlu1 %2410 }
0x1381   :  { %v2339_v35 = vpop.permute.xlu0 %2338 }
0x1382   :  { %v2449_v36 = vsel %vm172_vm1, %v2447_v18, %v2339_v35 }
0x1384   :  { %v2435_v0 = vpop.permute.xlu1 %2434 }
0x1389   :  { %v2347_v16 = vpop.permute.xlu0 %2346 }
0x138a   :  { %v2452_v11 = vsel %vm2450_vm5, %v2449_v36, %v2347_v16 }
0x138b   :  { %v2455_v55 = vsel %vm2453_vm6, %v2452_v11, %v2355_v56 }
0x138c   :  { %v2458_v19 = vsel %vm2456_vm7, %v2455_v55, %v2363_v48 }
0x1391   :  { %v2371_v37 = vpop.permute.xlu0 %2370 }
0x1392   :  { %v2461_v53 = vsel %vm2459_vm8, %v2458_v19, %v2371_v37 }
0x1393   :  { %v2464_v17 = vsel %vm2462_vm9, %v2461_v53, %v2379_v61 }
0x1394   :  { %v2467_v63 = vsel %vm2465_vm10, %v2464_v17, %v2387_v28 }
0x1399   :  { %v2395_v38 = vpop.permute.xlu0 %2394 }
0x139a   :  { %v2470_v14 = vsel %vm2468_vm11, %v2467_v63, %v2395_v38 }
0x139b   :  { %v2473_v30 = vsel %vm2471_vm12, %v2470_v14, %v2403_v22 }
0x139c   :  { %v2476_v29 = vsel %vm2474_vm13, %v2473_v30, %v2411_v2 }
0x13a1   :  { %v2419_v40 = vpop.permute.xlu0 %2418 }
0x13a2   :  { %v2479_v41 = vsel %vm2477_vm14, %v2476_v29, %v2419_v40 }
0x13a3   :  { %v2482_v42 = vsel %vm2480_vm15, %v2479_v41, %v2427_v44 }
0x13a4   :  { %v2485_v5 = vsel %vm2483_vm2, %v2482_v42, %v2435_v0 }
0x13a9   :  { %v2443_v62 = vpop.permute.xlu0 %2442 }
0x13aa   :  { %v2488_v57 = vsel %vm2486_vm3, %v2485_v5, %v2443_v62 }
0x13ab   :  { %2490 = vst [vmem:[%s3746_s2 + $0x1] sm:$0x1] %v2488_v57 }

</bundles_post_ra>
